<compile_context>
chip_gen: v7x
topology: tpu7x:2x2x1
jax: 0.10.0
libtpu: 0.0.40
codegen_flags: <defaults>
</compile_context>

<pallas_src>
import jax
import jax.numpy as jnp
from jax.experimental import pallas as pl
from jax.experimental.pallas import tpu as pltpu

LANES = 128
C1_OUT, C2_OUT = 18, 28
KSIZE = 5
NUM_CLASSES = 100


# ----------------------------- Pallas kernels ------------------------------ #

def _conv_pool_relu_kernel(p_ref, w_ref, b_ref, o_ref):
    """Fused conv-as-matmul + bias + MaxPool2d(2) + ReLU.

    p_ref: (4, tm, K) bf16 patch groups; group g = pool offset (g//2, g%2)
    w_ref: (K, Coutp) bf16, K ordered (kh, kw, cin)
    b_ref: (1, Coutp) f32
    o_ref: (tm, Coutp) bf16 pooled+ReLU'd rows in (b, oh, ow) order
    """
    w = w_ref[...]
    y0 = jnp.dot(p_ref[0], w, preferred_element_type=jnp.float32)
    y1 = jnp.dot(p_ref[1], w, preferred_element_type=jnp.float32)
    y2 = jnp.dot(p_ref[2], w, preferred_element_type=jnp.float32)
    y3 = jnp.dot(p_ref[3], w, preferred_element_type=jnp.float32)
    pooled = jnp.maximum(jnp.maximum(y0, y1), jnp.maximum(y2, y3))
    o_ref[...] = jnp.maximum(pooled + b_ref[...], 0.0).astype(o_ref.dtype)


def conv_pool_relu(patches, w, b):
    g, mp, k = patches.shape
    kw, coutp = w.shape
    assert g == 4 and kw == k
    # Tile M only when it is big enough to benefit from pipelining / megacore
    # splitting; at batch 2 (mp = 392 / 50) one resident block is fastest.
    tm = 256 if (mp > 512 and mp % 256 == 0) else mp
    return pl.pallas_call(
        _conv_pool_relu_kernel,
        out_shape=jax.ShapeDtypeStruct((mp, coutp), jnp.bfloat16),
        grid_spec=pltpu.PrefetchScalarGridSpec(
            num_scalar_prefetch=0,
            grid=(mp // tm,),
            in_specs=[
                pl.BlockSpec((4, tm, k), lambda i: (0, i, 0)),
                pl.BlockSpec((k, coutp), lambda i: (0, 0)),
                pl.BlockSpec((1, coutp), lambda i: (0, 0)),
            ],
            out_specs=pl.BlockSpec((tm, coutp), lambda i: (i, 0)),
        ),
        compiler_params=pltpu.CompilerParams(
            dimension_semantics=("parallel",)),
    )(patches, w, b)


def _classifier_kernel(x_ref, w1_ref, b1_ref, w2_ref, b2_ref, w3_ref, b3_ref,
                       o_ref):
    """fc1 + ReLU + fc2 + ReLU + fc3 fused; bf16 weights, f32 accumulation."""
    h = jnp.dot(x_ref[...], w1_ref[...], preferred_element_type=jnp.float32)
    h = jnp.maximum(h + b1_ref[...], 0.0).astype(jnp.bfloat16)
    h = jnp.dot(h, w2_ref[...], preferred_element_type=jnp.float32)
    h = jnp.maximum(h + b2_ref[...], 0.0).astype(jnp.bfloat16)
    h = jnp.dot(h, w3_ref[...], preferred_element_type=jnp.float32)
    o_ref[...] = (h + b3_ref[...]).astype(o_ref.dtype)


def classifier_fused(x, w1, b1, w2, b2, w3, b3):
    bsz = x.shape[0]
    np_ = w3.shape[1]
    # ~0.8 MB of bf16 weights + tiny activations: everything fits in VMEM, so
    # a single whole-block invocation keeps all intermediates on-chip.
    return pl.pallas_call(
        _classifier_kernel,
        out_shape=jax.ShapeDtypeStruct((bsz, np_), jnp.float32),
    )(x, w1, b1, w2, b2, w3, b3)


# ------------------------------- host glue --------------------------------- #

def build_pool_patches(x, k):
    """im2col fused with the 2x2/stride-2 pool decomposition.

    Returns (patches, (Ho, Wo)) where patches is (4, B*Ho*Wo, k*k*C): group
    g = py*2+px holds the conv patches for pool-window offset (py, px), rows
    ordered (b, oh, ow), K ordered (kh, kw, cin).  Built from strided slices
    and one concat only -- no activation transpose.
    # TODO(synk): patch extraction stays in XLA; at batch 2 its HBM cost is
    # negligible, a fully in-kernel im2col would be the next fusion step.
    """
    bsz, h, w, c = x.shape
    hv, wv = h - k + 1, w - k + 1
    assert hv % 2 == 0 and wv % 2 == 0, "MaxPool2d(2) needs even conv output"
    ho, wo = hv // 2, wv // 2
    groups = []
    for py in range(2):
        for px in range(2):
            taps = []
            for dy in range(k):
                for dx in range(k):
                    taps.append(x[:, py + dy:py + dy + 2 * ho:2,
                                  px + dx:px + dx + 2 * wo:2, :])
            grp = jnp.concatenate(taps, axis=-1)          # (B, Ho, Wo, k*k*C)
            groups.append(grp.reshape(bsz * ho * wo, k * k * c))
    return jnp.stack(groups, axis=0), (ho, wo)


def _pad_axis(a, axis, new_size):
    pad = [(0, 0)] * a.ndim
    pad[axis] = (0, new_size - a.shape[axis])
    return jnp.pad(a, pad)


def _prep_conv(w_oihw, b, coutp=LANES):
    cout, cin, kh, kw = w_oihw.shape
    wm = jnp.transpose(w_oihw, (2, 3, 1, 0)).reshape(kh * kw * cin, cout)
    wm = _pad_axis(wm, 1, coutp).astype(jnp.bfloat16)
    bm = _pad_axis(b.reshape(1, -1), 1, coutp).astype(jnp.float32)
    return wm, bm


def _prep_fc(w_in_out, b, n_pad, k_pad=None):
    wm = w_in_out
    if k_pad is not None:
        wm = _pad_axis(wm, 0, k_pad)
    wm = _pad_axis(wm, 1, n_pad).astype(jnp.bfloat16)
    bm = _pad_axis(b.reshape(1, -1), 1, n_pad).astype(jnp.float32)
    return wm, bm


def prepare_params(p):
    """One-time conversion of torch-layout params to kernel layout: reorder
    conv K to (kh,kw,cin), permute fc1 rows from torch's (C,H,W) flatten order
    to our (H,W,C) NHWC flatten, zero-pad widths to 128-lane multiples, and
    cast weights to bf16 (biases stay f32)."""
    q = {}
    q['c1_w'], q['c1_b'] = _prep_conv(p['c1_w'], p['c1_b'])
    q['c2_w'], q['c2_b'] = _prep_conv(p['c2_w'], p['c2_b'])
    c, hh, ww = C2_OUT, 5, 5
    fc1 = p['fc1_w'].reshape(c, hh, ww, -1).transpose(1, 2, 0, 3)
    fc1 = fc1.reshape(c * hh * ww, -1)
    q['fc1_w'], q['fc1_b'] = _prep_fc(fc1, p['fc1_b'], n_pad=384)
    q['fc2_w'], q['fc2_b'] = _prep_fc(p['fc2_w'], p['fc2_b'], n_pad=256,
                                      k_pad=384)
    q['fc3_w'], q['fc3_b'] = _prep_fc(p['fc3_w'], p['fc3_b'], n_pad=LANES,
                                      k_pad=256)
    return q


def init_params(key):
    """Random parameters in PyTorch-equivalent layout: conv (Cout,Cin,kh,kw);
    linear stored as (in_features, out_features) with fc1 rows in torch's
    (C,H,W) flatten order."""
    ks = jax.random.split(key, 10)

    def conv_init(kw_key, kb_key, cout, cin, ksz):
        w = jax.random.normal(kw_key, (cout, cin, ksz, ksz), jnp.float32)
        w = w / ((cin * ksz * ksz) ** 0.5)
        b = jax.random.normal(kb_key, (cout,), jnp.float32) * 0.01
        return w, b

    def fc_init(kw_key, kb_key, fin, fout):
        w = jax.random.normal(kw_key, (fin, fout), jnp.float32) / (fin ** 0.5)
        b = jax.random.normal(kb_key, (fout,), jnp.float32) * 0.01
        return w, b

    p = {}
    p['c1_w'], p['c1_b'] = conv_init(ks[0], ks[1], C1_OUT, 3, KSIZE)
    p['c2_w'], p['c2_b'] = conv_init(ks[2], ks[3], C2_OUT, C1_OUT, KSIZE)
    p['fc1_w'], p['fc1_b'] = fc_init(ks[4], ks[5], C2_OUT * 5 * 5, 360)
    p['fc2_w'], p['fc2_b'] = fc_init(ks[6], ks[7], 360, 252)
    p['fc3_w'], p['fc3_b'] = fc_init(ks[8], ks[9], 252, NUM_CLASSES)
    return p


def lenet_color_forward(x_nchw, params):
    """LeNetColor forward (inference) with prepared kernel-layout params.
    x_nchw: (B, 3, 32, 32) f32 -> logits (B, 100) f32."""
    x = jnp.transpose(x_nchw, (0, 2, 3, 1)).astype(jnp.bfloat16)    # NHWC
    bsz = x.shape[0]

    # Stage 1: Conv2d(3->18, 5, valid) + MaxPool2d(2) + ReLU   (one kernel)
    p1, (ho1, wo1) = build_pool_patches(x, KSIZE)
    y1 = conv_pool_relu(p1, params['c1_w'], params['c1_b'])
    y1 = y1.reshape(bsz, ho1, wo1, LANES)[..., :C1_OUT]

    # Stage 2: Conv2d(18->28, 5, valid) + MaxPool2d(2) + ReLU  (one kernel)
    p2, (ho2, wo2) = build_pool_patches(y1, KSIZE)
    y2 = conv_pool_relu(p2, params['c2_w'], params['c2_b'])
    y2 = y2.reshape(bsz, ho2, wo2, LANES)[..., :C2_OUT]

    # Classifier (fc1+ReLU+fc2+ReLU+fc3 in one kernel).  NHWC flatten is
    # (H,W,C); fc1 rows were pre-permuted to match torch's x.view(B,-1).
    feat = y2.reshape(bsz, ho2 * wo2 * C2_OUT)
    logits = classifier_fused(feat,
                              params['fc1_w'], params['fc1_b'],
                              params['fc2_w'], params['fc2_b'],
                              params['fc3_w'], params['fc3_b'])
    return logits[:, :NUM_CLASSES]


if __name__ == "__main__":
    # Classifier input dim 28*5*5 forces 3x32x32 inputs: (32-4)/2 -> 14,
    # (14-4)/2 -> 5.
    key = jax.random.PRNGKey(0)
    kx, kp = jax.random.split(key)
    x = jax.random.normal(kx, (2, 3, 32, 32), jnp.float32)
    params = prepare_params(init_params(kp))

    fwd = jax.jit(lenet_color_forward)
    out = jax.block_until_ready(fwd(x, params))
    assert out.shape == (2, NUM_CLASSES), out.shape
    assert bool(jnp.all(jnp.isfinite(out))), "non-finite logits"
    print("KERNEL_OK")
</pallas_src>

<mosaic_0001>
module attributes {stable_mosaic.version = 11 : i64} {
  func.func @_conv_pool_relu_kernel(%arg0: i32, %arg1: memref<4x392x75xbf16, #tpu.memory_space<vmem>>, %arg2: memref<75x128xbf16, #tpu.memory_space<vmem>>, %arg3: memref<1x128xf32, #tpu.memory_space<vmem>>, %arg4: memref<392x128xbf16, #tpu.memory_space<vmem>>) attributes {dimension_semantics = [#tpu.dimension_semantics<parallel>], iteration_bounds = array<i64: 1>, scalar_prefetch = 0 : i64, scratch_operands = 0 : i64, tpu.core_type = #tpu.core_type<tc>, window_params = [{transform_indices = @transform_0, window_bounds = array<i64: 4, 392, 75>}, {pipeline_mode = #tpu.pipeline_mode<synchronous>, transform_indices = @transform_1, window_bounds = array<i64: 75, 128>}, {pipeline_mode = #tpu.pipeline_mode<synchronous>, transform_indices = @transform_2, window_bounds = array<i64: 1, 128>}, {transform_indices = @transform_3, window_bounds = array<i64: 392, 128>}]} {
    %c0 = arith.constant 0 : index
    %c0_0 = arith.constant 0 : index
    %0 = vector.load %arg2[%c0, %c0_0] : memref<75x128xbf16, #tpu.memory_space<vmem>>, vector<75x128xbf16>
    %c0_1 = arith.constant 0 : index
    %c0_2 = arith.constant 0 : index
    %c0_3 = arith.constant 0 : index
    %1 = vector.load %arg1[%c0_1, %c0_2, %c0_3] : memref<4x392x75xbf16, #tpu.memory_space<vmem>>, vector<1x392x75xbf16>
    %2 = vector.shape_cast %1 : vector<1x392x75xbf16> to vector<392x75xbf16>
    %cst = arith.constant dense<0.000000e+00> : vector<392x128xf32>
    %3 = tpu.matmul %2, %0, %cst {dimension_numbers = #tpu.dot_dimension_numbers<[1], [0], [0], [1], [0, 0, 1, 1], [], []>} : vector<392x75xbf16>, vector<75x128xbf16>, vector<392x128xf32> -> vector<392x128xf32>
    %c1 = arith.constant 1 : index
    %c0_4 = arith.constant 0 : index
    %c0_5 = arith.constant 0 : index
    %4 = vector.load %arg1[%c1, %c0_4, %c0_5] : memref<4x392x75xbf16, #tpu.memory_space<vmem>>, vector<1x392x75xbf16>
    %5 = vector.shape_cast %4 : vector<1x392x75xbf16> to vector<392x75xbf16>
    %cst_6 = arith.constant dense<0.000000e+00> : vector<392x128xf32>
    %6 = tpu.matmul %5, %0, %cst_6 {dimension_numbers = #tpu.dot_dimension_numbers<[1], [0], [0], [1], [0, 0, 1, 1], [], []>} : vector<392x75xbf16>, vector<75x128xbf16>, vector<392x128xf32> -> vector<392x128xf32>
    %c2 = arith.constant 2 : index
    %c0_7 = arith.constant 0 : index
    %c0_8 = arith.constant 0 : index
    %7 = vector.load %arg1[%c2, %c0_7, %c0_8] : memref<4x392x75xbf16, #tpu.memory_space<vmem>>, vector<1x392x75xbf16>
    %8 = vector.shape_cast %7 : vector<1x392x75xbf16> to vector<392x75xbf16>
    %cst_9 = arith.constant dense<0.000000e+00> : vector<392x128xf32>
    %9 = tpu.matmul %8, %0, %cst_9 {dimension_numbers = #tpu.dot_dimension_numbers<[1], [0], [0], [1], [0, 0, 1, 1], [], []>} : vector<392x75xbf16>, vector<75x128xbf16>, vector<392x128xf32> -> vector<392x128xf32>
    %c3 = arith.constant 3 : index
    %c0_10 = arith.constant 0 : index
    %c0_11 = arith.constant 0 : index
    %10 = vector.load %arg1[%c3, %c0_10, %c0_11] : memref<4x392x75xbf16, #tpu.memory_space<vmem>>, vector<1x392x75xbf16>
    %11 = vector.shape_cast %10 : vector<1x392x75xbf16> to vector<392x75xbf16>
    %cst_12 = arith.constant dense<0.000000e+00> : vector<392x128xf32>
    %12 = tpu.matmul %11, %0, %cst_12 {dimension_numbers = #tpu.dot_dimension_numbers<[1], [0], [0], [1], [0, 0, 1, 1], [], []>} : vector<392x75xbf16>, vector<75x128xbf16>, vector<392x128xf32> -> vector<392x128xf32>
    %13 = arith.maximumf %3, %6 : vector<392x128xf32>
    %14 = arith.maximumf %9, %12 : vector<392x128xf32>
    %15 = arith.maximumf %13, %14 : vector<392x128xf32>
    %c0_13 = arith.constant 0 : index
    %c0_14 = arith.constant 0 : index
    %16 = vector.load %arg3[%c0_13, %c0_14] : memref<1x128xf32, #tpu.memory_space<vmem>>, vector<1x128xf32>
    %17 = vector.broadcast %16 : vector<1x128xf32> to vector<392x128xf32>
    %18 = arith.addf %15, %17 : vector<392x128xf32>
    %cst_15 = arith.constant 0.000000e+00 : f32
    %19 = vector.broadcast %cst_15 : f32 to vector<392x128xf32>
    %20 = arith.maximumf %18, %19 : vector<392x128xf32>
    %21 = arith.truncf %20 : vector<392x128xf32> to vector<392x128xbf16>
    %c0_16 = arith.constant 0 : index
    %c0_17 = arith.constant 0 : index
    %22 = vector.load %arg4[%c0_16, %c0_17] : memref<392x128xbf16, #tpu.memory_space<vmem>>, vector<392x128xbf16>
    tpu.vector_store %arg4[%c0_16, %c0_17], %21 {strides = array<i32>} : memref<392x128xbf16, #tpu.memory_space<vmem>>, vector<392x128xbf16>,
    return
  }
  func.func @transform_0(%arg0: i32) -> (i32, i32, i32) {
    %c0_i32 = arith.constant 0 : i32
    %c0_i32_0 = arith.constant 0 : i32
    %c0_i32_1 = arith.constant 0 : i32
    return %c0_i32, %arg0, %c0_i32_0 : i32, i32, i32
  }
  func.func @transform_1(%arg0: i32) -> (i32, i32) {
    %c0_i32 = arith.constant 0 : i32
    %c0_i32_0 = arith.constant 0 : i32
    %c0_i32_1 = arith.constant 0 : i32
    return %c0_i32, %c0_i32_0 : i32, i32
  }
  func.func @transform_2(%arg0: i32) -> (i32, i32) {
    %c0_i32 = arith.constant 0 : i32
    %c0_i32_0 = arith.constant 0 : i32
    %c0_i32_1 = arith.constant 0 : i32
    return %c0_i32, %c0_i32_0 : i32, i32
  }
  func.func @transform_3(%arg0: i32) -> (i32, i32) {
    %c0_i32 = arith.constant 0 : i32
    %c0_i32_0 = arith.constant 0 : i32
    return %arg0, %c0_i32 : i32, i32
  }
}

module attributes {stable_mosaic.version = 11 : i64} {
  func.func @_conv_pool_relu_kernel(%arg0: i32, %arg1: memref<4x50x450xbf16, #tpu.memory_space<vmem>>, %arg2: memref<450x128xbf16, #tpu.memory_space<vmem>>, %arg3: memref<1x128xf32, #tpu.memory_space<vmem>>, %arg4: memref<50x128xbf16, #tpu.memory_space<vmem>>) attributes {dimension_semantics = [#tpu.dimension_semantics<parallel>], iteration_bounds = array<i64: 1>, scalar_prefetch = 0 : i64, scratch_operands = 0 : i64, tpu.core_type = #tpu.core_type<tc>, window_params = [{transform_indices = @transform_0, window_bounds = array<i64: 4, 50, 450>}, {pipeline_mode = #tpu.pipeline_mode<synchronous>, transform_indices = @transform_1, window_bounds = array<i64: 450, 128>}, {pipeline_mode = #tpu.pipeline_mode<synchronous>, transform_indices = @transform_2, window_bounds = array<i64: 1, 128>}, {transform_indices = @transform_3, window_bounds = array<i64: 50, 128>}]} {
    %c0 = arith.constant 0 : index
    %c0_0 = arith.constant 0 : index
    %0 = vector.load %arg2[%c0, %c0_0] : memref<450x128xbf16, #tpu.memory_space<vmem>>, vector<450x128xbf16>
    %c0_1 = arith.constant 0 : index
    %c0_2 = arith.constant 0 : index
    %c0_3 = arith.constant 0 : index
    %1 = vector.load %arg1[%c0_1, %c0_2, %c0_3] : memref<4x50x450xbf16, #tpu.memory_space<vmem>>, vector<1x50x450xbf16>
    %2 = vector.shape_cast %1 : vector<1x50x450xbf16> to vector<50x450xbf16>
    %cst = arith.constant dense<0.000000e+00> : vector<50x128xf32>
    %3 = tpu.matmul %2, %0, %cst {dimension_numbers = #tpu.dot_dimension_numbers<[1], [0], [0], [1], [0, 0, 1, 1], [], []>} : vector<50x450xbf16>, vector<450x128xbf16>, vector<50x128xf32> -> vector<50x128xf32>
    %c1 = arith.constant 1 : index
    %c0_4 = arith.constant 0 : index
    %c0_5 = arith.constant 0 : index
    %4 = vector.load %arg1[%c1, %c0_4, %c0_5] : memref<4x50x450xbf16, #tpu.memory_space<vmem>>, vector<1x50x450xbf16>
    %5 = vector.shape_cast %4 : vector<1x50x450xbf16> to vector<50x450xbf16>
    %cst_6 = arith.constant dense<0.000000e+00> : vector<50x128xf32>
    %6 = tpu.matmul %5, %0, %cst_6 {dimension_numbers = #tpu.dot_dimension_numbers<[1], [0], [0], [1], [0, 0, 1, 1], [], []>} : vector<50x450xbf16>, vector<450x128xbf16>, vector<50x128xf32> -> vector<50x128xf32>
    %c2 = arith.constant 2 : index
    %c0_7 = arith.constant 0 : index
    %c0_8 = arith.constant 0 : index
    %7 = vector.load %arg1[%c2, %c0_7, %c0_8] : memref<4x50x450xbf16, #tpu.memory_space<vmem>>, vector<1x50x450xbf16>
    %8 = vector.shape_cast %7 : vector<1x50x450xbf16> to vector<50x450xbf16>
    %cst_9 = arith.constant dense<0.000000e+00> : vector<50x128xf32>
    %9 = tpu.matmul %8, %0, %cst_9 {dimension_numbers = #tpu.dot_dimension_numbers<[1], [0], [0], [1], [0, 0, 1, 1], [], []>} : vector<50x450xbf16>, vector<450x128xbf16>, vector<50x128xf32> -> vector<50x128xf32>
    %c3 = arith.constant 3 : index
    %c0_10 = arith.constant 0 : index
    %c0_11 = arith.constant 0 : index
    %10 = vector.load %arg1[%c3, %c0_10, %c0_11] : memref<4x50x450xbf16, #tpu.memory_space<vmem>>, vector<1x50x450xbf16>
    %11 = vector.shape_cast %10 : vector<1x50x450xbf16> to vector<50x450xbf16>
    %cst_12 = arith.constant dense<0.000000e+00> : vector<50x128xf32>
    %12 = tpu.matmul %11, %0, %cst_12 {dimension_numbers = #tpu.dot_dimension_numbers<[1], [0], [0], [1], [0, 0, 1, 1], [], []>} : vector<50x450xbf16>, vector<450x128xbf16>, vector<50x128xf32> -> vector<50x128xf32>
    %13 = arith.maximumf %3, %6 : vector<50x128xf32>
    %14 = arith.maximumf %9, %12 : vector<50x128xf32>
    %15 = arith.maximumf %13, %14 : vector<50x128xf32>
    %c0_13 = arith.constant 0 : index
    %c0_14 = arith.constant 0 : index
    %16 = vector.load %arg3[%c0_13, %c0_14] : memref<1x128xf32, #tpu.memory_space<vmem>>, vector<1x128xf32>
    %17 = vector.broadcast %16 : vector<1x128xf32> to vector<50x128xf32>
    %18 = arith.addf %15, %17 : vector<50x128xf32>
    %cst_15 = arith.constant 0.000000e+00 : f32
    %19 = vector.broadcast %cst_15 : f32 to vector<50x128xf32>
    %20 = arith.maximumf %18, %19 : vector<50x128xf32>
    %21 = arith.truncf %20 : vector<50x128xf32> to vector<50x128xbf16>
    %c0_16 = arith.constant 0 : index
    %c0_17 = arith.constant 0 : index
    %22 = vector.load %arg4[%c0_16, %c0_17] : memref<50x128xbf16, #tpu.memory_space<vmem>>, vector<50x128xbf16>
    tpu.vector_store %arg4[%c0_16, %c0_17], %21 {strides = array<i32>} : memref<50x128xbf16, #tpu.memory_space<vmem>>, vector<50x128xbf16>,
    return
  }
  func.func @transform_0(%arg0: i32) -> (i32, i32, i32) {
    %c0_i32 = arith.constant 0 : i32
    %c0_i32_0 = arith.constant 0 : i32
    %c0_i32_1 = arith.constant 0 : i32
    return %c0_i32, %arg0, %c0_i32_0 : i32, i32, i32
  }
  func.func @transform_1(%arg0: i32) -> (i32, i32) {
    %c0_i32 = arith.constant 0 : i32
    %c0_i32_0 = arith.constant 0 : i32
    %c0_i32_1 = arith.constant 0 : i32
    return %c0_i32, %c0_i32_0 : i32, i32
  }
  func.func @transform_2(%arg0: i32) -> (i32, i32) {
    %c0_i32 = arith.constant 0 : i32
    %c0_i32_0 = arith.constant 0 : i32
    %c0_i32_1 = arith.constant 0 : i32
    return %c0_i32, %c0_i32_0 : i32, i32
  }
  func.func @transform_3(%arg0: i32) -> (i32, i32) {
    %c0_i32 = arith.constant 0 : i32
    %c0_i32_0 = arith.constant 0 : i32
    return %arg0, %c0_i32 : i32, i32
  }
}

module attributes {stable_mosaic.version = 11 : i64} {
  func.func @_classifier_kernel(%arg0: memref<2x700xbf16, #tpu.memory_space<vmem>>, %arg1: memref<700x384xbf16, #tpu.memory_space<vmem>>, %arg2: memref<1x384xf32, #tpu.memory_space<vmem>>, %arg3: memref<384x256xbf16, #tpu.memory_space<vmem>>, %arg4: memref<1x256xf32, #tpu.memory_space<vmem>>, %arg5: memref<256x128xbf16, #tpu.memory_space<vmem>>, %arg6: memref<1x128xf32, #tpu.memory_space<vmem>>, %arg7: memref<2x128xf32, #tpu.memory_space<vmem>>) attributes {dimension_semantics = [], scalar_prefetch = 0 : i64, scratch_operands = 0 : i64, tpu.core_type = #tpu.core_type<tc>} {
    %c0 = arith.constant 0 : index
    %c0_0 = arith.constant 0 : index
    %0 = vector.load %arg0[%c0, %c0_0] : memref<2x700xbf16, #tpu.memory_space<vmem>>, vector<2x700xbf16>
    %c0_1 = arith.constant 0 : index
    %c0_2 = arith.constant 0 : index
    %1 = vector.load %arg1[%c0_1, %c0_2] : memref<700x384xbf16, #tpu.memory_space<vmem>>, vector<700x384xbf16>
    %cst = arith.constant dense<0.000000e+00> : vector<2x384xf32>
    %2 = tpu.matmul %0, %1, %cst {dimension_numbers = #tpu.dot_dimension_numbers<[1], [0], [0], [1], [0, 0, 1, 1], [], []>} : vector<2x700xbf16>, vector<700x384xbf16>, vector<2x384xf32> -> vector<2x384xf32>
    %c0_3 = arith.constant 0 : index
    %c0_4 = arith.constant 0 : index
    %3 = vector.load %arg2[%c0_3, %c0_4] : memref<1x384xf32, #tpu.memory_space<vmem>>, vector<1x384xf32>
    %4 = vector.broadcast %3 : vector<1x384xf32> to vector<2x384xf32>
    %5 = arith.addf %2, %4 : vector<2x384xf32>
    %cst_5 = arith.constant 0.000000e+00 : f32
    %6 = vector.broadcast %cst_5 : f32 to vector<2x384xf32>
    %7 = arith.maximumf %5, %6 : vector<2x384xf32>
    %8 = arith.truncf %7 : vector<2x384xf32> to vector<2x384xbf16>
    %c0_6 = arith.constant 0 : index
    %c0_7 = arith.constant 0 : index
    %9 = vector.load %arg3[%c0_6, %c0_7] : memref<384x256xbf16, #tpu.memory_space<vmem>>, vector<384x256xbf16>
    %cst_8 = arith.constant dense<0.000000e+00> : vector<2x256xf32>
    %10 = tpu.matmul %8, %9, %cst_8 {dimension_numbers = #tpu.dot_dimension_numbers<[1], [0], [0], [1], [0, 0, 1, 1], [], []>} : vector<2x384xbf16>, vector<384x256xbf16>, vector<2x256xf32> -> vector<2x256xf32>
    %c0_9 = arith.constant 0 : index
    %c0_10 = arith.constant 0 : index
    %11 = vector.load %arg4[%c0_9, %c0_10] : memref<1x256xf32, #tpu.memory_space<vmem>>, vector<1x256xf32>
    %12 = vector.broadcast %11 : vector<1x256xf32> to vector<2x256xf32>
    %13 = arith.addf %10, %12 : vector<2x256xf32>
    %cst_11 = arith.constant 0.000000e+00 : f32
    %14 = vector.broadcast %cst_11 : f32 to vector<2x256xf32>
    %15 = arith.maximumf %13, %14 : vector<2x256xf32>
    %16 = arith.truncf %15 : vector<2x256xf32> to vector<2x256xbf16>
    %c0_12 = arith.constant 0 : index
    %c0_13 = arith.constant 0 : index
    %17 = vector.load %arg5[%c0_12, %c0_13] : memref<256x128xbf16, #tpu.memory_space<vmem>>, vector<256x128xbf16>
    %cst_14 = arith.constant dense<0.000000e+00> : vector<2x128xf32>
    %18 = tpu.matmul %16, %17, %cst_14 {dimension_numbers = #tpu.dot_dimension_numbers<[1], [0], [0], [1], [0, 0, 1, 1], [], []>} : vector<2x256xbf16>, vector<256x128xbf16>, vector<2x128xf32> -> vector<2x128xf32>
    %c0_15 = arith.constant 0 : index
    %c0_16 = arith.constant 0 : index
    %19 = vector.load %arg6[%c0_15, %c0_16] : memref<1x128xf32, #tpu.memory_space<vmem>>, vector<1x128xf32>
    %20 = vector.broadcast %19 : vector<1x128xf32> to vector<2x128xf32>
    %21 = arith.addf %18, %20 : vector<2x128xf32>
    %c0_17 = arith.constant 0 : index
    %c0_18 = arith.constant 0 : index
    %22 = vector.load %arg7[%c0_17, %c0_18] : memref<2x128xf32, #tpu.memory_space<vmem>>, vector<2x128xf32>
    tpu.vector_store %arg7[%c0_17, %c0_18], %21 {strides = array<i32>} : memref<2x128xf32, #tpu.memory_space<vmem>>, vector<2x128xf32>,
    return
  }
}

</mosaic_0001>

<bundles_post_ra>
// kernel: lenet_color_forward.3
= control target key start
LH: loop header
LB: loop body
LE: loop exit
PB: predicated region body
PF: predicated region fallthrough
CT: control target
= control target key end

     0   :  { %v4977_v0 = vmov 0.0   ;;  %vm3746_vm0 = vmmov 0   ;;  %vm302_vm1 = vcmask 1044480   ;;  %vm303_vm2 = vcmask 1045504   ;;  %s4973_s1 = inlined_call_operand.vmem [shape: bf16[75,128], index: 1, kind: input, shape index: {}]   ;;  %s4974_s0 = inlined_call_operand.vmem [shape: bf16[4,392,75], index: 0, kind: input, shape index: {}]   ;;  %s4975_s2 = inlined_call_operand.vmem [shape: f32[1,128], index: 2, kind: input, shape index: {}]   ;;  %s4976_s3 = inlined_call_operand.vmem [shape: bf16[392,128], index: 3, kind: output, shape index: {}]  }
   0x1   :  { %3197 = vmatprep.subr.bf16.mxu0 %v4977_v0  ;;  %3307 = vmatprep.subr.bf16.mxu1 %v4977_v0  ;;  %v3640_v1 = vld [vmem:[%s4973_s1] sm:$0xff]   ;;  %v3641_v2 = vld [vmem:[%s4973_s1 + $0x8] sm:$0xff]   ;;  %v3642_v3 = vld [vmem:[%s4973_s1 + $0x10] sm:$0xff]   ;;  %v3747_v4 = vmov 65535   ;;  %vm226_vm3 = vcmask 613376  }
   0x2   :  { %3198 = vmatpush3.bf16.msra.mxu0 %v3640_v1  ;;  %3308 = vmatpush3.bf16.msra.mxu1 %v3640_v1  ;;  %v304_v5 = vsel %vm302_vm1, 4294967295, %v3747_v4  ;;  %v3643_v6 = vld [vmem:[%s4973_s1 + $0x18] sm:$0xff]   ;;  %v3644_v7 = vld [vmem:[%s4973_s1 + $0x20] sm:$0x3f]   ;;  %v3647_v12 = vld [vmem:[%s4974_s0 + $0x8] sm:$0xff]  }
   0x3   :  { %3199 = vmatprep.subr.bf16.mxu0 %v4977_v0  ;;  %3309 = vmatprep.subr.bf16.mxu1 %v4977_v0  ;;  %v305_v8 = vsel %vm303_vm2, %v304_v5, 0  ;;  %v3645_v10 = vld [vmem:[%s4974_s0] sm:$0xff]   ;;  %v3648_v13 = vld [vmem:[%s4974_s0 + $0xcc] sm:$0xff]   ;;  %v3650_v15 = vld [vmem:[%s4974_s0 + $0xd4] sm:$0xff]  }
   0x4   :  { %3207 = vmatprep.mubr.msk.bf16.mxu0 %vm3746_vm0, %v4977_v0  ;;  %3317 = vmatprep.mubr.msk.bf16.mxu1 %vm3746_vm0, %v4977_v0  ;;  %v307_v9 = vand.u32 %v3644_v7, %v305_v8  ;;  %v3646_v11 = vld [vmem:[%s4974_s0 + $0xc4] sm:$0xff]   ;;  %v3649_v14 = vld [vmem:[%s4974_s0 + $0x10] sm:$0xff]   ;;  %v3651_v16 = vld [vmem:[%s4974_s0 + $0x18] sm:$0xff]  }
   0x5   :  { %v3652_v17 = vld [vmem:[%s4974_s0 + $0xdc] sm:$0xff]   ;;  %v3654_v19 = vld [vmem:[%s4974_s0 + $0xe4] sm:$0xff]   ;;  %v3656_v21 = vld [vmem:[%s4974_s0 + $0xec] sm:$0xff]  }
   0x6   :  { %3200 = vmatpush3.bf16.msra.mxu0 %v3641_v2  ;;  %3310 = vmatpush3.bf16.msra.mxu1 %v3641_v2  ;;  %v3653_v18 = vld [vmem:[%s4974_s0 + $0x20] sm:$0xff]   ;;  %v3655_v20 = vld [vmem:[%s4974_s0 + $0x28] sm:$0xff]   ;;  %v3657_v22 = vld [vmem:[%s4974_s0 + $0x30] sm:$0xff]  }
   0x7   :  { %3201 = vmatprep.subr.bf16.mxu0 %v4977_v0  ;;  %3311 = vmatprep.subr.bf16.mxu1 %v4977_v0  ;;  %v3658_v23 = vld [vmem:[%s4974_s0 + $0xf4] sm:$0xff]   ;;  %v3660_v25 = vld [vmem:[%s4974_s0 + $0xfc] sm:$0xff]   ;;  %v3662_v27 = vld [vmem:[%s4974_s0 + $0x104] sm:$0xff]  }
   0x8   :  { %v3659_v24 = vld [vmem:[%s4974_s0 + $0x38] sm:$0xff]   ;;  %v3661_v26 = vld [vmem:[%s4974_s0 + $0x40] sm:$0xff]   ;;  %v3663_v28 = vld [vmem:[%s4974_s0 + $0x48] sm:$0xff]  }
   0x9   :  { %v3664_v29 = vld [vmem:[%s4974_s0 + $0x10c] sm:$0xff]   ;;  %v3666_v31 = vld [vmem:[%s4974_s0 + $0x114] sm:$0xff]   ;;  %v3668_v33 = vld [vmem:[%s4974_s0 + $0x11c] sm:$0xff]  }
   0xa   :  { %3202 = vmatpush3.bf16.msra.mxu0 %v3642_v3  ;;  %3312 = vmatpush3.bf16.msra.mxu1 %v3642_v3  ;;  %v3665_v30 = vld [vmem:[%s4974_s0 + $0x50] sm:$0xff]   ;;  %v3667_v32 = vld [vmem:[%s4974_s0 + $0x58] sm:$0xff]   ;;  %v3669_v34 = vld [vmem:[%s4974_s0 + $0x60] sm:$0xff]  }
   0xb   :  { %3203 = vmatprep.subr.bf16.mxu0 %v4977_v0  ;;  %3313 = vmatprep.subr.bf16.mxu1 %v4977_v0  ;;  %v3670_v35 = vld [vmem:[%s4974_s0 + $0x124] sm:$0xff]   ;;  %v3672_v37 = vld [vmem:[%s4974_s0 + $0x12c] sm:$0xff]   ;;  %v3674_v39 = vld [vmem:[%s4974_s0 + $0x134] sm:$0xff]  }
   0xc   :  { %v3671_v36 = vld [vmem:[%s4974_s0 + $0x68] sm:$0xff]   ;;  %v3673_v38 = vld [vmem:[%s4974_s0 + $0x70] sm:$0xff]   ;;  %v3675_v40 = vld [vmem:[%s4974_s0 + $0x78] sm:$0xff]  }
   0xd   :  { %v3676_v41 = vld [vmem:[%s4974_s0 + $0x13c] sm:$0xff]   ;;  %v3678_v43 = vld [vmem:[%s4974_s0 + $0x144] sm:$0xff]   ;;  %v3680_v45 = vld [vmem:[%s4974_s0 + $0x14c] sm:$0xff]  }
   0xe   :  { %3204 = vmatpush3.bf16.msra.mxu0 %v3643_v6  ;;  %3314 = vmatpush3.bf16.msra.mxu1 %v3643_v6  ;;  %v3677_v42 = vld [vmem:[%s4974_s0 + $0x80] sm:$0xff]   ;;  %v3679_v44 = vld [vmem:[%s4974_s0 + $0x88] sm:$0xff]   ;;  %v3681_v46 = vld [vmem:[%s4974_s0 + $0x90] sm:$0xff]  }
   0xf   :  { %3205 = vmatprep.subr.bf16.mxu0 %v4977_v0  ;;  %3315 = vmatprep.subr.bf16.mxu1 %v4977_v0  ;;  %v3682_v47 = vld [vmem:[%s4974_s0 + $0x154] sm:$0xff]   ;;  %v3684_v49 = vld [vmem:[%s4974_s0 + $0x15c] sm:$0xff]   ;;  %v3686_v51 = vld [vmem:[%s4974_s0 + $0x164] sm:$0xff]  }
  0x10   :  { %v3683_v48 = vld [vmem:[%s4974_s0 + $0x98] sm:$0xff]   ;;  %v3685_v50 = vld [vmem:[%s4974_s0 + $0xa0] sm:$0xff]   ;;  %v3687_v52 = vld [vmem:[%s4974_s0 + $0xa8] sm:$0xff]  }
  0x11   :  { %v3688_v53 = vld [vmem:[%s4974_s0 + $0x16c] sm:$0xff]   ;;  %v3690_v55 = vld [vmem:[%s4974_s0 + $0x174] sm:$0xff]   ;;  %v3692_v57 = vld [vmem:[%s4974_s0 + $0x17c] sm:$0xff]  }
  0x12   :  { %3206 = vmatpush3.bf16.msra.mxu0 %v307_v9  ;;  %3316 = vmatpush3.bf16.msra.mxu1 %v307_v9  ;;  %v3689_v54 = vld [vmem:[%s4974_s0 + $0xb0] sm:$0xff]   ;;  %v3691_v56 = vld [vmem:[%s4974_s0 + $0xb8] sm:$0xff]   ;;  %v3693_v58 = vld [vmem:[%s4974_s0 + $0xc0] ss:$0 sps:$4 sm:$0xff]  }
  0x13   :  { %3417 = vmatprep.subr.bf16.mxu0 %v4977_v0  ;;  %3527 = vmatprep.subr.bf16.mxu1 %v4977_v0  ;;  %v3694_v59 = vld [vmem:[%s4974_s0 + $0x184] ss:$0 sps:$4 sm:$0xff]   ;;  %v3695_v60 = vld [vmem:[%s4974_s0 + $0x188] sm:$0xff]   ;;  %v3697_v62 = vld [vmem:[%s4974_s0 + $0x190] sm:$0xff]  }
  0x14   :  { %v3696_v61 = vld [vmem:[%s4974_s0 + $0x24c] sm:$0xff]   ;;  %v3698_v63 = vld [vmem:[%s4974_s0 + $0x254] sm:$0xff]   ;;  %v3700_v7 = vld [vmem:[%s4974_s0 + $0x25c] sm:$0xff]  }
  0x15   :  { %3208 = vmatmul.mubr.msk.bf16.vlgmr.msra.gmra.mrb[0].mxu0 %vm226_vm3, %v3645_v10  ;;  %3318 = vmatmul.mubr.msk.bf16.vlgmr.msra.gmra.mrb[0].mxu1 %vm226_vm3, %v3646_v11 }
  0x16   :  { %3418 = vmatpush3.bf16.msra.mxu0 %v3640_v1  ;;  %3528 = vmatpush3.bf16.msra.mxu1 %v3640_v1 }
  0x17   :  { %3211 = vmatprep.mubr.msk.bf16.mxu0 %vm3746_vm0, %v4977_v0  ;;  %3321 = vmatprep.mubr.msk.bf16.mxu1 %vm3746_vm0, %v4977_v0 }
  0x18   :  { %3419 = vmatprep.subr.bf16.mxu0 %v4977_v0  ;;  %3529 = vmatprep.subr.bf16.mxu1 %v4977_v0 }
  0x1a   :  { %3420 = vmatpush3.bf16.msra.mxu0 %v3641_v2  ;;  %3530 = vmatpush3.bf16.msra.mxu1 %v3641_v2 }
  0x1b   :  { %3421 = vmatprep.subr.bf16.mxu0 %v4977_v0  ;;  %3531 = vmatprep.subr.bf16.mxu1 %v4977_v0 }
  0x1d   :  { %3212 = vmatmul.mubr.msk.bf16.gmra.mrb[4].mxu0 %vm226_vm3, %v3647_v12  ;;  %3322 = vmatmul.mubr.msk.bf16.gmra.mrb[4].mxu1 %vm226_vm3, %v3648_v13 }
  0x1e   :  { %3215 = vmatprep.mubr.msk.bf16.mxu0 %vm3746_vm0, %v4977_v0  ;;  %3325 = vmatprep.mubr.msk.bf16.mxu1 %vm3746_vm0, %v4977_v0 }
  0x1f   :  { %3422 = vmatpush3.bf16.msra.mxu0 %v3642_v3  ;;  %3532 = vmatpush3.bf16.msra.mxu1 %v3642_v3 }
  0x20   :  { %3423 = vmatprep.subr.bf16.mxu0 %v4977_v0  ;;  %3533 = vmatprep.subr.bf16.mxu1 %v4977_v0 }
  0x23   :  { %3424 = vmatpush3.bf16.msra.mxu0 %v3643_v6  ;;  %3534 = vmatpush3.bf16.msra.mxu1 %v3643_v6  ;;  %v3699_v6 = vld [vmem:[%s4974_s0 + $0x198] sm:$0xff]  }
  0x24   :  { %3425 = vmatprep.subr.bf16.mxu0 %v4977_v0  ;;  %3535 = vmatprep.subr.bf16.mxu1 %v4977_v0 }
  0x25   :  { %3216 = vmatmul.mubr.msk.bf16.gmra.mrb[8].mxu0 %vm226_vm3, %v3649_v14  ;;  %3326 = vmatmul.mubr.msk.bf16.gmra.mrb[8].mxu1 %vm226_vm3, %v3650_v15 }
  0x26   :  { %3219 = vmatprep.mubr.msk.bf16.mxu0 %vm3746_vm0, %v4977_v0  ;;  %3329 = vmatprep.mubr.msk.bf16.mxu1 %vm3746_vm0, %v4977_v0 }
  0x27   :  { %3426 = vmatpush3.bf16.msra.mxu0 %v307_v9  ;;  %3536 = vmatpush3.bf16.msra.mxu1 %v307_v9 }
  0x2d   :  { %3220 = vmatmul.mubr.msk.bf16.gmra.mrb[12].mxu0 %vm226_vm3, %v3651_v16  ;;  %3330 = vmatmul.mubr.msk.bf16.gmra.mrb[12].mxu1 %vm226_vm3, %v3652_v17 }
  0x2e   :  { %3223 = vmatprep.mubr.msk.bf16.mxu0 %vm3746_vm0, %v4977_v0  ;;  %3333 = vmatprep.mubr.msk.bf16.mxu1 %vm3746_vm0, %v4977_v0 }
  0x35   :  { %3224 = vmatmul.mubr.msk.bf16.gmra.mrb[16].mxu0 %vm226_vm3, %v3653_v18  ;;  %3334 = vmatmul.mubr.msk.bf16.gmra.mrb[16].mxu1 %vm226_vm3, %v3654_v19  ;;  %v3701_v18 = vld [vmem:[%s4974_s0 + $0x1a0] sm:$0xff]  }
  0x36   :  { %3227 = vmatprep.mubr.msk.bf16.mxu0 %vm3746_vm0, %v4977_v0  ;;  %3337 = vmatprep.mubr.msk.bf16.mxu1 %vm3746_vm0, %v4977_v0  ;;  %v3702_v19 = vld [vmem:[%s4974_s0 + $0x264] sm:$0xff]  }
  0x3d   :  { %3228 = vmatmul.mubr.msk.bf16.gmra.mrb[20].mxu0 %vm226_vm3, %v3655_v20  ;;  %3338 = vmatmul.mubr.msk.bf16.gmra.mrb[20].mxu1 %vm226_vm3, %v3656_v21 }
  0x3e   :  { %3231 = vmatprep.mubr.msk.bf16.mxu0 %vm3746_vm0, %v4977_v0  ;;  %3341 = vmatprep.mubr.msk.bf16.mxu1 %vm3746_vm0, %v4977_v0 }
  0x45   :  { %3232 = vmatmul.mubr.msk.bf16.gmra.mrb[24].mxu0 %vm226_vm3, %v3657_v22  ;;  %3342 = vmatmul.mubr.msk.bf16.gmra.mrb[24].mxu1 %vm226_vm3, %v3658_v23 }
  0x46   :  { %3235 = vmatprep.mubr.msk.bf16.mxu0 %vm3746_vm0, %v4977_v0  ;;  %3345 = vmatprep.mubr.msk.bf16.mxu1 %vm3746_vm0, %v4977_v0 }
  0x4d   :  { %3236 = vmatmul.mubr.msk.bf16.gmra.mrb[28].mxu0 %vm226_vm3, %v3659_v24  ;;  %3346 = vmatmul.mubr.msk.bf16.gmra.mrb[28].mxu1 %vm226_vm3, %v3660_v25 }
  0x4e   :  { %3239 = vmatprep.mubr.msk.bf16.mxu0 %vm3746_vm0, %v4977_v0  ;;  %3349 = vmatprep.mubr.msk.bf16.mxu1 %vm3746_vm0, %v4977_v0 }
  0x55   :  { %3240 = vmatmul.mubr.msk.bf16.gmra.mrb[32].mxu0 %vm226_vm3, %v3661_v26  ;;  %3350 = vmatmul.mubr.msk.bf16.gmra.mrb[32].mxu1 %vm226_vm3, %v3662_v27 }
  0x56   :  { %3243 = vmatprep.mubr.msk.bf16.mxu0 %vm3746_vm0, %v4977_v0  ;;  %3353 = vmatprep.mubr.msk.bf16.mxu1 %vm3746_vm0, %v4977_v0 }
  0x5d   :  { %3244 = vmatmul.mubr.msk.bf16.gmra.mrb[36].mxu0 %vm226_vm3, %v3663_v28  ;;  %3354 = vmatmul.mubr.msk.bf16.gmra.mrb[36].mxu1 %vm226_vm3, %v3664_v29 }
  0x5e   :  { %3247 = vmatprep.mubr.msk.bf16.mxu0 %vm3746_vm0, %v4977_v0  ;;  %3357 = vmatprep.mubr.msk.bf16.mxu1 %vm3746_vm0, %v4977_v0 }
  0x65   :  { %3248 = vmatmul.mubr.msk.bf16.gmra.mrb[40].mxu0 %vm226_vm3, %v3665_v30  ;;  %3358 = vmatmul.mubr.msk.bf16.gmra.mrb[40].mxu1 %vm226_vm3, %v3666_v31  ;;  %v3703_v30 = vld [vmem:[%s4974_s0 + $0x1a8] sm:$0xff]  }
  0x66   :  { %3251 = vmatprep.mubr.msk.bf16.mxu0 %vm3746_vm0, %v4977_v0  ;;  %3361 = vmatprep.mubr.msk.bf16.mxu1 %vm3746_vm0, %v4977_v0  ;;  %v3704_v31 = vld [vmem:[%s4974_s0 + $0x26c] sm:$0xff]  }
  0x6d   :  { %3252 = vmatmul.mubr.msk.bf16.gmra.mrb[44].mxu0 %vm226_vm3, %v3667_v32  ;;  %3362 = vmatmul.mubr.msk.bf16.gmra.mrb[44].mxu1 %vm226_vm3, %v3668_v33 }
  0x6e   :  { %3255 = vmatprep.mubr.msk.bf16.mxu0 %vm3746_vm0, %v4977_v0  ;;  %3365 = vmatprep.mubr.msk.bf16.mxu1 %vm3746_vm0, %v4977_v0 }
  0x75   :  { %3256 = vmatmul.mubr.msk.bf16.gmra.mrb[48].mxu0 %vm226_vm3, %v3669_v34  ;;  %3366 = vmatmul.mubr.msk.bf16.gmra.mrb[48].mxu1 %vm226_vm3, %v3670_v35 }
  0x76   :  { %3259 = vmatprep.mubr.msk.bf16.mxu0 %vm3746_vm0, %v4977_v0  ;;  %3369 = vmatprep.mubr.msk.bf16.mxu1 %vm3746_vm0, %v4977_v0 }
  0x7d   :  { %3260 = vmatmul.mubr.msk.bf16.gmra.mrb[52].mxu0 %vm226_vm3, %v3671_v36  ;;  %3370 = vmatmul.mubr.msk.bf16.gmra.mrb[52].mxu1 %vm226_vm3, %v3672_v37 }
  0x7e   :  { %3263 = vmatprep.mubr.msk.bf16.mxu0 %vm3746_vm0, %v4977_v0  ;;  %3373 = vmatprep.mubr.msk.bf16.mxu1 %vm3746_vm0, %v4977_v0 }
  0x85   :  { %3264 = vmatmul.mubr.msk.bf16.gmra.mrb[56].mxu0 %vm226_vm3, %v3673_v38  ;;  %3374 = vmatmul.mubr.msk.bf16.gmra.mrb[56].mxu1 %vm226_vm3, %v3674_v39 }
  0x86   :  { %3267 = vmatprep.mubr.msk.bf16.mxu0 %vm3746_vm0, %v4977_v0  ;;  %3377 = vmatprep.mubr.msk.bf16.mxu1 %vm3746_vm0, %v4977_v0 }
  0x8d   :  { %3268 = vmatmul.mubr.msk.bf16.gmra.mrb[60].mxu0 %vm226_vm3, %v3675_v40  ;;  %3378 = vmatmul.mubr.msk.bf16.gmra.mrb[60].mxu1 %vm226_vm3, %v3676_v41 }
  0x8e   :  { %3271 = vmatprep.mubr.msk.bf16.mxu0 %vm3746_vm0, %v4977_v0  ;;  %3381 = vmatprep.mubr.msk.bf16.mxu1 %vm3746_vm0, %v4977_v0 }
  0x95   :  { %3272 = vmatmul.mubr.msk.bf16.gmra.mrb[64].mxu0 %vm226_vm3, %v3677_v42  ;;  %3382 = vmatmul.mubr.msk.bf16.gmra.mrb[64].mxu1 %vm226_vm3, %v3678_v43  ;;  %v3705_v42 = vld [vmem:[%s4974_s0 + $0x1b0] sm:$0xff]  }
  0x96   :  { %3275 = vmatprep.mubr.msk.bf16.mxu0 %vm3746_vm0, %v4977_v0  ;;  %3385 = vmatprep.mubr.msk.bf16.mxu1 %vm3746_vm0, %v4977_v0  ;;  %v3706_v43 = vld [vmem:[%s4974_s0 + $0x274] sm:$0xff]  }
  0x9d   :  { %3276 = vmatmul.mubr.msk.bf16.gmra.mrb[68].mxu0 %vm226_vm3, %v3679_v44  ;;  %3386 = vmatmul.mubr.msk.bf16.gmra.mrb[68].mxu1 %vm226_vm3, %v3680_v45 }
  0x9e   :  { %3279 = vmatprep.mubr.msk.bf16.mxu0 %vm3746_vm0, %v4977_v0  ;;  %3389 = vmatprep.mubr.msk.bf16.mxu1 %vm3746_vm0, %v4977_v0 }
  0xa5   :  { %3280 = vmatmul.mubr.msk.bf16.gmra.mrb[72].mxu0 %vm226_vm3, %v3681_v46  ;;  %3390 = vmatmul.mubr.msk.bf16.gmra.mrb[72].mxu1 %vm226_vm3, %v3682_v47 }
  0xa6   :  { %3283 = vmatprep.mubr.msk.bf16.mxu0 %vm3746_vm0, %v4977_v0  ;;  %3393 = vmatprep.mubr.msk.bf16.mxu1 %vm3746_vm0, %v4977_v0 }
  0xad   :  { %3284 = vmatmul.mubr.msk.bf16.gmra.mrb[76].mxu0 %vm226_vm3, %v3683_v48  ;;  %3394 = vmatmul.mubr.msk.bf16.gmra.mrb[76].mxu1 %vm226_vm3, %v3684_v49 }
  0xae   :  { %3287 = vmatprep.mubr.msk.bf16.mxu0 %vm3746_vm0, %v4977_v0  ;;  %3397 = vmatprep.mubr.msk.bf16.mxu1 %vm3746_vm0, %v4977_v0 }
  0xb5   :  { %3288 = vmatmul.mubr.msk.bf16.gmra.mrb[80].mxu0 %vm226_vm3, %v3685_v50  ;;  %3398 = vmatmul.mubr.msk.bf16.gmra.mrb[80].mxu1 %vm226_vm3, %v3686_v51 }
  0xb6   :  { %3291 = vmatprep.mubr.msk.bf16.mxu0 %vm3746_vm0, %v4977_v0  ;;  %3401 = vmatprep.mubr.msk.bf16.mxu1 %vm3746_vm0, %v4977_v0 }
  0xbd   :  { %3292 = vmatmul.mubr.msk.bf16.gmra.mrb[84].mxu0 %vm226_vm3, %v3687_v52  ;;  %3402 = vmatmul.mubr.msk.bf16.gmra.mrb[84].mxu1 %vm226_vm3, %v3688_v53 }
  0xbe   :  { %3295 = vmatprep.mubr.msk.bf16.mxu0 %vm3746_vm0, %v4977_v0  ;;  %3405 = vmatprep.mubr.msk.bf16.mxu1 %vm3746_vm0, %v4977_v0 }
  0xc5   :  { %3296 = vmatmul.mubr.msk.bf16.gmra.mrb[88].mxu0 %vm226_vm3, %v3689_v54  ;;  %3406 = vmatmul.mubr.msk.bf16.gmra.mrb[88].mxu1 %vm226_vm3, %v3690_v55  ;;  %v3707_v54 = vld [vmem:[%s4974_s0 + $0x1b8] sm:$0xff]  }
  0xc6   :  { %3299 = vmatprep.mubr.msk.bf16.mxu0 %vm3746_vm0, %v4977_v0  ;;  %3409 = vmatprep.mubr.msk.bf16.mxu1 %vm3746_vm0, %v4977_v0  ;;  %v3708_v55 = vld [vmem:[%s4974_s0 + $0x27c] sm:$0xff]  }
  0xcd   :  { %3300 = vmatmul.mubr.msk.bf16.gmra.mrb[92].mxu0 %vm226_vm3, %v3691_v56  ;;  %3410 = vmatmul.mubr.msk.bf16.gmra.mrb[92].mxu1 %vm226_vm3, %v3692_v57 }
  0xce   :  { %3303 = vmatprep.mubr.msk.bf16.mxu0 %vm3746_vm0, %v4977_v0  ;;  %3413 = vmatprep.mubr.msk.bf16.mxu1 %vm3746_vm0, %v4977_v0 }
  0xd5   :  { %3304 = vmatmul.mubr.msk.bf16.gmra.mrb[96].mxu0 %vm226_vm3, %v3693_v58  ;;  %3414 = vmatmul.mubr.msk.bf16.gmra.mrb[96].mxu1 %vm226_vm3, %v3694_v59 }
  0xd6   :  { %3427 = vmatprep.mubr.msk.bf16.mxu0 %vm3746_vm0, %v4977_v0  ;;  %3537 = vmatprep.mubr.msk.bf16.mxu1 %vm3746_vm0, %v4977_v0 }
  0xdd   :  { %3428 = vmatmul.mubr.msk.bf16.vlgmr.msra.gmra.mrb[100].mxu0 %vm226_vm3, %v3695_v60  ;;  %3538 = vmatmul.mubr.msk.bf16.vlgmr.msra.gmra.mrb[100].mxu1 %vm226_vm3, %v3696_v61 }
  0xde   :  { %3431 = vmatprep.mubr.msk.bf16.mxu0 %vm3746_vm0, %v4977_v0  ;;  %3541 = vmatprep.mubr.msk.bf16.mxu1 %vm3746_vm0, %v4977_v0 }
  0xe5   :  { %3432 = vmatmul.mubr.msk.bf16.gmra.mrb[104].mxu0 %vm226_vm3, %v3697_v62  ;;  %3542 = vmatmul.mubr.msk.bf16.gmra.mrb[104].mxu1 %vm226_vm3, %v3698_v63 }
  0xe6   :  { %3435 = vmatprep.mubr.msk.bf16.mxu0 %vm3746_vm0, %v4977_v0  ;;  %3545 = vmatprep.mubr.msk.bf16.mxu1 %vm3746_vm0, %v4977_v0 }
  0xe8   :  { %v4131_v1 = vpop.f32.mrb[0].mxu0  ;;  %v4133_v2 = vpop.f32.mrb[0].mxu1 }
  0xe9   :  { %v3209_v4 = vpop.f32.mrb[1].mxu0  ;;  %v3319_v5 = vpop.f32.mrb[1].mxu1 }
  0xea   :  { %v4143_v8 = vpop.f32.mrb[2].mxu0  ;;  %v4145_v9 = vpop.f32.mrb[2].mxu1 }
  0xeb   :  { %v3210_v11 = vpop.f32.mrb[3].mxu0  ;;  %v3320_v12 = vpop.f32.mrb[3].mxu1 }
  0xed   :  { %3436 = vmatmul.mubr.msk.bf16.gmra.mrb[108].mxu0 %vm226_vm3, %v3699_v6  ;;  %3546 = vmatmul.mubr.msk.bf16.gmra.mrb[108].mxu1 %vm226_vm3, %v3700_v7  ;;  %v3709_v6 = vld [vmem:[%s4974_s0 + $0x1c0] sm:$0xff]  }
  0xee   :  { %3439 = vmatprep.mubr.msk.bf16.mxu0 %vm3746_vm0, %v4977_v0  ;;  %3549 = vmatprep.mubr.msk.bf16.mxu1 %vm3746_vm0, %v4977_v0  ;;  %v3710_v7 = vld [vmem:[%s4974_s0 + $0x284] sm:$0xff]  }
  0xf0   :  { %v4155_v13 = vpop.f32.mrb[4].mxu0  ;;  %v4157_v14 = vpop.f32.mrb[4].mxu1 }
  0xf1   :  { %v3213_v16 = vpop.f32.mrb[5].mxu0  ;;  %v3323_v17 = vpop.f32.mrb[5].mxu1 }
  0xf2   :  { %v4167_v20 = vpop.f32.mrb[6].mxu0  ;;  %v4169_v21 = vpop.f32.mrb[6].mxu1 }
  0xf3   :  { %v3214_v23 = vpop.f32.mrb[7].mxu0  ;;  %v3324_v24 = vpop.f32.mrb[7].mxu1 }
  0xf5   :  { %3440 = vmatmul.mubr.msk.bf16.gmra.mrb[112].mxu0 %vm226_vm3, %v3701_v18  ;;  %3550 = vmatmul.mubr.msk.bf16.gmra.mrb[112].mxu1 %vm226_vm3, %v3702_v19 }
  0xf6   :  { %3443 = vmatprep.mubr.msk.bf16.mxu0 %vm3746_vm0, %v4977_v0  ;;  %3553 = vmatprep.mubr.msk.bf16.mxu1 %vm3746_vm0, %v4977_v0 }
  0xf8   :  { %v4179_v25 = vpop.f32.mrb[8].mxu0  ;;  %v4181_v26 = vpop.f32.mrb[8].mxu1 }
  0xf9   :  { %v3217_v28 = vpop.f32.mrb[9].mxu0  ;;  %v3327_v29 = vpop.f32.mrb[9].mxu1 }
  0xfa   :  { %v4191_v32 = vpop.f32.mrb[10].mxu0  ;;  %v4193_v33 = vpop.f32.mrb[10].mxu1 }
  0xfb   :  { %v3218_v35 = vpop.f32.mrb[11].mxu0  ;;  %v3328_v36 = vpop.f32.mrb[11].mxu1 }
  0xfd   :  { %3444 = vmatmul.mubr.msk.bf16.gmra.mrb[116].mxu0 %vm226_vm3, %v3703_v30  ;;  %3554 = vmatmul.mubr.msk.bf16.gmra.mrb[116].mxu1 %vm226_vm3, %v3704_v31  ;;  %v3711_v30 = vld [vmem:[%s4974_s0 + $0x1c8] sm:$0xff]  }
  0xfe   :  { %3447 = vmatprep.mubr.msk.bf16.mxu0 %vm3746_vm0, %v4977_v0  ;;  %3557 = vmatprep.mubr.msk.bf16.mxu1 %vm3746_vm0, %v4977_v0  ;;  %v3712_v31 = vld [vmem:[%s4974_s0 + $0x28c] sm:$0xff]  }
 0x100   :  { %v4203_v37 = vpop.f32.mrb[12].mxu0  ;;  %v4205_v38 = vpop.f32.mrb[12].mxu1 }
 0x101   :  { %v3221_v40 = vpop.f32.mrb[13].mxu0  ;;  %v3331_v41 = vpop.f32.mrb[13].mxu1 }
 0x102   :  { %v4215_v44 = vpop.f32.mrb[14].mxu0  ;;  %v4217_v45 = vpop.f32.mrb[14].mxu1 }
 0x103   :  { %v3222_v47 = vpop.f32.mrb[15].mxu0  ;;  %v3332_v48 = vpop.f32.mrb[15].mxu1 }
 0x105   :  { %3448 = vmatmul.mubr.msk.bf16.gmra.mrb[120].mxu0 %vm226_vm3, %v3705_v42  ;;  %3558 = vmatmul.mubr.msk.bf16.gmra.mrb[120].mxu1 %vm226_vm3, %v3706_v43 }
 0x106   :  { %3451 = vmatprep.mubr.msk.bf16.mxu0 %vm3746_vm0, %v4977_v0  ;;  %3561 = vmatprep.mubr.msk.bf16.mxu1 %vm3746_vm0, %v4977_v0 }
 0x108   :  { %v4227_v49 = vpop.f32.mrb[16].mxu0  ;;  %v4229_v50 = vpop.f32.mrb[16].mxu1 }
 0x109   :  { %v3225_v52 = vpop.f32.mrb[17].mxu0  ;;  %v3335_v53 = vpop.f32.mrb[17].mxu1 }
 0x10a   :  { %v4239_v56 = vpop.f32.mrb[18].mxu0  ;;  %v4241_v57 = vpop.f32.mrb[18].mxu1 }
 0x10b   :  { %v3226_v59 = vpop.f32.mrb[19].mxu0  ;;  %v3336_v60 = vpop.f32.mrb[19].mxu1 }
 0x10d   :  { %3452 = vmatmul.mubr.msk.bf16.gmra.mrb[124].mxu0 %vm226_vm3, %v3707_v54  ;;  %3562 = vmatmul.mubr.msk.bf16.gmra.mrb[124].mxu1 %vm226_vm3, %v3708_v55  ;;  %v3713_v54 = vld [vmem:[%s4974_s0 + $0x1d0] sm:$0xff]  }
 0x10e   :  { %3455 = vmatprep.mubr.msk.bf16.mxu0 %vm3746_vm0, %v4977_v0  ;;  %3565 = vmatprep.mubr.msk.bf16.mxu1 %vm3746_vm0, %v4977_v0  ;;  %v3714_v55 = vld [vmem:[%s4974_s0 + $0x294] sm:$0xff]  }
 0x110   :  { %v4251_v61 = vpop.f32.mrb[20].mxu0  ;;  %v4253_v62 = vpop.f32.mrb[20].mxu1 }
 0x111   :  { %v3229_v4 = vpop.f32.mrb[21].mxu0  ;;  %v3339_v5 = vpop.f32.mrb[21].mxu1 }
 0x112   :  { %v4263_v11 = vpop.f32.mrb[22].mxu0  ;;  %v4265_v12 = vpop.f32.mrb[22].mxu1 }
 0x113   :  { %v3230_v17 = vpop.f32.mrb[23].mxu0  ;;  %v3340_v18 = vpop.f32.mrb[23].mxu1 }
 0x115   :  { %3456 = vmatmul.mubr.msk.bf16.gmra.mrb[128].mxu0 %vm226_vm3, %v3709_v6  ;;  %3566 = vmatmul.mubr.msk.bf16.gmra.mrb[128].mxu1 %vm226_vm3, %v3710_v7 }
 0x116   :  { %3459 = vmatprep.mubr.msk.bf16.mxu0 %vm3746_vm0, %v4977_v0  ;;  %3569 = vmatprep.mubr.msk.bf16.mxu1 %vm3746_vm0, %v4977_v0 }
 0x118   :  { %v4275_v19 = vpop.f32.mrb[24].mxu0  ;;  %v4277_v23 = vpop.f32.mrb[24].mxu1 }
 0x119   :  { %v3233_v28 = vpop.f32.mrb[25].mxu0  ;;  %v3343_v29 = vpop.f32.mrb[25].mxu1 }
 0x11a   :  { %v4287_v35 = vpop.f32.mrb[26].mxu0  ;;  %v4289_v36 = vpop.f32.mrb[26].mxu1 }
 0x11b   :  { %v3234_v41 = vpop.f32.mrb[27].mxu0  ;;  %v3344_v42 = vpop.f32.mrb[27].mxu1 }
 0x11d   :  { %3460 = vmatmul.mubr.msk.bf16.gmra.mrb[132].mxu0 %vm226_vm3, %v3711_v30  ;;  %3570 = vmatmul.mubr.msk.bf16.gmra.mrb[132].mxu1 %vm226_vm3, %v3712_v31  ;;  %v3715_v30 = vld [vmem:[%s4974_s0 + $0x1d8] sm:$0xff]  }
 0x11e   :  { %3463 = vmatprep.mubr.msk.bf16.mxu0 %vm3746_vm0, %v4977_v0  ;;  %3573 = vmatprep.mubr.msk.bf16.mxu1 %vm3746_vm0, %v4977_v0  ;;  %v3716_v31 = vld [vmem:[%s4974_s0 + $0x29c] sm:$0xff]  }
 0x120   :  { %v4299_v43 = vpop.f32.mrb[28].mxu0  ;;  %v4301_v47 = vpop.f32.mrb[28].mxu1 }
 0x121   :  { %v3237_v52 = vpop.f32.mrb[29].mxu0  ;;  %v3347_v53 = vpop.f32.mrb[29].mxu1 }
 0x122   :  { %v4311_v59 = vpop.f32.mrb[30].mxu0  ;;  %v4313_v60 = vpop.f32.mrb[30].mxu1 }
 0x123   :  { %v3238_v5 = vpop.f32.mrb[31].mxu0  ;;  %v3348_v6 = vpop.f32.mrb[31].mxu1 }
 0x125   :  { %3464 = vmatmul.mubr.msk.bf16.gmra.mrb[136].mxu0 %vm226_vm3, %v3713_v54  ;;  %3574 = vmatmul.mubr.msk.bf16.gmra.mrb[136].mxu1 %vm226_vm3, %v3714_v55 }
 0x126   :  { %3467 = vmatprep.mubr.msk.bf16.mxu0 %vm3746_vm0, %v4977_v0  ;;  %3577 = vmatprep.mubr.msk.bf16.mxu1 %vm3746_vm0, %v4977_v0 }
 0x128   :  { %v4323_v7 = vpop.f32.mrb[32].mxu0  ;;  %v4325_v17 = vpop.f32.mrb[32].mxu1 }
 0x129   :  { %v3241_v28 = vpop.f32.mrb[33].mxu0  ;;  %v3351_v29 = vpop.f32.mrb[33].mxu1 }
 0x12a   :  { %v4335_v41 = vpop.f32.mrb[34].mxu0  ;;  %v4337_v42 = vpop.f32.mrb[34].mxu1 }
 0x12b   :  { %v3242_v53 = vpop.f32.mrb[35].mxu0  ;;  %v3352_v54 = vpop.f32.mrb[35].mxu1 }
 0x12d   :  { %3468 = vmatmul.mubr.msk.bf16.gmra.mrb[140].mxu0 %vm226_vm3, %v3715_v30  ;;  %3578 = vmatmul.mubr.msk.bf16.gmra.mrb[140].mxu1 %vm226_vm3, %v3716_v31  ;;  %v3717_v30 = vld [vmem:[%s4974_s0 + $0x1e0] sm:$0xff]  }
 0x12e   :  { %3471 = vmatprep.mubr.msk.bf16.mxu0 %vm3746_vm0, %v4977_v0  ;;  %3581 = vmatprep.mubr.msk.bf16.mxu1 %vm3746_vm0, %v4977_v0  ;;  %v3718_v31 = vld [vmem:[%s4974_s0 + $0x2a4] sm:$0xff]  }
 0x130   :  { %v4347_v55 = vpop.f32.mrb[36].mxu0  ;;  %v4349_v5 = vpop.f32.mrb[36].mxu1 }
 0x131   :  { %v3245_v28 = vpop.f32.mrb[37].mxu0  ;;  %v3355_v29 = vpop.f32.mrb[37].mxu1 }
 0x132   :  { %v4359_v53 = vpop.f32.mrb[38].mxu0  ;;  %v4361_v54 = vpop.f32.mrb[38].mxu1 }
 0x133   :  { %v3246_v18 = vpop.f32.mrb[39].mxu0  ;;  %v3356_v4 = vpop.f32.mrb[39].mxu1 }
 0x134   :  { %v3719_v4 = vld [vmem:[%s4974_s0 + $0x1e8] sm:$0xff]  }
 0x135   :  { %3472 = vmatmul.mubr.msk.bf16.gmra.mrb[144].mxu0 %vm226_vm3, %v3717_v30  ;;  %3582 = vmatmul.mubr.msk.bf16.gmra.mrb[144].mxu1 %vm226_vm3, %v3718_v31  ;;  %v3720_v30 = vld [vmem:[%s4974_s0 + $0x2ac] sm:$0xff]  }
 0x136   :  { %3475 = vmatprep.mubr.msk.bf16.mxu0 %vm3746_vm0, %v4977_v0  ;;  %3585 = vmatprep.mubr.msk.bf16.mxu1 %vm3746_vm0, %v4977_v0 }
 0x138   :  { %v4371_v28 = vpop.f32.mrb[40].mxu0  ;;  %v4373_v29 = vpop.f32.mrb[40].mxu1 }
 0x139   :  { %v3249_v52 = vpop.f32.mrb[41].mxu0  ;;  %v3359_v18 = vpop.f32.mrb[41].mxu1 }
 0x13a   :  { %v4383_v31 = vpop.f32.mrb[42].mxu0  ;;  %v4385_v48 = vpop.f32.mrb[42].mxu1 }
 0x13b   :  { %v3250_v24 = vpop.f32.mrb[43].mxu0  ;;  %v3360_v16 = vpop.f32.mrb[43].mxu1 }
 0x13c   :  { %v3721_v16 = vld [vmem:[%s4974_s0 + $0x1f0] sm:$0xff]  }
 0x13d   :  { %3476 = vmatmul.mubr.msk.bf16.gmra.mrb[148].mxu0 %vm226_vm3, %v3719_v4  ;;  %3586 = vmatmul.mubr.msk.bf16.gmra.mrb[148].mxu1 %vm226_vm3, %v3720_v30  ;;  %v3722_v4 = vld [vmem:[%s4974_s0 + $0x2b4] sm:$0xff]  }
 0x13e   :  { %3479 = vmatprep.mubr.msk.bf16.mxu0 %vm3746_vm0, %v4977_v0  ;;  %3589 = vmatprep.mubr.msk.bf16.mxu1 %vm3746_vm0, %v4977_v0 }
 0x140   :  { %v4395_v52 = vpop.f32.mrb[44].mxu0  ;;  %v4397_v18 = vpop.f32.mrb[44].mxu1 }
 0x141   :  { %5033 = vst [vmem:[#allocation2_spill] sm:$0xff] %v4395_v52  ;;  %5034 = vst [vmem:[#allocation3_spill] sm:$0xff] %v4397_v18  ;;  %v3253_v40 = vpop.f32.mrb[45].mxu0  ;;  %v3363_v24 = vpop.f32.mrb[45].mxu1 }
 0x142   :  { %v4407_v30 = vpop.f32.mrb[46].mxu0  ;;  %v4409_v63 = vpop.f32.mrb[46].mxu1 }
 0x143   :  { %5035 = vst [vmem:[#allocation4_spill] sm:$0xff] %v4407_v30  ;;  %5036 = vst [vmem:[#allocation5_spill] sm:$0xff] %v4409_v63  ;;  %v3254_v51 = vpop.f32.mrb[47].mxu0  ;;  %v3364_v46 = vpop.f32.mrb[47].mxu1 }
 0x144   :  { %v3723_v46 = vld [vmem:[%s4974_s0 + $0x1f8] sm:$0xff]  }
 0x145   :  { %3480 = vmatmul.mubr.msk.bf16.gmra.mrb[152].mxu0 %vm226_vm3, %v3721_v16  ;;  %3590 = vmatmul.mubr.msk.bf16.gmra.mrb[152].mxu1 %vm226_vm3, %v3722_v4  ;;  %v3724_v16 = vld [vmem:[%s4974_s0 + $0x2bc] sm:$0xff]  }
 0x146   :  { %3483 = vmatprep.mubr.msk.bf16.mxu0 %vm3746_vm0, %v4977_v0  ;;  %3593 = vmatprep.mubr.msk.bf16.mxu1 %vm3746_vm0, %v4977_v0 }
 0x148   :  { %v4419_v40 = vpop.f32.mrb[48].mxu0  ;;  %v4421_v24 = vpop.f32.mrb[48].mxu1 }
 0x149   :  { %5037 = vst [vmem:[#allocation6_spill] sm:$0xff] %v4419_v40  ;;  %5038 = vst [vmem:[#allocation7_spill] sm:$0xff] %v4421_v24  ;;  %v3257_v58 = vpop.f32.mrb[49].mxu0  ;;  %v3367_v51 = vpop.f32.mrb[49].mxu1 }
 0x14a   :  { %v4431_v4 = vpop.f32.mrb[50].mxu0  ;;  %v4433_v39 = vpop.f32.mrb[50].mxu1 }
 0x14b   :  { %5039 = vst [vmem:[#allocation8_spill] sm:$0xff] %v4431_v4  ;;  %5040 = vst [vmem:[#allocation9_spill] sm:$0xff] %v4433_v39  ;;  %v3258_v27 = vpop.f32.mrb[51].mxu0  ;;  %v3368_v22 = vpop.f32.mrb[51].mxu1 }
 0x14c   :  { %v3725_v22 = vld [vmem:[%s4974_s0 + $0x200] sm:$0xff]  }
 0x14d   :  { %3484 = vmatmul.mubr.msk.bf16.gmra.mrb[156].mxu0 %vm226_vm3, %v3723_v46  ;;  %3594 = vmatmul.mubr.msk.bf16.gmra.mrb[156].mxu1 %vm226_vm3, %v3724_v16  ;;  %v3726_v46 = vld [vmem:[%s4974_s0 + $0x2c4] sm:$0xff]  }
 0x14e   :  { %3487 = vmatprep.mubr.msk.bf16.mxu0 %vm3746_vm0, %v4977_v0  ;;  %3597 = vmatprep.mubr.msk.bf16.mxu1 %vm3746_vm0, %v4977_v0 }
 0x150   :  { %v4443_v58 = vpop.f32.mrb[52].mxu0  ;;  %v4445_v51 = vpop.f32.mrb[52].mxu1 }
 0x151   :  { %5041 = vst [vmem:[#allocation10_spill] sm:$0xff] %v4443_v58  ;;  %5042 = vst [vmem:[#allocation11_spill] sm:$0xff] %v4445_v51  ;;  %v3261_v34 = vpop.f32.mrb[53].mxu0  ;;  %v3371_v27 = vpop.f32.mrb[53].mxu1 }
 0x152   :  { %v4455_v16 = vpop.f32.mrb[54].mxu0  ;;  %v4457_v15 = vpop.f32.mrb[54].mxu1  ;;  %v5045_v34 = vmov 0.0  }
 0x153   :  { %5043 = vst [vmem:[#allocation12_spill] sm:$0xff] %v4455_v16  ;;  %5044 = vst [vmem:[#allocation13_spill] sm:$0xff] %v4457_v15  ;;  %v3262_v3 = vpop.f32.mrb[55].mxu0  ;;  %v3372_v0 = vpop.f32.mrb[55].mxu1 }
 0x154   :  { %v3727_v0 = vld [vmem:[%s4974_s0 + $0x208] sm:$0xff]  }
 0x155   :  { %3488 = vmatmul.mubr.msk.bf16.gmra.mrb[160].mxu0 %vm226_vm3, %v3725_v22  ;;  %3598 = vmatmul.mubr.msk.bf16.gmra.mrb[160].mxu1 %vm226_vm3, %v3726_v46  ;;  %v3728_v22 = vld [vmem:[%s4974_s0 + $0x2cc] sm:$0xff]  }
 0x156   :  { %3491 = vmatprep.mubr.msk.bf16.mxu0 %vm3746_vm0, %v5045_v34  ;;  %3601 = vmatprep.mubr.msk.bf16.mxu1 %vm3746_vm0, %v5045_v34 }
 0x158   :  { %v4467_v27 = vpop.f32.mrb[56].mxu0  ;;  %v4469_v6 = vpop.f32.mrb[56].mxu1 }
 0x159   :  { %5046 = vst [vmem:[#allocation14_spill] sm:$0xff] %v4467_v27  ;;  %5047 = vst [vmem:[#allocation15_spill] sm:$0xff] %v4469_v6  ;;  %v3265_v10 = vpop.f32.mrb[57].mxu0  ;;  %v3375_v3 = vpop.f32.mrb[57].mxu1 }
 0x15a   :  { %v4479_v46 = vpop.f32.mrb[58].mxu0  ;;  %v4481_v15 = vpop.f32.mrb[58].mxu1 }
 0x15b   :  { %5048 = vst [vmem:[#allocation16_spill] sm:$0xff] %v4479_v46  ;;  %5049 = vst [vmem:[#allocation17_spill] sm:$0xff] %v4481_v15  ;;  %v3266_v58 = vpop.f32.mrb[59].mxu0  ;;  %v3376_v39 = vpop.f32.mrb[59].mxu1 }
 0x15c   :  { %v3729_v39 = vld [vmem:[%s4974_s0 + $0x210] sm:$0xff]  }
 0x15d   :  { %3492 = vmatmul.mubr.msk.bf16.gmra.mrb[164].mxu0 %vm226_vm3, %v3727_v0  ;;  %3602 = vmatmul.mubr.msk.bf16.gmra.mrb[164].mxu1 %vm226_vm3, %v3728_v22  ;;  %v3730_v0 = vld [vmem:[%s4974_s0 + $0x2d4] sm:$0xff]  }
 0x15e   :  { %3495 = vmatprep.mubr.msk.bf16.mxu0 %vm3746_vm0, %v5045_v34  ;;  %3605 = vmatprep.mubr.msk.bf16.mxu1 %vm3746_vm0, %v5045_v34 }
 0x160   :  { %v4491_v10 = vpop.f32.mrb[60].mxu0  ;;  %v4493_v3 = vpop.f32.mrb[60].mxu1 }
 0x161   :  { %5050 = vst [vmem:[#allocation18_spill] sm:$0xff] %v4491_v10  ;;  %5051 = vst [vmem:[#allocation19_spill] sm:$0xff] %v4493_v3  ;;  %v3269_v16 = vpop.f32.mrb[61].mxu0  ;;  %v3379_v58 = vpop.f32.mrb[61].mxu1 }
 0x162   :  { %v4503_v22 = vpop.f32.mrb[62].mxu0  ;;  %v4505_v15 = vpop.f32.mrb[62].mxu1 }
 0x163   :  { %5052 = vst [vmem:[#allocation20_spill] sm:$0xff] %v4503_v22  ;;  %5053 = vst [vmem:[#allocation21_spill] sm:$0xff] %v4505_v15  ;;  %v3270_v6 = vpop.f32.mrb[63].mxu0  ;;  %v3380_v27 = vpop.f32.mrb[63].mxu1 }
 0x164   :  { %v3731_v27 = vld [vmem:[%s4974_s0 + $0x218] sm:$0xff]  }
 0x165   :  { %3496 = vmatmul.mubr.msk.bf16.gmra.mrb[168].mxu0 %vm226_vm3, %v3729_v39  ;;  %3606 = vmatmul.mubr.msk.bf16.gmra.mrb[168].mxu1 %vm226_vm3, %v3730_v0  ;;  %v3732_v39 = vld [vmem:[%s4974_s0 + $0x2dc] sm:$0xff]  }
 0x166   :  { %3499 = vmatprep.mubr.msk.bf16.mxu0 %vm3746_vm0, %v5045_v34  ;;  %3609 = vmatprep.mubr.msk.bf16.mxu1 %vm3746_vm0, %v5045_v34 }
 0x168   :  { %v4515_v16 = vpop.f32.mrb[64].mxu0  ;;  %v4517_v58 = vpop.f32.mrb[64].mxu1 }
 0x169   :  { %5054 = vst [vmem:[#allocation22_spill] sm:$0xff] %v4515_v16  ;;  %5055 = vst [vmem:[#allocation23_spill] sm:$0xff] %v4517_v58  ;;  %v3273_v46 = vpop.f32.mrb[65].mxu0  ;;  %v3383_v6 = vpop.f32.mrb[65].mxu1 }
 0x16a   :  { %v4527_v0 = vpop.f32.mrb[66].mxu0  ;;  %v4529_v15 = vpop.f32.mrb[66].mxu1 }
 0x16b   :  { %5056 = vst [vmem:[#allocation24_spill] sm:$0xff] %v4527_v0  ;;  %5057 = vst [vmem:[#allocation25_spill] sm:$0xff] %v4529_v15  ;;  %v3274_v3 = vpop.f32.mrb[67].mxu0  ;;  %v3384_v10 = vpop.f32.mrb[67].mxu1 }
 0x16c   :  { %v3733_v10 = vld [vmem:[%s4974_s0 + $0x220] sm:$0xff]  }
 0x16d   :  { %3500 = vmatmul.mubr.msk.bf16.gmra.mrb[172].mxu0 %vm226_vm3, %v3731_v27  ;;  %3610 = vmatmul.mubr.msk.bf16.gmra.mrb[172].mxu1 %vm226_vm3, %v3732_v39  ;;  %v3734_v27 = vld [vmem:[%s4974_s0 + $0x2e4] sm:$0xff]  }
 0x16e   :  { %3503 = vmatprep.mubr.msk.bf16.mxu0 %vm3746_vm0, %v5045_v34  ;;  %3613 = vmatprep.mubr.msk.bf16.mxu1 %vm3746_vm0, %v5045_v34 }
 0x170   :  { %v4539_v46 = vpop.f32.mrb[68].mxu0  ;;  %v4541_v6 = vpop.f32.mrb[68].mxu1 }
 0x171   :  { %5058 = vst [vmem:[#allocation26_spill] sm:$0xff] %v4539_v46  ;;  %5059 = vst [vmem:[#allocation27_spill] sm:$0xff] %v4541_v6  ;;  %v3277_v22 = vpop.f32.mrb[69].mxu0  ;;  %v3387_v3 = vpop.f32.mrb[69].mxu1 }
 0x172   :  { %v4551_v39 = vpop.f32.mrb[70].mxu0  ;;  %v4553_v15 = vpop.f32.mrb[70].mxu1 }
 0x173   :  { %5060 = vst [vmem:[#allocation28_spill] sm:$0xff] %v4551_v39  ;;  %5061 = vst [vmem:[#allocation29_spill] sm:$0xff] %v4553_v15  ;;  %v3278_v58 = vpop.f32.mrb[71].mxu0  ;;  %v3388_v16 = vpop.f32.mrb[71].mxu1 }
 0x174   :  { %v3735_v16 = vld [vmem:[%s4974_s0 + $0x228] sm:$0xff]  }
 0x175   :  { %3504 = vmatmul.mubr.msk.bf16.gmra.mrb[176].mxu0 %vm226_vm3, %v3733_v10  ;;  %3614 = vmatmul.mubr.msk.bf16.gmra.mrb[176].mxu1 %vm226_vm3, %v3734_v27  ;;  %v3736_v10 = vld [vmem:[%s4974_s0 + $0x2ec] sm:$0xff]  }
 0x176   :  { %3507 = vmatprep.mubr.msk.bf16.mxu0 %vm3746_vm0, %v5045_v34  ;;  %3617 = vmatprep.mubr.msk.bf16.mxu1 %vm3746_vm0, %v5045_v34 }
 0x178   :  { %v4563_v22 = vpop.f32.mrb[72].mxu0  ;;  %v4565_v3 = vpop.f32.mrb[72].mxu1 }
 0x179   :  { %5062 = vst [vmem:[#allocation30_spill] sm:$0xff] %v4563_v22  ;;  %5063 = vst [vmem:[#allocation31_spill] sm:$0xff] %v4565_v3  ;;  %v3281_v0 = vpop.f32.mrb[73].mxu0  ;;  %v3391_v58 = vpop.f32.mrb[73].mxu1 }
 0x17a   :  { %v4575_v27 = vpop.f32.mrb[74].mxu0  ;;  %v4577_v15 = vpop.f32.mrb[74].mxu1 }
 0x17b   :  { %5064 = vst [vmem:[#allocation32_spill] sm:$0xff] %v4575_v27  ;;  %5065 = vst [vmem:[#allocation33_spill] sm:$0xff] %v4577_v15  ;;  %v3282_v6 = vpop.f32.mrb[75].mxu0  ;;  %v3392_v46 = vpop.f32.mrb[75].mxu1 }
 0x17c   :  { %v3737_v46 = vld [vmem:[%s4974_s0 + $0x230] sm:$0xff]  }
 0x17d   :  { %3508 = vmatmul.mubr.msk.bf16.gmra.mrb[180].mxu0 %vm226_vm3, %v3735_v16  ;;  %3618 = vmatmul.mubr.msk.bf16.gmra.mrb[180].mxu1 %vm226_vm3, %v3736_v10  ;;  %v3738_v16 = vld [vmem:[%s4974_s0 + $0x2f4] sm:$0xff]  }
 0x17e   :  { %3511 = vmatprep.mubr.msk.bf16.mxu0 %vm3746_vm0, %v5045_v34  ;;  %3621 = vmatprep.mubr.msk.bf16.mxu1 %vm3746_vm0, %v5045_v34 }
 0x180   :  { %v4587_v0 = vpop.f32.mrb[76].mxu0  ;;  %v4589_v58 = vpop.f32.mrb[76].mxu1 }
 0x181   :  { %5066 = vst [vmem:[#allocation34_spill] sm:$0xff] %v4587_v0  ;;  %5067 = vst [vmem:[#allocation35_spill] sm:$0xff] %v4589_v58  ;;  %v3285_v39 = vpop.f32.mrb[77].mxu0  ;;  %v3395_v6 = vpop.f32.mrb[77].mxu1 }
 0x182   :  { %v4599_v10 = vpop.f32.mrb[78].mxu0  ;;  %v4601_v15 = vpop.f32.mrb[78].mxu1 }
 0x183   :  { %5068 = vst [vmem:[#allocation36_spill] sm:$0xff] %v4599_v10  ;;  %5069 = vst [vmem:[#allocation37_spill] sm:$0xff] %v4601_v15  ;;  %v3286_v3 = vpop.f32.mrb[79].mxu0  ;;  %v3396_v22 = vpop.f32.mrb[79].mxu1 }
 0x184   :  { %v3739_v22 = vld [vmem:[%s4974_s0 + $0x238] sm:$0xff]  }
 0x185   :  { %3512 = vmatmul.mubr.msk.bf16.gmra.mrb[184].mxu0 %vm226_vm3, %v3737_v46  ;;  %3622 = vmatmul.mubr.msk.bf16.gmra.mrb[184].mxu1 %vm226_vm3, %v3738_v16  ;;  %v3740_v46 = vld [vmem:[%s4974_s0 + $0x2fc] sm:$0xff]  }
 0x186   :  { %3515 = vmatprep.mubr.msk.bf16.mxu0 %vm3746_vm0, %v5045_v34  ;;  %3625 = vmatprep.mubr.msk.bf16.mxu1 %vm3746_vm0, %v5045_v34 }
 0x188   :  { %v4611_v39 = vpop.f32.mrb[80].mxu0  ;;  %v4613_v6 = vpop.f32.mrb[80].mxu1 }
 0x189   :  { %5070 = vst [vmem:[#allocation38_spill] sm:$0xff] %v4611_v39  ;;  %5071 = vst [vmem:[#allocation39_spill] sm:$0xff] %v4613_v6  ;;  %v3289_v27 = vpop.f32.mrb[81].mxu0  ;;  %v3399_v3 = vpop.f32.mrb[81].mxu1 }
 0x18a   :  { %v4623_v16 = vpop.f32.mrb[82].mxu0  ;;  %v4625_v15 = vpop.f32.mrb[82].mxu1 }
 0x18b   :  { %5072 = vst [vmem:[#allocation40_spill] sm:$0xff] %v4623_v16  ;;  %5073 = vst [vmem:[#allocation41_spill] sm:$0xff] %v4625_v15  ;;  %v3290_v58 = vpop.f32.mrb[83].mxu0  ;;  %v3400_v0 = vpop.f32.mrb[83].mxu1 }
 0x18c   :  { %v3741_v0 = vld [vmem:[%s4974_s0 + $0x240] sm:$0xff]  }
 0x18d   :  { %3516 = vmatmul.mubr.msk.bf16.gmra.mrb[188].mxu0 %vm226_vm3, %v3739_v22  ;;  %3626 = vmatmul.mubr.msk.bf16.gmra.mrb[188].mxu1 %vm226_vm3, %v3740_v46  ;;  %v3742_v22 = vld [vmem:[%s4974_s0 + $0x304] sm:$0xff]  }
 0x18e   :  { %3519 = vmatprep.mubr.msk.bf16.mxu0 %vm3746_vm0, %v5045_v34  ;;  %3629 = vmatprep.mubr.msk.bf16.mxu1 %vm3746_vm0, %v5045_v34 }
 0x190   :  { %v4635_v27 = vpop.f32.mrb[84].mxu0  ;;  %v4637_v3 = vpop.f32.mrb[84].mxu1 }
 0x191   :  { %5074 = vst [vmem:[#allocation42_spill] sm:$0xff] %v4635_v27  ;;  %5075 = vst [vmem:[#allocation43_spill] sm:$0xff] %v4637_v3  ;;  %v3293_v10 = vpop.f32.mrb[85].mxu0  ;;  %v3403_v58 = vpop.f32.mrb[85].mxu1 }
 0x192   :  { %v4647_v46 = vpop.f32.mrb[86].mxu0  ;;  %v4649_v15 = vpop.f32.mrb[86].mxu1 }
 0x193   :  { %5076 = vst [vmem:[#allocation44_spill] sm:$0xff] %v4647_v46  ;;  %5077 = vst [vmem:[#allocation45_spill] sm:$0xff] %v4649_v15  ;;  %v3294_v6 = vpop.f32.mrb[87].mxu0  ;;  %v3404_v39 = vpop.f32.mrb[87].mxu1 }
 0x194   :  { %v3743_v39 = vld [vmem:[%s4974_s0 + $0x248] ss:$0 sps:$4 sm:$0xff]  }
 0x195   :  { %3520 = vmatmul.mubr.msk.bf16.gmra.mrb[192].mxu0 %vm226_vm3, %v3741_v0  ;;  %3630 = vmatmul.mubr.msk.bf16.gmra.mrb[192].mxu1 %vm226_vm3, %v3742_v22  ;;  %v3744_v0 = vld [vmem:[%s4974_s0 + $0x30c] ss:$0 sps:$4 sm:$0xff]  }
 0x196   :  { %3523 = vmatprep.mubr.msk.bf16.mxu0 %vm3746_vm0, %v5045_v34  ;;  %3633 = vmatprep.mubr.msk.bf16.mxu1 %vm3746_vm0, %v5045_v34 }
 0x198   :  { %v4659_v10 = vpop.f32.mrb[88].mxu0  ;;  %v4661_v58 = vpop.f32.mrb[88].mxu1 }
 0x199   :  { %5078 = vst [vmem:[#allocation46_spill] sm:$0xff] %v4659_v10  ;;  %5079 = vst [vmem:[#allocation47_spill] sm:$0xff] %v4661_v58  ;;  %v3297_v16 = vpop.f32.mrb[89].mxu0  ;;  %v3407_v6 = vpop.f32.mrb[89].mxu1 }
 0x19a   :  { %v4671_v22 = vpop.f32.mrb[90].mxu0  ;;  %v4673_v34 = vpop.f32.mrb[90].mxu1 }
 0x19b   :  { %5080 = vst [vmem:[#allocation48_spill] sm:$0xff] %v4671_v22  ;;  %5081 = vst [vmem:[#allocation49_spill] sm:$0xff] %v4673_v34  ;;  %v3298_v46 = vpop.f32.mrb[91].mxu0  ;;  %v3408_v3 = vpop.f32.mrb[91].mxu1 }
 0x19d   :  { %3524 = vmatmul.mubr.msk.bf16.gmra.mrb[196].mxu0 %vm226_vm3, %v3743_v39  ;;  %3634 = vmatmul.mubr.msk.bf16.gmra.mrb[196].mxu1 %vm226_vm3, %v3744_v0 }
 0x1a0   :  { %v4679_v16 = vpop.f32.mrb[92].mxu0  ;;  %v4681_v6 = vpop.f32.mrb[92].mxu1 }
 0x1a1   :  { %5082 = vst [vmem:[#allocation50_spill] sm:$0xff] %v4679_v16  ;;  %5083 = vst [vmem:[#allocation51_spill] sm:$0xff] %v4681_v6  ;;  %v3301_v58 = vpop.f32.mrb[93].mxu0  ;;  %v3411_v10 = vpop.f32.mrb[93].mxu1 }
 0x1a2   :  { %v4685_v27 = vpop.f32.mrb[94].mxu0  ;;  %v4687_v4 = vpop.f32.mrb[94].mxu1 }
 0x1a3   :  { %5084 = vst [vmem:[#allocation52_spill] sm:$0xff] %v4685_v27  ;;  %5085 = vst [vmem:[#allocation53_spill] sm:$0xff] %v4687_v4  ;;  %v3302_v46 = vpop.f32.mrb[95].mxu0  ;;  %v3412_v39 = vpop.f32.mrb[95].mxu1 }
 0x1a4   :  { %v4700_v46 = vld [vmem:[%s4975_s2] ss:$0 sm:$0xff] }
 0x1a8   :  { %v4691_v15 = vpop.f32.mrb[96].mxu0  ;;  %v4693_v0 = vpop.f32.mrb[96].mxu1 }
 0x1a9   :  { %5086 = vst [vmem:[#allocation54_spill] sm:$0xff] %v4691_v15  ;;  %5087 = vst [vmem:[#allocation55_spill] sm:$0xff] %v4693_v0  ;;  %v3305_v22 = vpop.f32.mrb[97].mxu0  ;;  %v3415_v51 = vpop.f32.mrb[97].mxu1 }
 0x1aa   :  { %v538_v58 = vpop.f32.mrb[98].mxu0  ;;  %v1018_v10 = vpop.f32.mrb[98].mxu1  ;;  %v5088_v22 = vmax.f32 %v4131_v1, %v4133_v2 }
 0x1ab   :  { %v3306_v6 = vpop.f32.mrb[99].mxu0  ;;  %v3416_v16 = vpop.f32.mrb[99].mxu1 }
 0x1b0   :  { %v1303_v24 = vpop.f32.mrb[100].mxu0  ;;  %v1783_v40 = vpop.f32.mrb[100].mxu1 }
 0x1b1   :  { %v2030_v63 = vmax.f32 %v1303_v24, %v1783_v40  ;;  %v3429_v30 = vpop.f32.mrb[101].mxu0  ;;  %v3539_v3 = vpop.f32.mrb[101].mxu1 }
 0x1b2   :  { %v1306_v39 = vpop.f32.mrb[102].mxu0  ;;  %v1786_v4 = vpop.f32.mrb[102].mxu1  ;;  %v5089_v30 = vmax.f32 %v4143_v8, %v4145_v9 }
 0x1b3   :  { %v2079_v51 = vmax.f32 %v5088_v22, %v2030_v63  ;;  %v2031_v58 = vmax.f32 %v1306_v39, %v1786_v4  ;;  %v3430_v10 = vpop.f32.mrb[103].mxu0  ;;  %v3540_v6 = vpop.f32.mrb[103].mxu1  ;;  %v5090_v4 = vmax.f32 %v4155_v13, %v4157_v14 }
 0x1b5   :  { %v2135_v16 = vadd.f32 %v4700_v46, %v2079_v51  ;;  %v2080_v40 = vmax.f32 %v5089_v30, %v2031_v58 }
 0x1b7   :  { %v2136_v24 = vadd.f32 %v4700_v46, %v2080_v40  ;;  %v2184_v0 = vmax.f32 %v2135_v16, 0.0  ;;  %v5092_v40 = vmax.f32 %v4179_v25, %v4181_v26 }
 0x1b8   :  { %v1311_v3 = vpop.f32.mrb[104].mxu0  ;;  %v1791_v34 = vpop.f32.mrb[104].mxu1 }
 0x1b9   :  { %v2185_v15 = vmax.f32 %v2136_v24, 0.0  ;;  %v2032_v27 = vmax.f32 %v1311_v3, %v1791_v34  ;;  %v3433_v18 = vpop.f32.mrb[105].mxu0  ;;  %v3543_v52 = vpop.f32.mrb[105].mxu1 }
 0x1ba   :  { %v1314_v1 = vpop.f32.mrb[106].mxu0  ;;  %v1794_v2 = vpop.f32.mrb[106].mxu1  ;;  %v5091_v18 = vmax.f32 %v4167_v20, %v4169_v21 }
 0x1bb   :  { %v2937_v63 = vpack.c.bf16 %v2185_v15, %v2184_v0  ;;  %v2081_v39 = vmax.f32 %v5090_v4, %v2032_v27  ;;  %v2033_v22 = vmax.f32 %v1314_v1, %v1794_v2  ;;  %v3434_v51 = vpop.f32.mrb[107].mxu0  ;;  %v3544_v8 = vpop.f32.mrb[107].mxu1  ;;  %v5093_v2 = vmax.f32 %v4191_v32, %v4193_v33 }
 0x1bd   :  { %2938 = vst [vmem:[%s4976_s3] sm:$0xff] %v2937_v63   ;;  %v2137_v9 = vadd.f32 %v4700_v46, %v2081_v39  ;;  %v2082_v52 = vmax.f32 %v5091_v18, %v2033_v22 }
 0x1bf   :  { %v2138_v34 = vadd.f32 %v4700_v46, %v2082_v52  ;;  %v2186_v58 = vmax.f32 %v2137_v9, 0.0 }
 0x1c0   :  { %v1319_v15 = vpop.f32.mrb[108].mxu0  ;;  %v1799_v0 = vpop.f32.mrb[108].mxu1 }
 0x1c1   :  { %v2187_v13 = vmax.f32 %v2138_v34, 0.0  ;;  %v2034_v14 = vmax.f32 %v1319_v15, %v1799_v0  ;;  %v3437_v27 = vpop.f32.mrb[109].mxu0  ;;  %v3547_v10 = vpop.f32.mrb[109].mxu1  ;;  %v5094_v15 = vmax.f32 %v4203_v37, %v4205_v38 }
 0x1c2   :  { %v1322_v6 = vpop.f32.mrb[110].mxu0  ;;  %v1802_v16 = vpop.f32.mrb[110].mxu1 }
 0x1c3   :  { %v2942_v30 = vpack.c.bf16 %v2187_v13, %v2186_v58  ;;  %v2083_v24 = vmax.f32 %v5092_v40, %v2034_v14  ;;  %v2035_v3 = vmax.f32 %v1322_v6, %v1802_v16  ;;  %v3438_v1 = vpop.f32.mrb[111].mxu0  ;;  %v3548_v20 = vpop.f32.mrb[111].mxu1  ;;  %v5095_v14 = vmax.f32 %v4215_v44, %v4217_v45 }
 0x1c5   :  { %3054 = vst [vmem:[%s4976_s3 + $0x8] sm:$0xff] %v2942_v30   ;;  %v2139_v21 = vadd.f32 %v4700_v46, %v2083_v24  ;;  %v2084_v63 = vmax.f32 %v5093_v2, %v2035_v3 }
 0x1c7   :  { %v2140_v4 = vadd.f32 %v4700_v46, %v2084_v63  ;;  %v2188_v51 = vmax.f32 %v2139_v21, 0.0  ;;  %v5096_v21 = vmax.f32 %v4227_v49, %v4229_v50 }
 0x1c8   :  { %v1327_v39 = vpop.f32.mrb[112].mxu0  ;;  %v1807_v22 = vpop.f32.mrb[112].mxu1 }
 0x1c9   :  { %v2189_v25 = vmax.f32 %v2140_v4, 0.0  ;;  %v2036_v26 = vmax.f32 %v1327_v39, %v1807_v22  ;;  %v3441_v8 = vpop.f32.mrb[113].mxu0  ;;  %v3551_v9 = vpop.f32.mrb[113].mxu1  ;;  %v5097_v39 = vmax.f32 %v4239_v56, %v4241_v57 }
 0x1ca   :  { %v1330_v18 = vpop.f32.mrb[114].mxu0  ;;  %v1810_v52 = vpop.f32.mrb[114].mxu1 }
 0x1cb   :  { %v2947_v34 = vpack.c.bf16 %v2189_v25, %v2188_v51  ;;  %v2085_v0 = vmax.f32 %v5094_v15, %v2036_v26  ;;  %v2037_v58 = vmax.f32 %v1330_v18, %v1810_v52  ;;  %v3442_v13 = vpop.f32.mrb[115].mxu0  ;;  %v3552_v32 = vpop.f32.mrb[115].mxu1 }
 0x1cd   :  { %3055 = vst [vmem:[%s4976_s3 + $0x10] sm:$0xff] %v2947_v34   ;;  %v2141_v33 = vadd.f32 %v4700_v46, %v2085_v0  ;;  %v2086_v27 = vmax.f32 %v5095_v14, %v2037_v58  ;;  %v5098_v0 = vmax.f32 %v4251_v61, %v4253_v62 }
 0x1cf   :  { %v2142_v10 = vadd.f32 %v4700_v46, %v2086_v27  ;;  %v2190_v30 = vmax.f32 %v2141_v33, 0.0  ;;  %v5099_v33 = vmax.f32 %v4263_v11, %v4265_v12 }
 0x1d0   :  { %v1335_v6 = vpop.f32.mrb[116].mxu0  ;;  %v1815_v16 = vpop.f32.mrb[116].mxu1 }
 0x1d1   :  { %v2191_v37 = vmax.f32 %v2142_v10, 0.0  ;;  %v2038_v38 = vmax.f32 %v1335_v6, %v1815_v16  ;;  %v3445_v40 = vpop.f32.mrb[117].mxu0  ;;  %v3555_v24 = vpop.f32.mrb[117].mxu1 }
 0x1d2   :  { %v1338_v3 = vpop.f32.mrb[118].mxu0  ;;  %v1818_v1 = vpop.f32.mrb[118].mxu1 }
 0x1d3   :  { %v2952_v20 = vpack.c.bf16 %v2191_v37, %v2190_v30  ;;  %v2087_v2 = vmax.f32 %v5096_v21, %v2038_v38  ;;  %v2039_v63 = vmax.f32 %v1338_v3, %v1818_v1  ;;  %v3446_v4 = vpop.f32.mrb[119].mxu0  ;;  %v3556_v44 = vpop.f32.mrb[119].mxu1  ;;  %v5100_v3 = vmax.f32 %v4275_v19, %v4277_v23 }
 0x1d5   :  { %3056 = vst [vmem:[%s4976_s3 + $0x18] sm:$0xff] %v2952_v20   ;;  %v2143_v45 = vadd.f32 %v4700_v46, %v2087_v2  ;;  %v2088_v22 = vmax.f32 %v5097_v39, %v2039_v63  ;;  %v5101_v2 = vmax.f32 %v4287_v35, %v4289_v36 }
 0x1d7   :  { %v2144_v51 = vadd.f32 %v4700_v46, %v2088_v22  ;;  %v2192_v8 = vmax.f32 %v2143_v45, 0.0 }
 0x1d8   :  { %v1343_v25 = vpop.f32.mrb[120].mxu0  ;;  %v1823_v26 = vpop.f32.mrb[120].mxu1 }
 0x1d9   :  { %v2193_v49 = vmax.f32 %v2144_v51, 0.0  ;;  %v2040_v50 = vmax.f32 %v1343_v25, %v1823_v26  ;;  %v3449_v9 = vpop.f32.mrb[121].mxu0  ;;  %v3559_v18 = vpop.f32.mrb[121].mxu1 }
 0x1da   :  { %v1346_v52 = vpop.f32.mrb[122].mxu0  ;;  %v1826_v34 = vpop.f32.mrb[122].mxu1 }
 0x1db   :  { %v2957_v15 = vpack.c.bf16 %v2193_v49, %v2192_v8  ;;  %v2089_v58 = vmax.f32 %v5098_v0, %v2040_v50  ;;  %v2041_v13 = vmax.f32 %v1346_v52, %v1826_v34  ;;  %v3450_v32 = vpop.f32.mrb[123].mxu0  ;;  %v3560_v56 = vpop.f32.mrb[123].mxu1  ;;  %v5102_v49 = vmax.f32 %v4299_v43, %v4301_v47 }
 0x1dc   :  { %v5103_v52 = vmax.f32 %v4311_v59, %v4313_v60 }
 0x1dd   :  { %3057 = vst [vmem:[%s4976_s3 + $0x20] sm:$0xff] %v2957_v15   ;;  %v2145_v57 = vadd.f32 %v4700_v46, %v2089_v58  ;;  %v2090_v14 = vmax.f32 %v5099_v33, %v2041_v13 }
 0x1df   :  { %v2146_v27 = vadd.f32 %v4700_v46, %v2090_v14  ;;  %v2194_v16 = vmax.f32 %v2145_v57, 0.0 }
 0x1e0   :  { %v1351_v10 = vpop.f32.mrb[124].mxu0  ;;  %v1831_v6 = vpop.f32.mrb[124].mxu1 }
 0x1e1   :  { %v2195_v61 = vmax.f32 %v2146_v27, 0.0  ;;  %v2042_v62 = vmax.f32 %v1351_v10, %v1831_v6  ;;  %v3453_v30 = vpop.f32.mrb[125].mxu0  ;;  %v3563_v37 = vpop.f32.mrb[125].mxu1  ;;  %v5104_v27 = vmax.f32 %v4323_v7, %v4325_v17 }
 0x1e2   :  { %v1354_v38 = vpop.f32.mrb[126].mxu0  ;;  %v1834_v40 = vpop.f32.mrb[126].mxu1 }
 0x1e3   :  { %v2962_v24 = vpack.c.bf16 %v2195_v61, %v2194_v16  ;;  %v2091_v1 = vmax.f32 %v5100_v3, %v2042_v62  ;;  %v2043_v20 = vmax.f32 %v1354_v38, %v1834_v40  ;;  %v3454_v21 = vpop.f32.mrb[127].mxu0  ;;  %v3564_v11 = vpop.f32.mrb[127].mxu1  ;;  %v5105_v61 = vmax.f32 %v4335_v41, %v4337_v42 }
 0x1e4   :  { %v5106_v11 = vmax.f32 %v4347_v55, %v4349_v5 }
 0x1e5   :  { %3058 = vst [vmem:[%s4976_s3 + $0x28] sm:$0xff] %v2962_v24   ;;  %v2147_v12 = vadd.f32 %v4700_v46, %v2091_v1  ;;  %v2092_v63 = vmax.f32 %v5101_v2, %v2043_v20 }
 0x1e7   :  { %v2148_v4 = vadd.f32 %v4700_v46, %v2092_v63  ;;  %v2196_v39 = vmax.f32 %v2147_v12, 0.0 }
 0x1e8   :  { %v1359_v44 = vpop.f32.mrb[128].mxu0  ;;  %v1839_v45 = vpop.f32.mrb[128].mxu1 }
 0x1e9   :  { %v2197_v19 = vmax.f32 %v2148_v4, 0.0  ;;  %v2044_v23 = vmax.f32 %v1359_v44, %v1839_v45  ;;  %v3457_v22 = vpop.f32.mrb[129].mxu0  ;;  %v3567_v51 = vpop.f32.mrb[129].mxu1  ;;  %v5107_v4 = vmax.f32 %v4359_v53, %v4361_v54 }
 0x1ea   :  { %v1362_v25 = vpop.f32.mrb[130].mxu0  ;;  %v1842_v26 = vpop.f32.mrb[130].mxu1 }
 0x1eb   :  { %v2967_v8 = vpack.c.bf16 %v2197_v19, %v2196_v39  ;;  %v2093_v50 = vmax.f32 %v5102_v49, %v2044_v23  ;;  %v2045_v9 = vmax.f32 %v1362_v25, %v1842_v26  ;;  %v3458_v18 = vpop.f32.mrb[131].mxu0  ;;  %v3568_v35 = vpop.f32.mrb[131].mxu1  ;;  %v5108_v49 = vmax.f32 %v4371_v28, %v4373_v29 }
 0x1ec   :  { %v5109_v35 = vmax.f32 %v4383_v31, %v4385_v48 }
 0x1ed   :  { %3059 = vst [vmem:[%s4976_s3 + $0x30] sm:$0xff] %v2967_v8   ;;  %v2149_v36 = vadd.f32 %v4700_v46, %v2093_v50  ;;  %v2094_v34 = vmax.f32 %v5103_v52, %v2045_v9 }
 0x1ef   :  { %v2150_v15 = vadd.f32 %v4700_v46, %v2094_v34  ;;  %v2198_v13 = vmax.f32 %v2149_v36, 0.0 }
 0x1f0   :  { %v1367_v0 = vpop.f32.mrb[132].mxu0  ;;  %v1847_v58 = vpop.f32.mrb[132].mxu1 }
 0x1f1   :  { %v2199_v43 = vmax.f32 %v2150_v15, 0.0  ;;  %v2046_v47 = vmax.f32 %v1367_v0, %v1847_v58  ;;  %v3461_v32 = vpop.f32.mrb[133].mxu0  ;;  %v3571_v56 = vpop.f32.mrb[133].mxu1 }
 0x1f2   :  { %v1370_v57 = vpop.f32.mrb[134].mxu0  ;;  %v1850_v33 = vpop.f32.mrb[134].mxu1  ;;  %v5110_v56 = vld [vmem:[#allocation2_spill] sm:$0xff] }
 0x1f3   :  { %v2972_v14 = vpack.c.bf16 %v2199_v43, %v2198_v13  ;;  %v2095_v10 = vmax.f32 %v5104_v27, %v2046_v47  ;;  %v2047_v6 = vmax.f32 %v1370_v57, %v1850_v33  ;;  %v3462_v16 = vpop.f32.mrb[135].mxu0  ;;  %v3572_v59 = vpop.f32.mrb[135].mxu1  ;;  %v5111_v57 = vld [vmem:[#allocation3_spill] sm:$0xff] }
 0x1f4   :  { %v5112_v33 = vmax.f32 %v5110_v56, %v5111_v57  ;;  %v5114_v16 = vld [vmem:[#allocation5_spill] sm:$0xff] }
 0x1f5   :  { %3060 = vst [vmem:[%s4976_s3 + $0x38] sm:$0xff] %v2972_v14   ;;  %v2151_v60 = vadd.f32 %v4700_v46, %v2095_v10  ;;  %v2096_v62 = vmax.f32 %v5105_v61, %v2047_v6  ;;  %v5113_v6 = vld [vmem:[#allocation4_spill] sm:$0xff] }
 0x1f6   :  { %v5115_v59 = vmax.f32 %v5113_v6, %v5114_v16 }
 0x1f7   :  { %v2152_v30 = vadd.f32 %v4700_v46, %v2096_v62  ;;  %v2200_v40 = vmax.f32 %v2151_v60, 0.0 }
 0x1f8   :  { %v1375_v37 = vpop.f32.mrb[136].mxu0  ;;  %v1855_v38 = vpop.f32.mrb[136].mxu1 }
 0x1f9   :  { %v2201_v7 = vmax.f32 %v2152_v30, 0.0  ;;  %v2048_v17 = vmax.f32 %v1375_v37, %v1855_v38  ;;  %v3465_v24 = vpop.f32.mrb[137].mxu0  ;;  %v3575_v3 = vpop.f32.mrb[137].mxu1 }
 0x1fa   :  { %v1378_v1 = vpop.f32.mrb[138].mxu0  ;;  %v1858_v20 = vpop.f32.mrb[138].mxu1 }
 0x1fb   :  { %v2977_v21 = vpack.c.bf16 %v2201_v7, %v2200_v40  ;;  %v2097_v12 = vmax.f32 %v5106_v11, %v2048_v17  ;;  %v2049_v2 = vmax.f32 %v1378_v1, %v1858_v20  ;;  %v3466_v63 = vpop.f32.mrb[139].mxu0  ;;  %v3576_v41 = vpop.f32.mrb[139].mxu1  ;;  %v5116_v20 = vld [vmem:[#allocation6_spill] sm:$0xff] }
 0x1fd   :  { %3061 = vst [vmem:[%s4976_s3 + $0x40] sm:$0xff] %v2977_v21   ;;  %v2153_v42 = vadd.f32 %v4700_v46, %v2097_v12  ;;  %v2098_v44 = vmax.f32 %v5107_v4, %v2049_v2  ;;  %v5117_v21 = vld [vmem:[#allocation7_spill] sm:$0xff]  ;;  %v5119_v4 = vld [vmem:[#allocation8_spill] sm:$0xff] }
 0x1fe   :  { %v5118_v11 = vmax.f32 %v5116_v20, %v5117_v21 }
 0x1ff   :  { %v2154_v45 = vadd.f32 %v4700_v46, %v2098_v44  ;;  %v2202_v23 = vmax.f32 %v2153_v42, 0.0  ;;  %v5120_v44 = vld [vmem:[#allocation9_spill] sm:$0xff] }
 0x200   :  { %v1383_v39 = vpop.f32.mrb[140].mxu0  ;;  %v1863_v19 = vpop.f32.mrb[140].mxu1 }
 0x201   :  { %v2203_v55 = vmax.f32 %v2154_v45, 0.0  ;;  %v2050_v5 = vmax.f32 %v1383_v39, %v1863_v19  ;;  %v3469_v22 = vpop.f32.mrb[141].mxu0  ;;  %v3579_v51 = vpop.f32.mrb[141].mxu1  ;;  %v5121_v45 = vmax.f32 %v5119_v4, %v5120_v44 }
 0x202   :  { %v1386_v25 = vpop.f32.mrb[142].mxu0  ;;  %v1866_v26 = vpop.f32.mrb[142].mxu1 }
 0x203   :  { %v2982_v8 = vpack.c.bf16 %v2203_v55, %v2202_v23  ;;  %v2099_v50 = vmax.f32 %v5108_v49, %v2050_v5  ;;  %v2051_v9 = vmax.f32 %v1386_v25, %v1866_v26  ;;  %v3470_v18 = vpop.f32.mrb[143].mxu0  ;;  %v3580_v53 = vpop.f32.mrb[143].mxu1 }
 0x204   :  { %v5123_v18 = vld [vmem:[#allocation11_spill] sm:$0xff] }
 0x205   :  { %3062 = vst [vmem:[%s4976_s3 + $0x48] sm:$0xff] %v2982_v8   ;;  %v2155_v54 = vadd.f32 %v4700_v46, %v2099_v50  ;;  %v2100_v36 = vmax.f32 %v5109_v35, %v2051_v9  ;;  %v5122_v9 = vld [vmem:[#allocation10_spill] sm:$0xff] }
 0x206   :  { %v5124_v53 = vmax.f32 %v5122_v9, %v5123_v18 }
 0x207   :  { %v2156_v52 = vadd.f32 %v4700_v46, %v2100_v36  ;;  %v2204_v0 = vmax.f32 %v2155_v54, 0.0 }
 0x208   :  { %v1391_v34 = vpop.f32.mrb[144].mxu0  ;;  %v1871_v15 = vpop.f32.mrb[144].mxu1 }
 0x209   :  { %v2205_v28 = vmax.f32 %v2156_v52, 0.0  ;;  %v2052_v29 = vmax.f32 %v1391_v34, %v1871_v15  ;;  %v3473_v58 = vpop.f32.mrb[145].mxu0  ;;  %v3583_v13 = vpop.f32.mrb[145].mxu1  ;;  %v5125_v15 = vld [vmem:[#allocation12_spill] sm:$0xff] }
 0x20a   :  { %v1394_v43 = vpop.f32.mrb[146].mxu0  ;;  %v1874_v47 = vpop.f32.mrb[146].mxu1 }
 0x20b   :  { %v2987_v32 = vpack.c.bf16 %v2205_v28, %v2204_v0  ;;  %v2101_v14 = vmax.f32 %v5112_v33, %v2052_v29  ;;  %v2053_v27 = vmax.f32 %v1394_v43, %v1874_v47  ;;  %v3474_v10 = vpop.f32.mrb[147].mxu0  ;;  %v3584_v48 = vpop.f32.mrb[147].mxu1  ;;  %v5126_v0 = vld [vmem:[#allocation13_spill] sm:$0xff] }
 0x20c   :  { %v5127_v28 = vmax.f32 %v5125_v15, %v5126_v0  ;;  %v5128_v48 = vld [vmem:[#allocation14_spill] sm:$0xff] }
 0x20d   :  { %3063 = vst [vmem:[%s4976_s3 + $0x50] sm:$0xff] %v2987_v32   ;;  %v2157_v31 = vadd.f32 %v4700_v46, %v2101_v14  ;;  %v2102_v60 = vmax.f32 %v5115_v59, %v2053_v27 }
 0x20f   :  { %v2158_v61 = vadd.f32 %v4700_v46, %v2102_v60  ;;  %v2206_v37 = vmax.f32 %v2157_v31, 0.0  ;;  %v5129_v31 = vld [vmem:[#allocation15_spill] sm:$0xff] }
 0x210   :  { %v1399_v62 = vpop.f32.mrb[148].mxu0  ;;  %v1879_v30 = vpop.f32.mrb[148].mxu1  ;;  %v5130_v6 = vmax.f32 %v5128_v48, %v5129_v31 }
 0x211   :  { %v2207_v38 = vmax.f32 %v2158_v61, 0.0  ;;  %v2054_v40 = vmax.f32 %v1399_v62, %v1879_v30  ;;  %v3477_v7 = vpop.f32.mrb[149].mxu0  ;;  %v3587_v17 = vpop.f32.mrb[149].mxu1  ;;  %v5131_v30 = vld [vmem:[#allocation16_spill] sm:$0xff] }
 0x212   :  { %v1402_v24 = vpop.f32.mrb[150].mxu0  ;;  %v1882_v3 = vpop.f32.mrb[150].mxu1 }
 0x213   :  { %v2992_v1 = vpack.c.bf16 %v2207_v38, %v2206_v37  ;;  %v2103_v12 = vmax.f32 %v5118_v11, %v2054_v40  ;;  %v2055_v2 = vmax.f32 %v1402_v24, %v1882_v3  ;;  %v3478_v63 = vpop.f32.mrb[151].mxu0  ;;  %v3588_v41 = vpop.f32.mrb[151].mxu1  ;;  %v5132_v37 = vld [vmem:[#allocation17_spill] sm:$0xff] }
 0x214   :  { %v5133_v38 = vmax.f32 %v5131_v30, %v5132_v37  ;;  %v5134_v41 = vld [vmem:[#allocation18_spill] sm:$0xff] }
 0x215   :  { %3064 = vst [vmem:[%s4976_s3 + $0x58] sm:$0xff] %v2992_v1   ;;  %v2159_v42 = vadd.f32 %v4700_v46, %v2103_v12  ;;  %v2104_v39 = vmax.f32 %v5121_v45, %v2055_v2 }
 0x217   :  { %v2160_v19 = vadd.f32 %v4700_v46, %v2104_v39  ;;  %v2208_v5 = vmax.f32 %v2159_v42, 0.0  ;;  %v5135_v42 = vld [vmem:[#allocation19_spill] sm:$0xff] }
 0x218   :  { %v1407_v23 = vpop.f32.mrb[152].mxu0  ;;  %v1887_v55 = vpop.f32.mrb[152].mxu1  ;;  %v5136_v4 = vmax.f32 %v5134_v41, %v5135_v42 }
 0x219   :  { %v2209_v22 = vmax.f32 %v2160_v19, 0.0  ;;  %v2056_v51 = vmax.f32 %v1407_v23, %v1887_v55  ;;  %v3481_v25 = vpop.f32.mrb[153].mxu0  ;;  %v3591_v26 = vpop.f32.mrb[153].mxu1  ;;  %v5137_v55 = vld [vmem:[#allocation20_spill] sm:$0xff] }
 0x21a   :  { %v1410_v8 = vpop.f32.mrb[154].mxu0  ;;  %v1890_v49 = vpop.f32.mrb[154].mxu1 }
 0x21b   :  { %v2997_v50 = vpack.c.bf16 %v2209_v22, %v2208_v5  ;;  %v2105_v54 = vmax.f32 %v5124_v53, %v2056_v51  ;;  %v2057_v35 = vmax.f32 %v1410_v8, %v1890_v49  ;;  %v3482_v36 = vpop.f32.mrb[155].mxu0  ;;  %v3592_v52 = vpop.f32.mrb[155].mxu1  ;;  %v5138_v5 = vld [vmem:[#allocation21_spill] sm:$0xff] }
 0x21c   :  { %v5139_v22 = vmax.f32 %v5137_v55, %v5138_v5  ;;  %v5140_v52 = vld [vmem:[#allocation22_spill] sm:$0xff] }
 0x21d   :  { %3065 = vst [vmem:[%s4976_s3 + $0x60] sm:$0xff] %v2997_v50   ;;  %v2161_v34 = vadd.f32 %v4700_v46, %v2105_v54  ;;  %v2106_v29 = vmax.f32 %v5127_v28, %v2057_v35 }
 0x21f   :  { %v2162_v58 = vadd.f32 %v4700_v46, %v2106_v29  ;;  %v2210_v47 = vmax.f32 %v2161_v34, 0.0  ;;  %v5141_v34 = vld [vmem:[#allocation23_spill] sm:$0xff] }
 0x220   :  { %v1415_v13 = vpop.f32.mrb[156].mxu0  ;;  %v1895_v43 = vpop.f32.mrb[156].mxu1  ;;  %v5142_v15 = vmax.f32 %v5140_v52, %v5141_v34 }
 0x221   :  { %v2211_v32 = vmax.f32 %v2162_v58, 0.0  ;;  %v2058_v56 = vmax.f32 %v1415_v13, %v1895_v43  ;;  %v3485_v57 = vpop.f32.mrb[157].mxu0  ;;  %v3595_v33 = vpop.f32.mrb[157].mxu1  ;;  %v5143_v43 = vld [vmem:[#allocation24_spill] sm:$0xff] }
 0x222   :  { %v1418_v14 = vpop.f32.mrb[158].mxu0  ;;  %v1898_v27 = vpop.f32.mrb[158].mxu1 }
 0x223   :  { %v3002_v10 = vpack.c.bf16 %v2211_v32, %v2210_v47  ;;  %v2107_v16 = vmax.f32 %v5130_v6, %v2058_v56  ;;  %v2059_v59 = vmax.f32 %v1418_v14, %v1898_v27  ;;  %v3486_v60 = vpop.f32.mrb[159].mxu0  ;;  %v3596_v61 = vpop.f32.mrb[159].mxu1  ;;  %v5144_v47 = vld [vmem:[#allocation25_spill] sm:$0xff] }
 0x224   :  { %v5145_v32 = vmax.f32 %v5143_v43, %v5144_v47  ;;  %v5146_v61 = vld [vmem:[#allocation26_spill] sm:$0xff] }
 0x225   :  { %3066 = vst [vmem:[%s4976_s3 + $0x68] sm:$0xff] %v3002_v10   ;;  %v2163_v62 = vadd.f32 %v4700_v46, %v2107_v16  ;;  %v2108_v40 = vmax.f32 %v5133_v38, %v2059_v59 }
 0x227   :  { %v2164_v7 = vadd.f32 %v4700_v46, %v2108_v40  ;;  %v2212_v3 = vmax.f32 %v2163_v62, 0.0  ;;  %v5147_v62 = vld [vmem:[#allocation27_spill] sm:$0xff] }
 0x228   :  { %v1423_v17 = vpop.f32.mrb[160].mxu0  ;;  %v1903_v24 = vpop.f32.mrb[160].mxu1  ;;  %v5148_v30 = vmax.f32 %v5146_v61, %v5147_v62 }
 0x229   :  { %v2213_v1 = vmax.f32 %v2164_v7, 0.0  ;;  %v2060_v20 = vmax.f32 %v1423_v17, %v1903_v24  ;;  %v3489_v21 = vpop.f32.mrb[161].mxu0  ;;  %v3599_v11 = vpop.f32.mrb[161].mxu1  ;;  %v5149_v24 = vld [vmem:[#allocation28_spill] sm:$0xff] }
 0x22a   :  { %v1426_v12 = vpop.f32.mrb[162].mxu0  ;;  %v1906_v2 = vpop.f32.mrb[162].mxu1 }
 0x22b   :  { %v3007_v63 = vpack.c.bf16 %v2213_v1, %v2212_v3  ;;  %v2109_v44 = vmax.f32 %v5136_v4, %v2060_v20  ;;  %v2061_v45 = vmax.f32 %v1426_v12, %v1906_v2  ;;  %v3490_v39 = vpop.f32.mrb[163].mxu0  ;;  %v3600_v19 = vpop.f32.mrb[163].mxu1  ;;  %v5150_v3 = vld [vmem:[#allocation29_spill] sm:$0xff] }
 0x22c   :  { %v5151_v1 = vmax.f32 %v5149_v24, %v5150_v3  ;;  %v5152_v19 = vld [vmem:[#allocation30_spill] sm:$0xff] }
 0x22d   :  { %3067 = vst [vmem:[%s4976_s3 + $0x70] sm:$0xff] %v3007_v63   ;;  %v2165_v23 = vadd.f32 %v4700_v46, %v2109_v44  ;;  %v2110_v51 = vmax.f32 %v5139_v22, %v2061_v45 }
 0x22f   :  { %v2166_v25 = vadd.f32 %v4700_v46, %v2110_v51  ;;  %v2214_v49 = vmax.f32 %v2165_v23, 0.0  ;;  %v5153_v23 = vld [vmem:[#allocation31_spill] sm:$0xff] }
 0x230   :  { %v1431_v26 = vpop.f32.mrb[164].mxu0  ;;  %v1911_v8 = vpop.f32.mrb[164].mxu1  ;;  %v5154_v55 = vmax.f32 %v5152_v19, %v5153_v23 }
 0x231   :  { %v2215_v50 = vmax.f32 %v2166_v25, 0.0  ;;  %v2062_v9 = vmax.f32 %v1431_v26, %v1911_v8  ;;  %v3493_v18 = vpop.f32.mrb[165].mxu0  ;;  %v3603_v53 = vpop.f32.mrb[165].mxu1  ;;  %v5155_v8 = vld [vmem:[#allocation32_spill] sm:$0xff] }
 0x232   :  { %v1434_v54 = vpop.f32.mrb[166].mxu0  ;;  %v1914_v35 = vpop.f32.mrb[166].mxu1 }
 0x233   :  { %v3012_v36 = vpack.c.bf16 %v2215_v50, %v2214_v49  ;;  %v2111_v0 = vmax.f32 %v5142_v15, %v2062_v9  ;;  %v2063_v28 = vmax.f32 %v1434_v54, %v1914_v35  ;;  %v3494_v29 = vpop.f32.mrb[167].mxu0  ;;  %v3604_v58 = vpop.f32.mrb[167].mxu1  ;;  %v5156_v49 = vld [vmem:[#allocation33_spill] sm:$0xff] }
 0x234   :  { %v5157_v50 = vmax.f32 %v5155_v8, %v5156_v49  ;;  %v5158_v58 = vld [vmem:[#allocation34_spill] sm:$0xff] }
 0x235   :  { %3068 = vst [vmem:[%s4976_s3 + $0x78] sm:$0xff] %v3012_v36   ;;  %v2167_v13 = vadd.f32 %v4700_v46, %v2111_v0  ;;  %v2112_v56 = vmax.f32 %v5145_v32, %v2063_v28 }
 0x237   :  { %v2168_v57 = vadd.f32 %v4700_v46, %v2112_v56  ;;  %v2216_v27 = vmax.f32 %v2167_v13, 0.0  ;;  %v5159_v13 = vld [vmem:[#allocation35_spill] sm:$0xff] }
 0x238   :  { %v1439_v33 = vpop.f32.mrb[168].mxu0  ;;  %v1919_v14 = vpop.f32.mrb[168].mxu1  ;;  %v5160_v43 = vmax.f32 %v5158_v58, %v5159_v13 }
 0x239   :  { %v2217_v10 = vmax.f32 %v2168_v57, 0.0  ;;  %v2064_v48 = vmax.f32 %v1439_v33, %v1919_v14  ;;  %v3497_v31 = vpop.f32.mrb[169].mxu0  ;;  %v3607_v6 = vpop.f32.mrb[169].mxu1  ;;  %v5161_v14 = vld [vmem:[#allocation36_spill] sm:$0xff] }
 0x23a   :  { %v1442_v16 = vpop.f32.mrb[170].mxu0  ;;  %v1922_v59 = vpop.f32.mrb[170].mxu1 }
 0x23b   :  { %v3017_v60 = vpack.c.bf16 %v2217_v10, %v2216_v27  ;;  %v2113_v37 = vmax.f32 %v5148_v30, %v2064_v48  ;;  %v2065_v38 = vmax.f32 %v1442_v16, %v1922_v59  ;;  %v3498_v40 = vpop.f32.mrb[171].mxu0  ;;  %v3608_v7 = vpop.f32.mrb[171].mxu1  ;;  %v5162_v27 = vld [vmem:[#allocation37_spill] sm:$0xff] }
 0x23c   :  { %v5163_v10 = vmax.f32 %v5161_v14, %v5162_v27  ;;  %v5164_v7 = vld [vmem:[#allocation38_spill] sm:$0xff] }
 0x23d   :  { %3069 = vst [vmem:[%s4976_s3 + $0x80] sm:$0xff] %v3017_v60   ;;  %v2169_v17 = vadd.f32 %v4700_v46, %v2113_v37  ;;  %v2114_v20 = vmax.f32 %v5151_v1, %v2065_v38 }
 0x23f   :  { %v2170_v21 = vadd.f32 %v4700_v46, %v2114_v20  ;;  %v2218_v2 = vmax.f32 %v2169_v17, 0.0  ;;  %v5165_v17 = vld [vmem:[#allocation39_spill] sm:$0xff] }
 0x240   :  { %v1447_v11 = vpop.f32.mrb[172].mxu0  ;;  %v1927_v12 = vpop.f32.mrb[172].mxu1  ;;  %v5166_v24 = vmax.f32 %v5164_v7, %v5165_v17 }
 0x241   :  { %v2219_v63 = vmax.f32 %v2170_v21, 0.0  ;;  %v2066_v41 = vmax.f32 %v1447_v11, %v1927_v12  ;;  %v3501_v42 = vpop.f32.mrb[173].mxu0  ;;  %v3611_v4 = vpop.f32.mrb[173].mxu1  ;;  %v5167_v12 = vld [vmem:[#allocation40_spill] sm:$0xff] }
 0x242   :  { %v1450_v44 = vpop.f32.mrb[174].mxu0  ;;  %v1930_v45 = vpop.f32.mrb[174].mxu1 }
 0x243   :  { %v3022_v39 = vpack.c.bf16 %v2219_v63, %v2218_v2  ;;  %v2115_v5 = vmax.f32 %v5154_v55, %v2066_v41  ;;  %v2067_v22 = vmax.f32 %v1450_v44, %v1930_v45  ;;  %v3502_v51 = vpop.f32.mrb[175].mxu0  ;;  %v3612_v25 = vpop.f32.mrb[175].mxu1  ;;  %v5168_v2 = vld [vmem:[#allocation41_spill] sm:$0xff] }
 0x244   :  { %v5169_v63 = vmax.f32 %v5167_v12, %v5168_v2  ;;  %v5170_v25 = vld [vmem:[#allocation42_spill] sm:$0xff] }
 0x245   :  { %3070 = vst [vmem:[%s4976_s3 + $0x88] sm:$0xff] %v3022_v39   ;;  %v2171_v26 = vadd.f32 %v4700_v46, %v2115_v5  ;;  %v2116_v9 = vmax.f32 %v5157_v50, %v2067_v22 }
 0x247   :  { %v2172_v18 = vadd.f32 %v4700_v46, %v2116_v9  ;;  %v2220_v35 = vmax.f32 %v2171_v26, 0.0  ;;  %v5171_v26 = vld [vmem:[#allocation43_spill] sm:$0xff] }
 0x248   :  { %v1455_v53 = vpop.f32.mrb[176].mxu0  ;;  %v1935_v54 = vpop.f32.mrb[176].mxu1  ;;  %v5172_v8 = vmax.f32 %v5170_v25, %v5171_v26 }
 0x249   :  { %v2221_v36 = vmax.f32 %v2172_v18, 0.0  ;;  %v2068_v52 = vmax.f32 %v1455_v53, %v1935_v54  ;;  %v3505_v34 = vpop.f32.mrb[177].mxu0  ;;  %v3615_v15 = vpop.f32.mrb[177].mxu1  ;;  %v5173_v54 = vld [vmem:[#allocation44_spill] sm:$0xff] }
 0x24a   :  { %v1458_v0 = vpop.f32.mrb[178].mxu0  ;;  %v1938_v28 = vpop.f32.mrb[178].mxu1 }
 0x24b   :  { %v3027_v29 = vpack.c.bf16 %v2221_v36, %v2220_v35  ;;  %v2117_v47 = vmax.f32 %v5160_v43, %v2068_v52  ;;  %v2069_v32 = vmax.f32 %v1458_v0, %v1938_v28  ;;  %v3506_v56 = vpop.f32.mrb[179].mxu0  ;;  %v3616_v57 = vpop.f32.mrb[179].mxu1  ;;  %v5174_v35 = vld [vmem:[#allocation45_spill] sm:$0xff] }
 0x24c   :  { %v5175_v36 = vmax.f32 %v5173_v54, %v5174_v35  ;;  %v5176_v57 = vld [vmem:[#allocation46_spill] sm:$0xff] }
 0x24d   :  { %3071 = vst [vmem:[%s4976_s3 + $0x90] sm:$0xff] %v3027_v29   ;;  %v2173_v33 = vadd.f32 %v4700_v46, %v2117_v47  ;;  %v2118_v48 = vmax.f32 %v5163_v10, %v2069_v32 }
 0x24f   :  { %v2174_v31 = vadd.f32 %v4700_v46, %v2118_v48  ;;  %v2222_v59 = vmax.f32 %v2173_v33, 0.0  ;;  %v5177_v33 = vld [vmem:[#allocation47_spill] sm:$0xff] }
 0x250   :  { %v1463_v6 = vpop.f32.mrb[180].mxu0  ;;  %v1943_v16 = vpop.f32.mrb[180].mxu1  ;;  %v5178_v14 = vmax.f32 %v5176_v57, %v5177_v33 }
 0x251   :  { %v2223_v60 = vmax.f32 %v2174_v31, 0.0  ;;  %v2070_v61 = vmax.f32 %v1463_v6, %v1943_v16  ;;  %v3509_v62 = vpop.f32.mrb[181].mxu0  ;;  %v3619_v30 = vpop.f32.mrb[181].mxu1  ;;  %v5179_v16 = vld [vmem:[#allocation48_spill] sm:$0xff] }
 0x252   :  { %v1466_v37 = vpop.f32.mrb[182].mxu0  ;;  %v1946_v38 = vpop.f32.mrb[182].mxu1 }
 0x253   :  { %v3032_v40 = vpack.c.bf16 %v2223_v60, %v2222_v59  ;;  %v2119_v3 = vmax.f32 %v5166_v24, %v2070_v61  ;;  %v2071_v1 = vmax.f32 %v1466_v37, %v1946_v38  ;;  %v3510_v20 = vpop.f32.mrb[183].mxu0  ;;  %v3620_v21 = vpop.f32.mrb[183].mxu1  ;;  %v5180_v59 = vld [vmem:[#allocation49_spill] sm:$0xff] }
 0x254   :  { %v5181_v60 = vmax.f32 %v5179_v16, %v5180_v59  ;;  %v5182_v21 = vld [vmem:[#allocation50_spill] sm:$0xff] }
 0x255   :  { %3072 = vst [vmem:[%s4976_s3 + $0x98] sm:$0xff] %v3032_v40   ;;  %v2175_v11 = vadd.f32 %v4700_v46, %v2119_v3  ;;  %v2120_v41 = vmax.f32 %v5169_v63, %v2071_v1 }
 0x257   :  { %v2176_v42 = vadd.f32 %v4700_v46, %v2120_v41  ;;  %v2224_v45 = vmax.f32 %v2175_v11, 0.0  ;;  %v5183_v11 = vld [vmem:[#allocation51_spill] sm:$0xff] }
 0x258   :  { %v1471_v4 = vpop.f32.mrb[184].mxu0  ;;  %v1951_v44 = vpop.f32.mrb[184].mxu1  ;;  %v5184_v12 = vmax.f32 %v5182_v21, %v5183_v11 }
 0x259   :  { %v2225_v39 = vmax.f32 %v2176_v42, 0.0  ;;  %v2072_v19 = vmax.f32 %v1471_v4, %v1951_v44  ;;  %v3513_v23 = vpop.f32.mrb[185].mxu0  ;;  %v3623_v55 = vpop.f32.mrb[185].mxu1  ;;  %v5185_v44 = vld [vmem:[#allocation52_spill] sm:$0xff] }
 0x25a   :  { %v1474_v5 = vpop.f32.mrb[186].mxu0  ;;  %v1954_v22 = vpop.f32.mrb[186].mxu1 }
 0x25b   :  { %v3037_v51 = vpack.c.bf16 %v2225_v39, %v2224_v45  ;;  %v2121_v49 = vmax.f32 %v5172_v8, %v2072_v19  ;;  %v2073_v50 = vmax.f32 %v1474_v5, %v1954_v22  ;;  %v3514_v9 = vpop.f32.mrb[187].mxu0  ;;  %v3624_v18 = vpop.f32.mrb[187].mxu1  ;;  %v5186_v45 = vld [vmem:[#allocation53_spill] sm:$0xff] }
 0x25c   :  { %v5187_v39 = vmax.f32 %v5185_v44, %v5186_v45  ;;  %v5188_v18 = vld [vmem:[#allocation54_spill] sm:$0xff] }
 0x25d   :  { %3073 = vst [vmem:[%s4976_s3 + $0xa0] sm:$0xff] %v3037_v51   ;;  %v2177_v53 = vadd.f32 %v4700_v46, %v2121_v49  ;;  %v2122_v52 = vmax.f32 %v5175_v36, %v2073_v50 }
 0x25f   :  { %v2178_v34 = vadd.f32 %v4700_v46, %v2122_v52  ;;  %v2226_v28 = vmax.f32 %v2177_v53, 0.0  ;;  %v5189_v53 = vld [vmem:[#allocation55_spill] sm:$0xff] }
 0x260   :  { %v1479_v15 = vpop.f32.mrb[188].mxu0  ;;  %v1959_v0 = vpop.f32.mrb[188].mxu1  ;;  %v5190_v54 = vmax.f32 %v5188_v18, %v5189_v53 }
 0x261   :  { %v2227_v29 = vmax.f32 %v2178_v34, 0.0  ;;  %v2074_v58 = vmax.f32 %v1479_v15, %v1959_v0  ;;  %v3517_v13 = vpop.f32.mrb[189].mxu0  ;;  %v3627_v43 = vpop.f32.mrb[189].mxu1 }
 0x262   :  { %v1482_v47 = vpop.f32.mrb[190].mxu0  ;;  %v1962_v32 = vpop.f32.mrb[190].mxu1 }
 0x263   :  { %v3042_v56 = vpack.c.bf16 %v2227_v29, %v2226_v28  ;;  %v2123_v27 = vmax.f32 %v5178_v14, %v2074_v58  ;;  %v2075_v10 = vmax.f32 %v1482_v47, %v1962_v32  ;;  %v3518_v48 = vpop.f32.mrb[191].mxu0  ;;  %v3628_v31 = vpop.f32.mrb[191].mxu1 }
 0x265   :  { %3074 = vst [vmem:[%s4976_s3 + $0xa8] sm:$0xff] %v3042_v56   ;;  %v2179_v6 = vadd.f32 %v4700_v46, %v2123_v27  ;;  %v2124_v61 = vmax.f32 %v5181_v60, %v2075_v10 }
 0x267   :  { %v2180_v62 = vadd.f32 %v4700_v46, %v2124_v61  ;;  %v2228_v38 = vmax.f32 %v2179_v6, 0.0 }
 0x268   :  { %v1487_v30 = vpop.f32.mrb[192].mxu0  ;;  %v1967_v37 = vpop.f32.mrb[192].mxu1 }
 0x269   :  { %v2229_v40 = vmax.f32 %v2180_v62, 0.0  ;;  %v2076_v7 = vmax.f32 %v1487_v30, %v1967_v37  ;;  %v3521_v17 = vpop.f32.mrb[193].mxu0  ;;  %v3631_v24 = vpop.f32.mrb[193].mxu1 }
 0x26a   :  { %v1490_v3 = vpop.f32.mrb[194].mxu0  ;;  %v1970_v1 = vpop.f32.mrb[194].mxu1 }
 0x26b   :  { %v3047_v20 = vpack.c.bf16 %v2229_v40, %v2228_v38  ;;  %v2125_v2 = vmax.f32 %v5184_v12, %v2076_v7  ;;  %v2077_v63 = vmax.f32 %v1490_v3, %v1970_v1  ;;  %v3522_v41 = vpop.f32.mrb[195].mxu0  ;;  %v3632_v42 = vpop.f32.mrb[195].mxu1 }
 0x26d   :  { %3075 = vst [vmem:[%s4976_s3 + $0xb0] sm:$0xff] %v3047_v20   ;;  %v2181_v4 = vadd.f32 %v4700_v46, %v2125_v2  ;;  %v2126_v19 = vmax.f32 %v5187_v39, %v2077_v63 }
 0x26f   :  { %v2182_v23 = vadd.f32 %v4700_v46, %v2126_v19  ;;  %v2230_v22 = vmax.f32 %v2181_v4, 0.0 }
 0x270   :  { %v1495_v55 = vpop.f32.mrb[196].mxu0  ;;  %v1975_v5 = vpop.f32.mrb[196].mxu1 }
 0x271   :  { %v2231_v51 = vmax.f32 %v2182_v23, 0.0  ;;  %v2078_v25 = vmax.f32 %v1495_v55, %v1975_v5  ;;  %v3525_v26 = vpop.f32.mrb[197].mxu0  ;;  %v3635_v8 = vpop.f32.mrb[197].mxu1 }
 0x272   :  { %v1498_v49 = vpop.f32.mrb[198].mxu0  ;;  %v1978_v50 = vpop.f32.mrb[198].mxu1 }
 0x273   :  { %v3052_v9 = vpack.c.bf16 %v2231_v51, %v2230_v22  ;;  %v2127_v35 = vmax.f32 %v5190_v54, %v2078_v25  ;;  %v3526_v36 = vpop.f32.mrb[199].mxu0  ;;  %v3636_v52 = vpop.f32.mrb[199].mxu1 }
 0x275   :  { %3076 = vst [vmem:[%s4976_s3 + $0xb8] sm:$0xff] %v3052_v9   ;;  %v2183_v34 = vadd.f32 %v4700_v46, %v2127_v35 }
 0x277   :  { %v2232_v15 = vmax.f32 %v2183_v34, 0.0 }
 0x279   :  { %v2933_v0 = vpack.c.bf16 %v2232_v15, %v2232_v15 }
 0x27b   :  { %2478 = vst [vmem:[%s4976_s3 + $0xc0] sm:$0xf] %v2933_v0 }

// kernel: lenet_color_forward.4
= control target key start
LH: loop header
LB: loop body
LE: loop exit
PB: predicated region body
PF: predicated region fallthrough
CT: control target
= control target key end

     0   :  { %v1690_v0 = vmov 0   ;;  %vm327_vm0 = vcmask 539648   ;;  %vm340_vm1 = vcmask 1040384   ;;  %s2298_s1 = inlined_call_operand.vmem [shape: bf16[450,128], index: 1, kind: input, shape index: {}]   ;;  %s2299_s0 = inlined_call_operand.vmem [shape: bf16[4,50,450], index: 0, kind: input, shape index: {}]   ;;  %s2300_s2 = inlined_call_operand.vmem [shape: f32[1,128], index: 2, kind: input, shape index: {}]   ;;  %s2301_s3 = inlined_call_operand.vmem [shape: bf16[50,128], index: 3, kind: output, shape index: {}]  }
   0x1   :  { %408 = vmatprep.subr.bf16.mxu1 %v1690_v0  ;;  %v1715_v1 = vld [vmem:[%s2298_s1 + $0x40] sm:$0xff]   ;;  %v1732_v4 = vld [vmem:[%s2298_s1 + $0x48] sm:$0xff]   ;;  %v1750_v7 = vld [vmem:[%s2298_s1 + $0x50] sm:$0xff]  }
   0x2   :  { %v1720_v2 = vld [vmem:[%s2298_s1 + $0x80] sm:$0xff]   ;;  %1412 = vmatprep.subr.bf16.mxu0 %v1715_v1  ;;  %v1739_v5 = vld [vmem:[%s2298_s1 + $0x88] sm:$0xff]   ;;  %v1756_v8 = vld [vmem:[%s2298_s1 + $0x90] sm:$0xff]  }
   0x3   :  { %v1726_v3 = vld [vmem:[%s2298_s1] sm:$0xff]   ;;  %409 = vmatpush1.bf16.msra.mxu1 %v1720_v2  ;;  %v1745_v6 = vld [vmem:[%s2298_s1 + $0x8] sm:$0xff]   ;;  %v1763_v9 = vld [vmem:[%s2298_s1 + $0x10] sm:$0xff]  }
   0x4   :  { %1413 = vmatpush3.bf16.msra.mxu0 %v1726_v3  ;;  %410 = vmatprep.subr.bf16.mxu1 %v1690_v0  ;;  %v1769_v10 = vld [vmem:[%s2298_s1 + $0x58] sm:$0xff]   ;;  %v1788_v13 = vld [vmem:[%s2298_s1 + $0x60] sm:$0xff]   ;;  %v1807_v16 = vld [vmem:[%s2298_s1 + $0x68] sm:$0xff]  }
   0x5   :  { %1414 = vmatprep.subr.bf16.mxu0 %v1732_v4  ;;  %v1775_v11 = vld [vmem:[%s2298_s1 + $0x98] sm:$0xff]   ;;  %v1794_v14 = vld [vmem:[%s2298_s1 + $0xa0] sm:$0xff]   ;;  %v1813_v17 = vld [vmem:[%s2298_s1 + $0xa8] sm:$0xff]  }
   0x6   :  { %v1782_v12 = vld [vmem:[%s2298_s1 + $0x18] sm:$0xff]   ;;  %v1801_v15 = vld [vmem:[%s2298_s1 + $0x20] sm:$0xff]   ;;  %v1820_v18 = vld [vmem:[%s2298_s1 + $0x28] sm:$0xff]  }
   0x7   :  { %411 = vmatpush1.bf16.msra.mxu1 %v1739_v5  ;;  %v1826_v19 = vld [vmem:[%s2298_s1 + $0x70] sm:$0xff]   ;;  %v1844_v22 = vld [vmem:[%s2298_s1 + $0x78] sm:$0xff]   ;;  %v1871_v27 = vld [vmem:[%s2298_s1 + $0xc0] sm:$0xff]  }
   0x8   :  { %1415 = vmatpush3.bf16.msra.mxu0 %v1745_v6  ;;  %412 = vmatprep.subr.bf16.mxu1 %v1690_v0  ;;  %v1831_v20 = vld [vmem:[%s2298_s1 + $0xb0] sm:$0xff]   ;;  %v1854_v24 = vld [vmem:[%s2298_s1 + $0xb8] sm:$0xff]   ;;  %v1886_v30 = vld [vmem:[%s2298_s1 + $0xc8] sm:$0xff]  }
   0x9   :  { %1416 = vmatprep.subr.bf16.mxu0 %v1750_v7  ;;  %v1837_v21 = vld [vmem:[%s2298_s1 + $0x30] sm:$0xff]   ;;  %v1861_v25 = vld [vmem:[%s2298_s1 + $0x38] sm:$0xff]   ;;  %v1610_v35 = vld [vmem:[%s2298_s1 + $0xe0] ss:$0 sps:$4 sm:$0x11]  }
   0xa   :  { %v1599_v23 = vld [vmem:[%s2299_s0 + $0x4] ss:$16 sps:$4 sm:$0xff]   ;;  %v1597_v26 = vld [vmem:[%s2299_s0] ss:$16 sps:$4 sm:$0xff]   ;;  %v1613_v29 = vld [vmem:[%s2299_s0 + $0xc] ss:$16 sps:$4 sm:$0xff]  }
   0xb   :  { %413 = vmatpush1.bf16.msra.mxu1 %v1756_v8  ;;  %376 = vmatprep.mubr.bf16.mxu0 %v1599_v23  ;;  %v1602_v28 = vld [vmem:[%s2299_s0 + $0x24] ss:$16 sps:$4 sm:$0xff]   ;;  %v1604_v31 = vld [vmem:[%s2299_s0 + $0x20] ss:$16 sps:$4 sm:$0xff]   ;;  %v1911_v34 = vld [vmem:[%s2298_s1 + $0xd8] sm:$0xff]   ;;  %v1928_v38 = vsel %vm340_vm1, %v1610_v35, 0 }
   0xc   :  { %1417 = vmatpush3.bf16.msra.mxu0 %v1763_v9  ;;  %414 = vmatprep.subr.bf16.mxu1 %v1690_v0  ;;  %v1899_v32 = vld [vmem:[%s2298_s1 + $0xd0] sm:$0xff]   ;;  %v84_v36 = vld [vmem:[%s2299_s0 + $0x60] sm:$0x11]  ;;  %v1611_v40 = vld [vmem:[%s2299_s0 + $0x8] ss:$16 sps:$4 sm:$0xff]  }
   0xd   :  { %1418 = vmatprep.subr.bf16.mxu0 %v1769_v10  ;;  %1274 = vmatprep.mubr.msk.bf16.mxu1 %vm327_vm0, %v1613_v29  ;;  %v1607_v33 = vld [vmem:[%s2299_s0 + $0x44] ss:$16 sps:$4 sm:$0xff]   ;;  %v1609_v37 = vld [vmem:[%s2299_s0 + $0x40] ss:$16 sps:$4 sm:$0xff]   ;;  %v1242_v39 = vcombine.high %v84_v36, %v84_v36  ;;  %v1616_v41 = vld [vmem:[%s2299_s0 + $0x2c] ss:$16 sps:$4 sm:$0xff]   ;;  %v1241_v42 = vcombine.low %v84_v36, %v84_v36 }
   0xe   :  { %v1621_v43 = vld [vmem:[%s2299_s0 + $0x74] ss:$16 sps:$4 sm:$0xff]   ;;  %v1618_v44 = vld [vmem:[%s2299_s0 + $0x28] ss:$16 sps:$4 sm:$0xff]   ;;  %v1622_v45 = vld [vmem:[%s2299_s0 + $0x4c] ss:$16 sps:$4 sm:$0xff]  }
   0xf   :  { %415 = vmatpush1.bf16.msra.mxu1 %v1775_v11  ;;  %v1619_v46 = vld [vmem:[%s2299_s0 + $0x70] ss:$16 sps:$4 sm:$0xff]   ;;  %v85_v47 = vld [vmem:[%s2299_s0 + $0x68] sm:$0x11]  ;;  %v1625_v48 = vld [vmem:[%s2299_s0 + $0x94] ss:$16 sps:$4 sm:$0xff]  }
  0x10   :  { %1419 = vmatpush3.bf16.msra.mxu0 %v1782_v12  ;;  %416 = vmatprep.subr.bf16.mxu1 %v1690_v0  ;;  %v1624_v49 = vld [vmem:[%s2299_s0 + $0x48] ss:$16 sps:$4 sm:$0xff]   ;;  %v1244_v50 = vcombine.high %v85_v47, %v85_v47  ;;  %v1627_v51 = vld [vmem:[%s2299_s0 + $0x90] ss:$16 sps:$4 sm:$0xff]   ;;  %v1630_v52 = vld [vmem:[%s2299_s0 + $0xb4] ss:$16 sps:$4 sm:$0xff]   ;;  %v1243_v53 = vcombine.low %v85_v47, %v85_v47 }
  0x11   :  { %1420 = vmatprep.subr.bf16.mxu0 %v1788_v13  ;;  %v1640_v54 = vld [vmem:[%s2299_s0 + $0x7c] ss:$16 sps:$4 sm:$0xff]   ;;  %v1290_v55 = vld [vmem:[%s2299_s0 + $0xd0] sm:$0x11]  ;;  %v1638_v62 = vld [vmem:[%s2299_s0 + $0x78] ss:$16 sps:$4 sm:$0xff]  }
  0x12   :  { %v1632_v56 = vld [vmem:[%s2299_s0 + $0xb0] ss:$16 sps:$4 sm:$0xff]   ;;  %v1305_v57 = vcombine.high %v1290_v55, %v1290_v55  ;;  %v1304_v58 = vcombine.low %v1290_v55, %v1290_v55  ;;  %v1637_v59 = vld [vmem:[%s2299_s0 + $0xe4] ss:$16 sps:$4 sm:$0xff]   ;;  %v1641_v63 = vld [vmem:[%s2299_s0 + $0x9c] ss:$16 sps:$4 sm:$0xff]  }
  0x13   :  { %417 = vmatpush1.bf16.msra.mxu1 %v1794_v14  ;;  %v1635_v60 = vld [vmem:[%s2299_s0 + $0xe0] ss:$16 sps:$4 sm:$0xff]   ;;  %v1647_v61 = vld [vmem:[%s2299_s0 + $0x104] ss:$16 sps:$4 sm:$0xff]   ;;  %v1643_v29 = vld [vmem:[%s2299_s0 + $0x98] ss:$16 sps:$4 sm:$0xff]  }
  0x14   :  { %1421 = vmatpush3.bf16.msra.mxu0 %v1801_v15  ;;  %418 = vmatprep.subr.bf16.mxu1 %v1690_v0  ;;  %v1649_v23 = vld [vmem:[%s2299_s0 + $0x100] ss:$16 sps:$4 sm:$0xff]   ;;  %v1291_v35 = vld [vmem:[%s2299_s0 + $0xd8] sm:$0x11] }
  0x15   :  { %1422 = vmatprep.subr.bf16.mxu0 %v1807_v16  ;;  %v1307_v36 = vcombine.high %v1291_v35, %v1291_v35 }
  0x17   :  { %419 = vmatpush1.bf16.msra.mxu1 %v1813_v17 }
  0x18   :  { %1423 = vmatpush3.bf16.msra.mxu0 %v1820_v18  ;;  %420 = vmatprep.subr.bf16.mxu1 %v1690_v0 }
  0x19   :  { %1424 = vmatprep.subr.bf16.mxu0 %v1826_v19 }
  0x1b   :  { %421 = vmatpush1.bf16.msra.mxu1 %v1831_v20 }
  0x1c   :  { %1425 = vmatpush3.bf16.msra.mxu0 %v1837_v21  ;;  %422 = vmatprep.subr.bf16.mxu1 %v1690_v0 }
  0x1d   :  { %1426 = vmatprep.subr.bf16.mxu0 %v1844_v22 }
  0x1f   :  { %423 = vmatpush1.bf16.msra.mxu1 %v1854_v24 }
  0x20   :  { %1427 = vmatpush3.bf16.msra.mxu0 %v1861_v25  ;;  %424 = vmatprep.subr.bf16.mxu1 %v1690_v0 }
  0x21   :  { %1452 = vmatprep.subr.bf16.mxu0 %v1715_v1 }
  0x23   :  { %377 = vmatmul.mubr.bf16.vlgmr.msra.gmra.mrb[0].mxu0 %v1597_v26  ;;  %425 = vmatpush1.bf16.msra.mxu1 %v1871_v27  ;;  %v1652_v26 = vld [vmem:[%s2299_s0 + $0x124] ss:$16 sps:$4 sm:$0xff]  }
  0x24   :  { %1453 = vmatpush3.bf16.msra.mxu0 %v1726_v3  ;;  %426 = vmatprep.subr.bf16.mxu1 %v1690_v0 }
  0x25   :  { %1454 = vmatprep.subr.bf16.mxu0 %v1732_v4  ;;  %384 = vmatprep.mubr.bf16.mxu0 %v1602_v28  ;;  %v1324_v28 = vld [vmem:[%s2299_s0 + $0x140] sm:$0x11] }
  0x27   :  { %427 = vmatpush1.bf16.msra.mxu1 %v1886_v30 }
  0x28   :  { %1455 = vmatpush3.bf16.msra.mxu0 %v1745_v6  ;;  %428 = vmatprep.subr.bf16.mxu1 %v1690_v0 }
  0x29   :  { %1456 = vmatprep.subr.bf16.mxu0 %v1750_v7 }
  0x2b   :  { %385 = vmatmul.mubr.bf16.gmra.mrb[4].mxu0 %v1604_v31  ;;  %429 = vmatpush1.bf16.msra.mxu1 %v1899_v32  ;;  %v1644_v31 = vld [vmem:[%s2299_s0 + $0xbc] ss:$16 sps:$4 sm:$0xff]  }
  0x2c   :  { %1457 = vmatpush3.bf16.msra.mxu0 %v1763_v9  ;;  %430 = vmatprep.subr.bf16.mxu1 %v1690_v0 }
  0x2d   :  { %1458 = vmatprep.subr.bf16.mxu0 %v1769_v10  ;;  %392 = vmatprep.mubr.bf16.mxu0 %v1607_v33  ;;  %v1654_v33 = vld [vmem:[%s2299_s0 + $0x120] ss:$16 sps:$4 sm:$0xff]  }
  0x2f   :  { %431 = vmatpush1.bf16.msra.mxu1 %v1911_v34 }
  0x30   :  { %1459 = vmatpush3.bf16.msra.mxu0 %v1782_v12  ;;  %432 = vmatprep.subr.bf16.mxu1 %v1690_v0 }
  0x31   :  { %1460 = vmatprep.subr.bf16.mxu0 %v1788_v13 }
  0x33   :  { %393 = vmatmul.mubr.bf16.gmra.mrb[8].mxu0 %v1609_v37  ;;  %433 = vmatpush1.bf16.msra.mxu1 %v1928_v38  ;;  %v1338_v37 = vcombine.low %v1324_v28, %v1324_v28 }
  0x34   :  { %1461 = vmatpush3.bf16.msra.mxu0 %v1801_v15  ;;  %633 = vmatprep.subr.bf16.mxu1 %v1690_v0 }
  0x35   :  { %1462 = vmatprep.subr.bf16.mxu0 %v1807_v16  ;;  %400 = vmatprep.mubr.bf16.mxu0 %v1242_v39  ;;  %v1659_v39 = vld [vmem:[%s2299_s0 + $0xec] ss:$16 sps:$4 sm:$0xff]  }
  0x36   :  { %441 = vmatmul.mubr.bf16.vlgmr.msra.gmra.mrb[0].mxu1 %v1611_v40 }
  0x37   :  { %634 = vmatpush1.bf16.msra.mxu1 %v1720_v2  ;;  %1275 = vmatprep.mubr.msk.bf16.mxu1 %vm327_vm0, %v1616_v41 }
  0x38   :  { %1463 = vmatpush3.bf16.msra.mxu0 %v1820_v18  ;;  %635 = vmatprep.subr.bf16.mxu1 %v1690_v0 }
  0x39   :  { %1464 = vmatprep.subr.bf16.mxu0 %v1826_v19 }
  0x3b   :  { %401 = vmatmul.mubr.bf16.gmra.mrb[12].mxu0 %v1241_v42  ;;  %636 = vmatpush1.bf16.msra.mxu1 %v1739_v5 }
  0x3c   :  { %1465 = vmatpush3.bf16.msra.mxu0 %v1837_v21  ;;  %637 = vmatprep.subr.bf16.mxu1 %v1690_v0 }
  0x3d   :  { %1466 = vmatprep.subr.bf16.mxu0 %v1844_v22  ;;  %601 = vmatprep.mubr.bf16.mxu0 %v1621_v43 }
  0x3e   :  { %449 = vmatmul.mubr.bf16.gmra.mrb[4].mxu1 %v1618_v44 }
  0x3f   :  { %638 = vmatpush1.bf16.msra.mxu1 %v1756_v8  ;;  %1276 = vmatprep.mubr.msk.bf16.mxu1 %vm327_vm0, %v1622_v45 }
  0x40   :  { %1467 = vmatpush3.bf16.msra.mxu0 %v1861_v25  ;;  %639 = vmatprep.subr.bf16.mxu1 %v1690_v0 }
  0x41   :  { %1492 = vmatprep.subr.bf16.mxu0 %v1715_v1 }
  0x43   :  { %602 = vmatmul.mubr.bf16.vlgmr.msra.gmra.mrb[16].mxu0 %v1619_v46  ;;  %640 = vmatpush1.bf16.msra.mxu1 %v1775_v11 }
  0x44   :  { %1493 = vmatpush3.bf16.msra.mxu0 %v1726_v3  ;;  %641 = vmatprep.subr.bf16.mxu1 %v1690_v0 }
  0x45   :  { %1494 = vmatprep.subr.bf16.mxu0 %v1732_v4  ;;  %609 = vmatprep.mubr.bf16.mxu0 %v1625_v48 }
  0x46   :  { %457 = vmatmul.mubr.bf16.gmra.mrb[8].mxu1 %v1624_v49 }
  0x47   :  { %642 = vmatpush1.bf16.msra.mxu1 %v1794_v14  ;;  %1277 = vmatprep.mubr.msk.bf16.mxu1 %vm327_vm0, %v1244_v50 }
  0x48   :  { %1495 = vmatpush3.bf16.msra.mxu0 %v1745_v6  ;;  %643 = vmatprep.subr.bf16.mxu1 %v1690_v0 }
  0x49   :  { %1496 = vmatprep.subr.bf16.mxu0 %v1750_v7 }
  0x4b   :  { %610 = vmatmul.mubr.bf16.gmra.mrb[20].mxu0 %v1627_v51  ;;  %644 = vmatpush1.bf16.msra.mxu1 %v1813_v17 }
  0x4c   :  { %1497 = vmatpush3.bf16.msra.mxu0 %v1763_v9  ;;  %645 = vmatprep.subr.bf16.mxu1 %v1690_v0 }
  0x4d   :  { %1498 = vmatprep.subr.bf16.mxu0 %v1769_v10  ;;  %617 = vmatprep.mubr.bf16.mxu0 %v1630_v52 }
  0x4e   :  { %465 = vmatmul.mubr.bf16.gmra.mrb[12].mxu1 %v1243_v53 }
  0x4f   :  { %646 = vmatpush1.bf16.msra.mxu1 %v1831_v20  ;;  %1308 = vmatprep.mubr.msk.bf16.mxu1 %vm327_vm0, %v1640_v54 }
  0x50   :  { %1499 = vmatpush3.bf16.msra.mxu0 %v1782_v12  ;;  %647 = vmatprep.subr.bf16.mxu1 %v1690_v0 }
  0x51   :  { %1500 = vmatprep.subr.bf16.mxu0 %v1788_v13 }
  0x53   :  { %618 = vmatmul.mubr.bf16.gmra.mrb[24].mxu0 %v1632_v56  ;;  %648 = vmatpush1.bf16.msra.mxu1 %v1854_v24 }
  0x54   :  { %1501 = vmatpush3.bf16.msra.mxu0 %v1801_v15  ;;  %649 = vmatprep.subr.bf16.mxu1 %v1690_v0 }
  0x55   :  { %1502 = vmatprep.subr.bf16.mxu0 %v1807_v16  ;;  %625 = vmatprep.mubr.bf16.mxu0 %v1305_v57 }
  0x57   :  { %650 = vmatpush1.bf16.msra.mxu1 %v1871_v27 }
  0x58   :  { %1503 = vmatpush3.bf16.msra.mxu0 %v1820_v18  ;;  %651 = vmatprep.subr.bf16.mxu1 %v1690_v0 }
  0x59   :  { %1504 = vmatprep.subr.bf16.mxu0 %v1826_v19 }
  0x5b   :  { %626 = vmatmul.mubr.bf16.gmra.mrb[28].mxu0 %v1304_v58  ;;  %652 = vmatpush1.bf16.msra.mxu1 %v1886_v30 }
  0x5c   :  { %1505 = vmatpush3.bf16.msra.mxu0 %v1837_v21  ;;  %653 = vmatprep.subr.bf16.mxu1 %v1690_v0 }
  0x5d   :  { %1506 = vmatprep.subr.bf16.mxu0 %v1844_v22  ;;  %826 = vmatprep.mubr.bf16.mxu0 %v1637_v59 }
  0x5f   :  { %654 = vmatpush1.bf16.msra.mxu1 %v1899_v32 }
  0x60   :  { %1507 = vmatpush3.bf16.msra.mxu0 %v1861_v25  ;;  %655 = vmatprep.subr.bf16.mxu1 %v1690_v0 }
  0x61   :  { %858 = vmatprep.subr.bf16.mxu0 %v1690_v0 }
  0x63   :  { %656 = vmatpush1.bf16.msra.mxu1 %v1911_v34  ;;  %827 = vmatmul.mubr.bf16.vlgmr.msra.gmra.mrb[32].mxu0 %v1635_v60 }
  0x64   :  { %859 = vmatpush1.bf16.msra.mxu0 %v1720_v2  ;;  %657 = vmatprep.subr.bf16.mxu1 %v1690_v0 }
  0x65   :  { %860 = vmatprep.subr.bf16.mxu0 %v1690_v0  ;;  %834 = vmatprep.mubr.bf16.mxu0 %v1647_v61 }
  0x67   :  { %658 = vmatpush1.bf16.msra.mxu1 %v1928_v38 }
  0x68   :  { %861 = vmatpush1.bf16.msra.mxu0 %v1739_v5  ;;  %1083 = vmatprep.subr.bf16.mxu1 %v1690_v0 }
  0x69   :  { %862 = vmatprep.subr.bf16.mxu0 %v1690_v0 }
  0x6a   :  { %666 = vmatmul.mubr.bf16.vlgmr.msra.gmra.mrb[16].mxu1 %v1638_v62 }
  0x6b   :  { %1309 = vmatprep.mubr.msk.bf16.mxu1 %vm327_vm0, %v1641_v63  ;;  %835 = vmatmul.mubr.bf16.gmra.mrb[36].mxu0 %v1649_v23 }
  0x6c   :  { %863 = vmatpush1.bf16.msra.mxu0 %v1756_v8  ;;  %842 = vmatprep.mubr.bf16.mxu0 %v1652_v26 }
  0x6d   :  { %864 = vmatprep.subr.bf16.mxu0 %v1690_v0  ;;  %1084 = vmatpush1.bf16.msra.mxu1 %v1720_v2  ;;  %v1339_v2 = vcombine.high %v1324_v28, %v1324_v28 }
  0x6e   :  { %1085 = vmatprep.subr.bf16.mxu1 %v1690_v0 }
  0x70   :  { %865 = vmatpush1.bf16.msra.mxu0 %v1775_v11 }
  0x71   :  { %866 = vmatprep.subr.bf16.mxu0 %v1690_v0  ;;  %1086 = vmatpush1.bf16.msra.mxu1 %v1739_v5  ;;  %v1646_v5 = vld [vmem:[%s2299_s0 + $0xb8] ss:$16 sps:$4 sm:$0xff]  }
  0x72   :  { %674 = vmatmul.mubr.bf16.gmra.mrb[20].mxu1 %v1643_v29  ;;  %1087 = vmatprep.subr.bf16.mxu1 %v1690_v0 }
  0x73   :  { %1310 = vmatprep.mubr.msk.bf16.mxu1 %vm327_vm0, %v1644_v31  ;;  %843 = vmatmul.mubr.bf16.gmra.mrb[40].mxu0 %v1654_v33 }
  0x74   :  { %867 = vmatpush1.bf16.msra.mxu0 %v1794_v14  ;;  %850 = vmatprep.mubr.bf16.mxu0 %v1339_v2 }
  0x75   :  { %868 = vmatprep.subr.bf16.mxu0 %v1690_v0  ;;  %1088 = vmatpush1.bf16.msra.mxu1 %v1756_v8  ;;  %v1306_v8 = vcombine.low %v1291_v35, %v1291_v35 }
  0x76   :  { %1089 = vmatprep.subr.bf16.mxu1 %v1690_v0 }
  0x78   :  { %869 = vmatpush1.bf16.msra.mxu0 %v1813_v17 }
  0x79   :  { %870 = vmatprep.subr.bf16.mxu0 %v1690_v0  ;;  %1090 = vmatpush1.bf16.msra.mxu1 %v1775_v11  ;;  %v1673_v11 = vld [vmem:[%s2299_s0 + $0x15c] ss:$16 sps:$4 sm:$0xff]  }
  0x7a   :  { %682 = vmatmul.mubr.bf16.gmra.mrb[24].mxu1 %v1646_v5  ;;  %1091 = vmatprep.subr.bf16.mxu1 %v1690_v0 }
  0x7b   :  { %1311 = vmatprep.mubr.msk.bf16.mxu1 %vm327_vm0, %v1307_v36  ;;  %851 = vmatmul.mubr.bf16.gmra.mrb[44].mxu0 %v1338_v37 }
  0x7c   :  { %871 = vmatpush1.bf16.msra.mxu0 %v1831_v20  ;;  %1342 = vmatprep.mubr.msk.bf16.mxu0 %vm327_vm0, %v1659_v39 }
  0x7d   :  { %872 = vmatprep.subr.bf16.mxu0 %v1690_v0  ;;  %1092 = vmatpush1.bf16.msra.mxu1 %v1794_v14  ;;  %v1657_v14 = vld [vmem:[%s2299_s0 + $0xe8] ss:$16 sps:$4 sm:$0xff]  }
  0x7e   :  { %1093 = vmatprep.subr.bf16.mxu1 %v1690_v0 }
  0x80   :  { %873 = vmatpush1.bf16.msra.mxu0 %v1854_v24 }
  0x81   :  { %874 = vmatprep.subr.bf16.mxu0 %v1690_v0  ;;  %1094 = vmatpush1.bf16.msra.mxu1 %v1813_v17  ;;  %v1660_v17 = vld [vmem:[%s2299_s0 + $0x10c] ss:$16 sps:$4 sm:$0xff]  }
  0x82   :  { %690 = vmatmul.mubr.bf16.gmra.mrb[28].mxu1 %v1306_v8  ;;  %1095 = vmatprep.subr.bf16.mxu1 %v1690_v0 }
  0x83   :  { %1376 = vmatprep.mubr.msk.bf16.mxu1 %vm327_vm0, %v1673_v11 }
  0x84   :  { %875 = vmatpush1.bf16.msra.mxu0 %v1871_v27 }
  0x85   :  { %876 = vmatprep.subr.bf16.mxu0 %v1690_v0  ;;  %1096 = vmatpush1.bf16.msra.mxu1 %v1831_v20  ;;  %v1662_v20 = vld [vmem:[%s2299_s0 + $0x108] ss:$16 sps:$4 sm:$0xff]  }
  0x86   :  { %1097 = vmatprep.subr.bf16.mxu1 %v1690_v0 }
  0x88   :  { %877 = vmatpush1.bf16.msra.mxu0 %v1886_v30 }
  0x89   :  { %878 = vmatprep.subr.bf16.mxu0 %v1690_v0  ;;  %1098 = vmatpush1.bf16.msra.mxu1 %v1854_v24  ;;  %v1670_v24 = vld [vmem:[%s2299_s0 + $0x154] ss:$16 sps:$4 sm:$0xff]  }
  0x8a   :  { %1099 = vmatprep.subr.bf16.mxu1 %v1690_v0 }
  0x8c   :  { %879 = vmatpush1.bf16.msra.mxu0 %v1899_v32 }
  0x8d   :  { %880 = vmatprep.subr.bf16.mxu0 %v1690_v0  ;;  %1100 = vmatpush1.bf16.msra.mxu1 %v1871_v27 }
  0x8e   :  { %1101 = vmatprep.subr.bf16.mxu1 %v1690_v0 }
  0x90   :  { %881 = vmatpush1.bf16.msra.mxu0 %v1911_v34 }
  0x91   :  { %882 = vmatprep.subr.bf16.mxu0 %v1690_v0  ;;  %1102 = vmatpush1.bf16.msra.mxu1 %v1886_v30  ;;  %v1682_v30 = vld [vmem:[%s2299_s0 + $0x190] ss:$16 sps:$4 sm:$0xff]  }
  0x92   :  { %1103 = vmatprep.subr.bf16.mxu1 %v1690_v0 }
  0x94   :  { %883 = vmatpush1.bf16.msra.mxu0 %v1928_v38 }
  0x95   :  { %1532 = vmatprep.subr.bf16.mxu0 %v1715_v1  ;;  %1104 = vmatpush1.bf16.msra.mxu1 %v1899_v32  ;;  %v1663_v1 = vld [vmem:[%s2299_s0 + $0x12c] ss:$16 sps:$4 sm:$0xff]  }
  0x96   :  { %1105 = vmatprep.subr.bf16.mxu1 %v1690_v0 }
  0x97   :  { %891 = vmatmul.mubr.bf16.vlgmr.msra.gmra.mrb[48].mxu0 %v1657_v14 }
  0x98   :  { %1533 = vmatpush3.bf16.msra.mxu0 %v1726_v3  ;;  %1343 = vmatprep.mubr.msk.bf16.mxu0 %vm327_vm0, %v1660_v17  ;;  %v1671_v3 = vld [vmem:[%s2299_s0 + $0x158] ss:$16 sps:$4 sm:$0xff]  }
  0x99   :  { %1534 = vmatprep.subr.bf16.mxu0 %v1732_v4  ;;  %1106 = vmatpush1.bf16.msra.mxu1 %v1911_v34  ;;  %v1325_v4 = vld [vmem:[%s2299_s0 + $0x148] sm:$0x11] }
  0x9a   :  { %1107 = vmatprep.subr.bf16.mxu1 %v1690_v0  ;;  %v1677_v0 = vld [vmem:[%s2299_s0 + $0x17c] ss:$16 sps:$4 sm:$0xff]  }
  0x9c   :  { %1535 = vmatpush3.bf16.msra.mxu0 %v1745_v6  ;;  %v1665_v6 = vld [vmem:[%s2299_s0 + $0x128] ss:$16 sps:$4 sm:$0xff]  }
  0x9d   :  { %1536 = vmatprep.subr.bf16.mxu0 %v1750_v7  ;;  %1108 = vmatpush1.bf16.msra.mxu1 %v1928_v38  ;;  %v1341_v7 = vcombine.high %v1325_v4, %v1325_v4 }
  0x9f   :  { %899 = vmatmul.mubr.bf16.gmra.mrb[52].mxu0 %v1662_v20 }
  0xa0   :  { %1537 = vmatpush3.bf16.msra.mxu0 %v1763_v9  ;;  %1344 = vmatprep.mubr.msk.bf16.mxu0 %vm327_vm0, %v1663_v1  ;;  %v1679_v9 = vld [vmem:[%s2299_s0 + $0x178] ss:$16 sps:$4 sm:$0xff]  }
  0xa1   :  { %1538 = vmatprep.subr.bf16.mxu0 %v1769_v10  ;;  %1116 = vmatmul.mubr.bf16.vlgmr.msra.gmra.mrb[32].mxu1 %v1671_v3  ;;  %v1683_v10 = vld [vmem:[%s2299_s0 + $0x19c] ss:$16 sps:$4 sm:$0xff]  }
  0xa2   :  { %1377 = vmatprep.mubr.msk.bf16.mxu1 %vm327_vm0, %v1677_v0 }
  0xa4   :  { %1539 = vmatpush3.bf16.msra.mxu0 %v1782_v12  ;;  %v1340_v12 = vcombine.low %v1325_v4, %v1325_v4 }
  0xa5   :  { %1540 = vmatprep.subr.bf16.mxu0 %v1788_v13  ;;  %v1359_v13 = vld [vmem:[%s2299_s0 + $0x1b8] sm:$0x11] }
  0xa6   :  { %v1374_v27 = vcombine.low %v1359_v13, %v1359_v13 }
  0xa7   :  { %907 = vmatmul.mubr.bf16.gmra.mrb[56].mxu0 %v1665_v6 }
  0xa8   :  { %1541 = vmatpush3.bf16.msra.mxu0 %v1801_v15  ;;  %1345 = vmatprep.mubr.msk.bf16.mxu0 %vm327_vm0, %v1341_v7  ;;  %v1685_v15 = vld [vmem:[%s2299_s0 + $0x198] ss:$16 sps:$4 sm:$0xff]  }
  0xa9   :  { %1542 = vmatprep.subr.bf16.mxu0 %v1807_v16  ;;  %1124 = vmatmul.mubr.bf16.gmra.mrb[36].mxu1 %v1679_v9  ;;  %v1375_v16 = vcombine.high %v1359_v13, %v1359_v13 }
  0xaa   :  { %1378 = vmatprep.mubr.msk.bf16.mxu1 %vm327_vm0, %v1683_v10 }
  0xac   :  { %1543 = vmatpush3.bf16.msra.mxu0 %v1820_v18  ;;  %v1668_v18 = vld [vmem:[%s2299_s0 + $0x150] ss:$16 sps:$4 sm:$0xff]  }
  0xad   :  { %1544 = vmatprep.subr.bf16.mxu0 %v1826_v19  ;;  %v1674_v19 = vld [vmem:[%s2299_s0 + $0x174] ss:$16 sps:$4 sm:$0xff]  }
  0xaf   :  { %915 = vmatmul.mubr.bf16.gmra.mrb[60].mxu0 %v1340_v12 }
  0xb0   :  { %1545 = vmatpush3.bf16.msra.mxu0 %v1837_v21  ;;  %1051 = vmatprep.mubr.bf16.mxu0 %v1670_v24  ;;  %v1676_v21 = vld [vmem:[%s2299_s0 + $0x170] ss:$16 sps:$4 sm:$0xff]  }
  0xb1   :  { %1546 = vmatprep.subr.bf16.mxu0 %v1844_v22  ;;  %1132 = vmatmul.mubr.bf16.gmra.mrb[40].mxu1 %v1685_v15  ;;  %v1680_v22 = vld [vmem:[%s2299_s0 + $0x194] ss:$16 sps:$4 sm:$0xff]  }
  0xb2   :  { %1379 = vmatprep.mubr.msk.bf16.mxu1 %vm327_vm0, %v1375_v16 }
  0xb4   :  { %1547 = vmatpush3.bf16.msra.mxu0 %v1861_v25  ;;  %v1358_v25 = vld [vmem:[%s2299_s0 + $0x1b0] sm:$0x11] }
  0xb5   :  { %v1373_v32 = vcombine.high %v1358_v25, %v1358_v25  ;;  %v1372_v34 = vcombine.low %v1358_v25, %v1358_v25 }
  0xb7   :  { %1052 = vmatmul.mubr.bf16.vlgmr.msra.gmra.mrb[64].mxu0 %v1668_v18 }
  0xb8   :  { %1059 = vmatprep.mubr.bf16.mxu0 %v1674_v19 }
  0xb9   :  { %1140 = vmatmul.mubr.bf16.gmra.mrb[44].mxu1 %v1374_v27 }
  0xbf   :  { %1060 = vmatmul.mubr.bf16.gmra.mrb[68].mxu0 %v1676_v21 }
  0xc0   :  { %1067 = vmatprep.mubr.bf16.mxu0 %v1680_v22 }
  0xc7   :  { %1068 = vmatmul.mubr.bf16.gmra.mrb[72].mxu0 %v1682_v30 }
  0xc8   :  { %1075 = vmatprep.mubr.bf16.mxu0 %v1373_v32 }
  0xcf   :  { %1076 = vmatmul.mubr.bf16.gmra.mrb[76].mxu0 %v1372_v34 }
  0xf6   :  { %v1428_v38 = vpop.f32.mrb[0].mxu0 }
  0xf7   :  { %v1429_v40 = vpop.f32.mrb[1].mxu0 }
  0xf8   :  { %v1430_v41 = vadd.f32 %v1429_v40, %v1428_v38  ;;  %v1431_v42 = vpop.f32.mrb[2].mxu0 }
  0xf9   :  { %v1432_v43 = vpop.f32.mrb[3].mxu0 }
  0xfa   :  { %v1433_v44 = vadd.f32 %v1432_v43, %v1431_v42 }
  0xfe   :  { %v1434_v45 = vpop.f32.mrb[4].mxu0 }
  0xff   :  { %v1435_v46 = vpop.f32.mrb[5].mxu0 }
 0x100   :  { %v1436_v47 = vadd.f32 %v1435_v46, %v1434_v45  ;;  %v1437_v48 = vpop.f32.mrb[6].mxu0 }
 0x101   :  { %v1438_v49 = vpop.f32.mrb[7].mxu0 }
 0x102   :  { %v1439_v50 = vadd.f32 %v1438_v49, %v1437_v48 }
 0x106   :  { %v1440_v51 = vpop.f32.mrb[8].mxu0 }
 0x107   :  { %v1441_v52 = vpop.f32.mrb[9].mxu0 }
 0x108   :  { %v1442_v53 = vadd.f32 %v1441_v52, %v1440_v51  ;;  %v1443_v54 = vpop.f32.mrb[10].mxu0 }
 0x109   :  { %v1444_v55 = vpop.f32.mrb[11].mxu0  ;;  %v442_v56 = vpop.f32.mrb[0].mxu1 }
 0x10a   :  { %v1445_v57 = vadd.f32 %v1444_v55, %v1443_v54  ;;  %v2208_v58 = vadd.f32 %v1430_v41, %v442_v56  ;;  %v444_v59 = vpop.f32.mrb[1].mxu1 }
 0x10b   :  { %v445_v60 = vpop.f32.mrb[2].mxu1 }
 0x10c   :  { %v2210_v61 = vadd.f32 %v1433_v44, %v445_v60  ;;  %v447_v62 = vpop.f32.mrb[3].mxu1 }
 0x10e   :  { %v1446_v63 = vpop.f32.mrb[12].mxu0 }
 0x10f   :  { %v1447_v23 = vpop.f32.mrb[13].mxu0 }
 0x110   :  { %v1448_v26 = vadd.f32 %v1447_v23, %v1446_v63  ;;  %v1449_v28 = vpop.f32.mrb[14].mxu0 }
 0x111   :  { %v1450_v29 = vpop.f32.mrb[15].mxu0  ;;  %v450_v31 = vpop.f32.mrb[4].mxu1 }
 0x112   :  { %v2212_v33 = vadd.f32 %v1436_v47, %v450_v31  ;;  %v452_v2 = vpop.f32.mrb[5].mxu1 }
 0x113   :  { %v453_v35 = vpop.f32.mrb[6].mxu1 }
 0x114   :  { %v2214_v5 = vadd.f32 %v1439_v50, %v453_v35  ;;  %v455_v36 = vpop.f32.mrb[7].mxu1 }
 0x116   :  { %v1468_v37 = vpop.f32.mrb[16].mxu0 }
 0x117   :  { %v1469_v39 = vpop.f32.mrb[17].mxu0 }
 0x118   :  { %v1470_v8 = vadd.f32 %v1469_v39, %v1468_v37  ;;  %v1471_v11 = vpop.f32.mrb[18].mxu0 }
 0x119   :  { %v458_v14 = vpop.f32.mrb[8].mxu1  ;;  %v1472_v17 = vpop.f32.mrb[19].mxu0 }
 0x11a   :  { %v2216_v20 = vadd.f32 %v1442_v53, %v458_v14  ;;  %v1473_v1 = vadd.f32 %v1472_v17, %v1471_v11  ;;  %v460_v3 = vpop.f32.mrb[9].mxu1 }
 0x11b   :  { %v461_v0 = vpop.f32.mrb[10].mxu1 }
 0x11c   :  { %v2218_v4 = vadd.f32 %v1445_v57, %v461_v0  ;;  %v463_v6 = vpop.f32.mrb[11].mxu1 }
 0x11e   :  { %v1474_v7 = vpop.f32.mrb[20].mxu0 }
 0x11f   :  { %v1475_v9 = vpop.f32.mrb[21].mxu0 }
 0x120   :  { %v1476_v10 = vadd.f32 %v1475_v9, %v1474_v7  ;;  %v1477_v12 = vpop.f32.mrb[22].mxu0 }
 0x121   :  { %v466_v13 = vpop.f32.mrb[12].mxu1  ;;  %v1478_v24 = vpop.f32.mrb[23].mxu0 }
 0x122   :  { %v2220_v15 = vadd.f32 %v1448_v26, %v466_v13  ;;  %v1479_v16 = vadd.f32 %v1478_v24, %v1477_v12  ;;  %v468_v18 = vpop.f32.mrb[13].mxu1 }
 0x123   :  { %v469_v19 = vpop.f32.mrb[14].mxu1 }
 0x124   :  { %v470_v27 = vpop.f32.mrb[15].mxu1 }
 0x126   :  { %v1480_v21 = vpop.f32.mrb[24].mxu0 }
 0x127   :  { %v1481_v22 = vpop.f32.mrb[25].mxu0 }
 0x128   :  { %v1482_v25 = vadd.f32 %v1481_v22, %v1480_v21  ;;  %v1483_v30 = vpop.f32.mrb[26].mxu0 }
 0x129   :  { %v1484_v32 = vpop.f32.mrb[27].mxu0 }
 0x12a   :  { %v1485_v34 = vadd.f32 %v1484_v32, %v1483_v30 }
 0x12e   :  { %v1486_v38 = vpop.f32.mrb[28].mxu0 }
 0x12f   :  { %v1487_v40 = vpop.f32.mrb[29].mxu0 }
 0x130   :  { %v1488_v41 = vadd.f32 %v1487_v40, %v1486_v38  ;;  %v1489_v42 = vpop.f32.mrb[30].mxu0 }
 0x131   :  { %v1490_v43 = vpop.f32.mrb[31].mxu0 }
 0x136   :  { %v1508_v44 = vpop.f32.mrb[32].mxu0 }
 0x137   :  { %v1509_v45 = vpop.f32.mrb[33].mxu0 }
 0x138   :  { %v1510_v46 = vadd.f32 %v1509_v45, %v1508_v44  ;;  %v1511_v47 = vpop.f32.mrb[34].mxu0 }
 0x139   :  { %v1512_v48 = vpop.f32.mrb[35].mxu0 }
 0x13a   :  { %v1513_v49 = vadd.f32 %v1512_v48, %v1511_v47 }
 0x13d   :  { %v667_v50 = vpop.f32.mrb[16].mxu1 }
 0x13e   :  { %v2222_v51 = vadd.f32 %v1470_v8, %v667_v50  ;;  %v669_v52 = vpop.f32.mrb[17].mxu1  ;;  %v1514_v53 = vpop.f32.mrb[36].mxu0 }
 0x13f   :  { %v670_v54 = vpop.f32.mrb[18].mxu1  ;;  %v1515_v55 = vpop.f32.mrb[37].mxu0 }
 0x140   :  { %v1147_v56 = vmax.f32 %v2208_v58, %v2222_v51  ;;  %v2226_v57 = vadd.f32 %v1473_v1, %v670_v54  ;;  %v672_v59 = vpop.f32.mrb[19].mxu1  ;;  %v1516_v60 = vadd.f32 %v1515_v55, %v1514_v53  ;;  %v1517_v62 = vpop.f32.mrb[38].mxu0 }
 0x141   :  { %v1518_v63 = vpop.f32.mrb[39].mxu0 }
 0x142   :  { %v1148_v23 = vmax.f32 %v2210_v61, %v2226_v57  ;;  %v1519_v26 = vadd.f32 %v1518_v63, %v1517_v62 }
 0x145   :  { %v675_v28 = vpop.f32.mrb[20].mxu1 }
 0x146   :  { %v2230_v29 = vadd.f32 %v1476_v10, %v675_v28  ;;  %v677_v31 = vpop.f32.mrb[21].mxu1  ;;  %v1520_v2 = vpop.f32.mrb[40].mxu0 }
 0x147   :  { %v678_v35 = vpop.f32.mrb[22].mxu1  ;;  %v1521_v36 = vpop.f32.mrb[41].mxu0 }
 0x148   :  { %v1149_v37 = vmax.f32 %v2212_v33, %v2230_v29  ;;  %v2234_v39 = vadd.f32 %v1479_v16, %v678_v35  ;;  %v680_v8 = vpop.f32.mrb[23].mxu1  ;;  %v1522_v11 = vadd.f32 %v1521_v36, %v1520_v2  ;;  %v1523_v14 = vpop.f32.mrb[42].mxu0 }
 0x149   :  { %v1524_v17 = vpop.f32.mrb[43].mxu0 }
 0x14a   :  { %v1150_v1 = vmax.f32 %v2214_v5, %v2234_v39  ;;  %v1525_v3 = vadd.f32 %v1524_v17, %v1523_v14 }
 0x14d   :  { %v683_v0 = vpop.f32.mrb[24].mxu1 }
 0x14e   :  { %v2238_v6 = vadd.f32 %v1482_v25, %v683_v0  ;;  %v685_v7 = vpop.f32.mrb[25].mxu1  ;;  %v1526_v9 = vpop.f32.mrb[44].mxu0 }
 0x14f   :  { %v686_v10 = vpop.f32.mrb[26].mxu1  ;;  %v1527_v12 = vpop.f32.mrb[45].mxu0 }
 0x150   :  { %v1151_v13 = vmax.f32 %v2216_v20, %v2238_v6  ;;  %v2242_v24 = vadd.f32 %v1485_v34, %v686_v10  ;;  %v688_v16 = vpop.f32.mrb[27].mxu1  ;;  %v1528_v18 = vadd.f32 %v1527_v12, %v1526_v9  ;;  %v1529_v19 = vpop.f32.mrb[46].mxu0 }
 0x151   :  { %v1530_v27 = vpop.f32.mrb[47].mxu0 }
 0x152   :  { %v1152_v21 = vmax.f32 %v2218_v4, %v2242_v24 }
 0x155   :  { %v691_v22 = vpop.f32.mrb[28].mxu1 }
 0x156   :  { %v2246_v30 = vadd.f32 %v1488_v41, %v691_v22  ;;  %v693_v25 = vpop.f32.mrb[29].mxu1 }
 0x157   :  { %v694_v32 = vpop.f32.mrb[30].mxu1 }
 0x158   :  { %v1153_v38 = vmax.f32 %v2220_v15, %v2246_v30  ;;  %v695_v40 = vpop.f32.mrb[31].mxu1 }
 0x16a   :  { %v892_v42 = vpop.f32.mrb[48].mxu0 }
 0x16b   :  { %v893_v43 = vadd.f32 %v1510_v46, %v892_v42  ;;  %v894_v34 = vpop.f32.mrb[49].mxu0 }
 0x16c   :  { %v895_v44 = vpop.f32.mrb[50].mxu0 }
 0x16d   :  { %v896_v45 = vadd.f32 %v1513_v49, %v895_v44  ;;  %v897_v47 = vpop.f32.mrb[51].mxu0 }
 0x172   :  { %v900_v48 = vpop.f32.mrb[52].mxu0 }
 0x173   :  { %v901_v50 = vadd.f32 %v1516_v60, %v900_v48  ;;  %v902_v52 = vpop.f32.mrb[53].mxu0 }
 0x174   :  { %v903_v53 = vpop.f32.mrb[54].mxu0  ;;  %v1117_v54 = vpop.f32.mrb[32].mxu1  ;;  %v1380_v52 = vld [vmem:[%s2300_s2] ss:$0 sm:$0xff] }
 0x175   :  { %v2250_v55 = vadd.f32 %v1519_v26, %v903_v53  ;;  %v905_v41 = vpop.f32.mrb[55].mxu0  ;;  %v1119_v59 = vpop.f32.mrb[33].mxu1 }
 0x176   :  { %v1120_v62 = vpop.f32.mrb[34].mxu1 }
 0x177   :  { %v1122_v63 = vpop.f32.mrb[35].mxu1 }
 0x17a   :  { %v908_v28 = vpop.f32.mrb[56].mxu0 }
 0x17b   :  { %v2252_v31 = vadd.f32 %v1522_v11, %v908_v28  ;;  %v910_v2 = vpop.f32.mrb[57].mxu0 }
 0x17c   :  { %v911_v46 = vpop.f32.mrb[58].mxu0  ;;  %v1125_v35 = vpop.f32.mrb[36].mxu1 }
 0x17d   :  { %v2254_v36 = vadd.f32 %v1525_v3, %v911_v46  ;;  %v913_v49 = vpop.f32.mrb[59].mxu0  ;;  %v1127_v8 = vpop.f32.mrb[37].mxu1 }
 0x17e   :  { %v1128_v60 = vpop.f32.mrb[38].mxu1 }
 0x17f   :  { %v1130_v14 = vpop.f32.mrb[39].mxu1 }
 0x182   :  { %v916_v17 = vpop.f32.mrb[60].mxu0 }
 0x183   :  { %v2256_v0 = vadd.f32 %v1528_v18, %v916_v17  ;;  %v918_v26 = vpop.f32.mrb[61].mxu0 }
 0x184   :  { %v919_v7 = vpop.f32.mrb[62].mxu0  ;;  %v1133_v9 = vpop.f32.mrb[40].mxu1 }
 0x185   :  { %v920_v10 = vpop.f32.mrb[63].mxu0  ;;  %v1135_v12 = vpop.f32.mrb[41].mxu1 }
 0x186   :  { %v1136_v16 = vpop.f32.mrb[42].mxu1 }
 0x187   :  { %v1138_v11 = vpop.f32.mrb[43].mxu1 }
 0x18a   :  { %v1548_v19 = vpop.f32.mrb[64].mxu0 }
 0x18b   :  { %v1549_v27 = vpop.f32.mrb[65].mxu0 }
 0x18c   :  { %v1550_v22 = vadd.f32 %v1549_v27, %v1548_v19  ;;  %v1551_v25 = vpop.f32.mrb[66].mxu0  ;;  %v1141_v3 = vpop.f32.mrb[44].mxu1 }
 0x18d   :  { %v1552_v32 = vpop.f32.mrb[67].mxu0  ;;  %v1143_v40 = vpop.f32.mrb[45].mxu1 }
 0x18e   :  { %v1118_v42 = vadd.f32 %v1550_v22, %v1117_v54  ;;  %v1553_v34 = vadd.f32 %v1552_v32, %v1551_v25  ;;  %v1144_v44 = vpop.f32.mrb[46].mxu1 }
 0x18f   :  { %v1145_v47 = vpop.f32.mrb[47].mxu1 }
 0x190   :  { %v1154_v18 = vmax.f32 %v893_v43, %v1118_v42  ;;  %v1121_v48 = vadd.f32 %v1553_v34, %v1120_v62 }
 0x192   :  { %v1161_v53 = vmax.f32 %v1147_v56, %v1154_v18  ;;  %v1155_v41 = vmax.f32 %v896_v45, %v1121_v48  ;;  %v1554_v59 = vpop.f32.mrb[68].mxu0 }
 0x193   :  { %v1555_v63 = vpop.f32.mrb[69].mxu0 }
 0x194   :  { %v1175_v28 = vadd.f32 %v1380_v52, %v1161_v53  ;;  %v1162_v54 = vmax.f32 %v1148_v23, %v1155_v41  ;;  %v1556_v2 = vadd.f32 %v1555_v63, %v1554_v59  ;;  %v1557_v46 = vpop.f32.mrb[70].mxu0 }
 0x195   :  { %v1558_v43 = vpop.f32.mrb[71].mxu0 }
 0x196   :  { %v1176_v62 = vadd.f32 %v1380_v52, %v1162_v54  ;;  %v1126_v49 = vadd.f32 %v1556_v2, %v1125_v35  ;;  %v1559_v8 = vadd.f32 %v1558_v43, %v1557_v46  ;;  %v1182_v14 = vmax.f32 %v1175_v28, 0.0 }
 0x198   :  { %v1183_v17 = vmax.f32 %v1176_v62, 0.0  ;;  %v1156_v26 = vmax.f32 %v901_v50, %v1126_v49  ;;  %v1129_v7 = vadd.f32 %v1559_v8, %v1128_v60 }
 0x19a   :  { %v1398_v58 = vpack.c.bf16 %v1183_v17, %v1182_v14  ;;  %v1163_v51 = vmax.f32 %v1149_v37, %v1156_v26  ;;  %v1157_v56 = vmax.f32 %v2250_v55, %v1129_v7  ;;  %v1560_v45 = vpop.f32.mrb[72].mxu0 }
 0x19b   :  { %v1561_v61 = vpop.f32.mrb[73].mxu0 }
 0x19c   :  { %1399 = vst [vmem:[%s2301_s3] sm:$0xff] %v1398_v58   ;;  %v1177_v57 = vadd.f32 %v1380_v52, %v1163_v51  ;;  %v1164_v23 = vmax.f32 %v1150_v1, %v1157_v56  ;;  %v1562_v50 = vadd.f32 %v1561_v61, %v1560_v45  ;;  %v1563_v35 = vpop.f32.mrb[74].mxu0 }
 0x19d   :  { %v1564_v60 = vpop.f32.mrb[75].mxu0 }
 0x19e   :  { %v1178_v10 = vadd.f32 %v1380_v52, %v1164_v23  ;;  %v1134_v12 = vadd.f32 %v1562_v50, %v1133_v9  ;;  %v1565_v33 = vadd.f32 %v1564_v60, %v1563_v35  ;;  %v1184_v29 = vmax.f32 %v1177_v57, 0.0 }
 0x1a0   :  { %v1185_v37 = vmax.f32 %v1178_v10, 0.0  ;;  %v1158_v55 = vmax.f32 %v2252_v31, %v1134_v12  ;;  %v1137_v11 = vadd.f32 %v1565_v33, %v1136_v16 }
 0x1a2   :  { %v1403_v19 = vpack.c.bf16 %v1185_v37, %v1184_v29  ;;  %v1165_v27 = vmax.f32 %v1151_v13, %v1158_v55  ;;  %v1159_v22 = vmax.f32 %v2254_v36, %v1137_v11  ;;  %v1566_v5 = vpop.f32.mrb[76].mxu0 }
 0x1a3   :  { %v1567_v39 = vpop.f32.mrb[77].mxu0 }
 0x1a4   :  { %1410 = vst [vmem:[%s2301_s3 + $0x8] sm:$0xff] %v1403_v19   ;;  %v1179_v1 = vadd.f32 %v1380_v52, %v1165_v27  ;;  %v1166_v9 = vmax.f32 %v1152_v21, %v1159_v22  ;;  %v1568_v31 = vadd.f32 %v1567_v39, %v1566_v5  ;;  %v1569_v16 = vpop.f32.mrb[78].mxu0 }
 0x1a5   :  { %v1570_v25 = vpop.f32.mrb[79].mxu0 }
 0x1a6   :  { %v1180_v32 = vadd.f32 %v1380_v52, %v1166_v9  ;;  %v1142_v40 = vadd.f32 %v1568_v31, %v1141_v3  ;;  %v1186_v20 = vmax.f32 %v1179_v1, 0.0 }
 0x1a8   :  { %v1187_v6 = vmax.f32 %v1180_v32, 0.0  ;;  %v1160_v13 = vmax.f32 %v2256_v0, %v1142_v40 }
 0x1aa   :  { %v1408_v36 = vpack.c.bf16 %v1187_v6, %v1186_v20  ;;  %v1167_v42 = vmax.f32 %v1153_v38, %v1160_v13 }
 0x1ac   :  { %1411 = vst [vmem:[%s2301_s3 + $0x10] sm:$0xff] %v1408_v36   ;;  %v1181_v4 = vadd.f32 %v1380_v52, %v1167_v42 }
 0x1ae   :  { %v1188_v24 = vmax.f32 %v1181_v4, 0.0 }
 0x1b0   :  { %v1394_v21 = vpack.c.bf16 %v1188_v24, %v1188_v24 }
 0x1b2   :  { %1224 = vst [vmem:[%s2301_s3 + $0x18] sm:$0x1] %v1394_v21 }

// kernel: lenet_color_forward.5
= control target key start
LH: loop header
LB: loop body
LE: loop exit
PB: predicated region body
PF: predicated region fallthrough
CT: control target
= control target key end

     0   :  { %v207_v24 = vlaneseq  ;;  %v2389_v25 = vmov 1966171168   ;;  %vm976_vm0 = vcmask 490496   ;;  %vm980_vm1 = vcmask 1045504   ;;  %s3104_s0 = inlined_call_operand.vmem [shape: bf16[2,700], index: 0, kind: input, shape index: {}]   ;;  %s3105_s1 = inlined_call_operand.vmem [shape: bf16[700,384], index: 1, kind: input, shape index: {}]   ;;  %s3106_s2 = inlined_call_operand.vmem [shape: f32[1,384], index: 2, kind: input, shape index: {}]   ;;  %s3107_s3 = inlined_call_operand.vmem [shape: bf16[384,256], index: 3, kind: input, shape index: {}]   ;;  %s3108_s4 = inlined_call_operand.vmem [shape: f32[1,256], index: 4, kind: input, shape index: {}]   ;;  %s3109_s5 = inlined_call_operand.vmem [shape: bf16[256,128], index: 5, kind: input, shape index: {}]   ;;  %s3110_s6 = inlined_call_operand.vmem [shape: f32[1,128], index: 6, kind: input, shape index: {}]   ;;  %s3111_s7 = inlined_call_operand.hbm [shape: f32[2,128], index: 7, kind: output, shape index: {}]  }
   0x1   :  { %v2100_v0 = vld [vmem:[%s3105_s1 + $0x4] ss:$12 sps:$4 sm:$0xff]   ;;  %v2102_v1 = vld [vmem:[%s3105_s1] ss:$12 sps:$4 sm:$0xff]   ;;  %v2103_v2 = vld [vmem:[%s3105_s1 + $0x1c] ss:$12 sps:$4 sm:$0xff]   ;;  %v225_v26 = vunpack.c.l.s4 %v2389_v25 }
   0x2   :  { %990 = vmatprep.subr.bf16.mxu0 %v2100_v0  ;;  %v2105_v3 = vld [vmem:[%s3105_s1 + $0x18] ss:$12 sps:$4 sm:$0xff]   ;;  %v2106_v4 = vld [vmem:[%s3105_s1 + $0x34] ss:$12 sps:$4 sm:$0xff]   ;;  %v2108_v5 = vld [vmem:[%s3105_s1 + $0x30] ss:$12 sps:$4 sm:$0xff]  }
   0x3   :  { %991 = vmatpush1.bf16.msra.mxu0 %v2102_v1  ;;  %v2109_v6 = vld [vmem:[%s3105_s1 + $0x4c] ss:$12 sps:$4 sm:$0xff]   ;;  %v2120_v7 = vld [vmem:[%s3105_s1 + $0xc8] ss:$12 sps:$4 sm:$0xff]   ;;  %v2112_v10 = vld [vmem:[%s3105_s1 + $0x64] ss:$12 sps:$4 sm:$0xff]   ;;  %v226_v32 = vunpack.c.0.s8 %v225_v26 }
   0x4   :  { %992 = vmatprep.subr.bf16.mxu0 %v2103_v2  ;;  %v2111_v8 = vld [vmem:[%s3105_s1 + $0x48] ss:$12 sps:$4 sm:$0xff]   ;;  %2015 = vmatprep.subr.bf16.mxu1 %v2120_v7  ;;  %v2125_v11 = vld [vmem:[%s3105_s1 + $0xe0] ss:$12 sps:$4 sm:$0xff]   ;;  %v2130_v15 = vld [vmem:[%s3105_s1 + $0xf8] ss:$12 sps:$4 sm:$0xff]  }
   0x5   :  { %v2122_v9 = vld [vmem:[%s3105_s1 + $0x8] ss:$12 sps:$4 sm:$0xff]   ;;  %v2127_v12 = vld [vmem:[%s3105_s1 + $0x20] ss:$12 sps:$4 sm:$0xff]   ;;  %v2132_v16 = vld [vmem:[%s3105_s1 + $0x38] ss:$12 sps:$4 sm:$0xff]  }
   0x6   :  { %2016 = vmatpush3.bf16.msra.mxu1 %v2122_v9  ;;  %v2114_v13 = vld [vmem:[%s3105_s1 + $0x60] ss:$12 sps:$4 sm:$0xff]   ;;  %v2115_v14 = vld [vmem:[%s3105_s1 + $0x7c] ss:$12 sps:$4 sm:$0xff]   ;;  %v2117_v17 = vld [vmem:[%s3105_s1 + $0x78] ss:$12 sps:$4 sm:$0xff]  }
   0x7   :  { %993 = vmatpush1.bf16.msra.mxu0 %v2105_v3  ;;  %2017 = vmatprep.subr.bf16.mxu1 %v2125_v11  ;;  %v2135_v18 = vld [vmem:[%s3105_s1 + $0x110] ss:$12 sps:$4 sm:$0xff]   ;;  %v2118_v19 = vld [vmem:[%s3105_s1 + $0x94] ss:$12 sps:$4 sm:$0xff]   ;;  %v2123_v23 = vld [vmem:[%s3105_s1 + $0xac] ss:$12 sps:$4 sm:$0xff]  }
   0x8   :  { %994 = vmatprep.subr.bf16.mxu0 %v2106_v4  ;;  %v2137_v20 = vld [vmem:[%s3105_s1 + $0x50] ss:$12 sps:$4 sm:$0xff]   ;;  %v2140_v22 = vld [vmem:[%s3105_s1 + $0x128] ss:$12 sps:$4 sm:$0xff]   ;;  %v2145_v28 = vld [vmem:[%s3105_s1 + $0x140] ss:$12 sps:$4 sm:$0xff]  }
   0x9   :  { %v2121_v21 = vld [vmem:[%s3105_s1 + $0x90] ss:$12 sps:$4 sm:$0xff]   ;;  %v2142_v27 = vld [vmem:[%s3105_s1 + $0x68] ss:$12 sps:$4 sm:$0xff]   ;;  %v2516_v31 = vshrl.u32 %v207_v24, 7  ;;  %v2390_v25 = vmov 0  }
   0xa   :  { %2018 = vmatpush3.bf16.msra.mxu1 %v2127_v12  ;;  %v2126_v29 = vld [vmem:[%s3105_s1 + $0xa8] ss:$12 sps:$4 sm:$0xff]   ;;  %v2128_v30 = vld [vmem:[%s3105_s1 + $0xc4] ss:$12 sps:$4 sm:$0xff]   ;;  %v2147_v33 = vld [vmem:[%s3105_s1 + $0x80] ss:$12 sps:$4 sm:$0xff]  }
   0xb   :  { %995 = vmatpush1.bf16.msra.mxu0 %v2108_v5  ;;  %2019 = vmatprep.subr.bf16.mxu1 %v2130_v15  ;;  %v2150_v34 = vld [vmem:[%s3105_s1 + $0x158] ss:$12 sps:$4 sm:$0xff]   ;;  %v2131_v35 = vld [vmem:[%s3105_s1 + $0xc0] ss:$12 sps:$4 sm:$0xff]   ;;  %v2133_v36 = vld [vmem:[%s3105_s1 + $0xdc] ss:$12 sps:$4 sm:$0xff]   ;;  %v2531_v37 = vsub.s32 %v226_v32, %v2516_v31 }
   0xc   :  { %996 = vmatprep.subr.bf16.mxu0 %v2109_v6  ;;  %v2152_v38 = vld [vmem:[%s3105_s1 + $0x98] ss:$12 sps:$4 sm:$0xff]   ;;  %v2155_v39 = vld [vmem:[%s3105_s1 + $0x170] ss:$12 sps:$4 sm:$0xff]   ;;  %v2138_v42 = vld [vmem:[%s3105_s1 + $0xf4] ss:$12 sps:$4 sm:$0xff]  }
   0xd   :  { %v2136_v40 = vld [vmem:[%s3105_s1 + $0xd8] ss:$12 sps:$4 sm:$0xff]   ;;  %v2157_v44 = vld [vmem:[%s3105_s1 + $0xb0] ss:$12 sps:$4 sm:$0xff]   ;;  %v2161_v46 = vld [vmem:[%s3105_s1 + $0x248] ss:$12 sps:$4 sm:$0xff]  }
   0xe   :  { %2020 = vmatpush3.bf16.msra.mxu1 %v2132_v16  ;;  %v2545_v41 = vld [vmem:[%s3104_s0] sm:$0x3f]  ;;  %v2141_v47 = vld [vmem:[%s3105_s1 + $0xf0] ss:$12 sps:$4 sm:$0xff]   ;;  %v2143_v48 = vld [vmem:[%s3105_s1 + $0x10c] ss:$12 sps:$4 sm:$0xff]  }
   0xf   :  { %997 = vmatpush1.bf16.msra.mxu0 %v2111_v8  ;;  %2021 = vmatprep.subr.bf16.mxu1 %v2135_v18  ;;  %v230_v43 = vrot.slane %v2545_v41, %v2531_v37  ;;  %v2163_v51 = vld [vmem:[%s3105_s1 + $0x188] ss:$12 sps:$4 sm:$0xff]   ;;  %v2166_v52 = vld [vmem:[%s3105_s1 + $0x260] ss:$12 sps:$4 sm:$0xff]   ;;  %v2148_v55 = vld [vmem:[%s3105_s1 + $0x124] ss:$12 sps:$4 sm:$0xff]   ;;  %v223_v8 = vcombine.high %v2545_v41, %v2545_v41 }
  0x10   :  { %998 = vmatprep.subr.bf16.mxu0 %v2112_v10  ;;  %v2146_v54 = vld [vmem:[%s3105_s1 + $0x108] ss:$12 sps:$4 sm:$0xff]   ;;  %v2168_v56 = vld [vmem:[%s3105_s1 + $0x1a0] ss:$12 sps:$4 sm:$0xff]   ;;  %v2172_v57 = vld [vmem:[%s3105_s1 + $0x278] ss:$12 sps:$4 sm:$0xff]  }
  0x11   :  { %v238_v45 = vcombine.high %v230_v43, %v230_v43  ;;  %v2566_v50 = vrot.slane %v230_v43, %v2531_v37  ;;  %v2151_v58 = vld [vmem:[%s3105_s1 + $0x120] ss:$12 sps:$4 sm:$0xff]   ;;  %v2153_v59 = vld [vmem:[%s3105_s1 + $0x13c] ss:$12 sps:$4 sm:$0xff]   ;;  %v2173_v60 = vld [vmem:[%s3105_s1 + $0x1b8] ss:$12 sps:$4 sm:$0xff]  }
  0x12   :  { %2022 = vmatpush3.bf16.msra.mxu1 %v2137_v20  ;;  %v2177_v61 = vld [vmem:[%s3105_s1 + $0x290] ss:$12 sps:$4 sm:$0xff]   ;;  %v2156_v62 = vld [vmem:[%s3105_s1 + $0x138] ss:$12 sps:$4 sm:$0xff]   ;;  %v2158_v63 = vld [vmem:[%s3105_s1 + $0x154] ss:$12 sps:$4 sm:$0xff]  }
  0x13   :  { %999 = vmatpush1.bf16.msra.mxu0 %v2114_v13  ;;  %2023 = vmatprep.subr.bf16.mxu1 %v2140_v22  ;;  %v260_v49 = vrot.slane %v238_v45, %v2531_v37  ;;  %v2178_v0 = vld [vmem:[%s3105_s1 + $0x1d0] ss:$12 sps:$4 sm:$0xff]   ;;  %v2182_v1 = vld [vmem:[%s3105_s1 + $0x2a8] ss:$12 sps:$4 sm:$0xff]   ;;  %v2164_v3 = vld [vmem:[%s3105_s1 + $0x16c] ss:$12 sps:$4 sm:$0xff]   ;;  %v2672_v22 = vcombine.high %v2566_v50, %v2566_v50 }
  0x14   :  { %1000 = vmatprep.subr.bf16.mxu0 %v2115_v14  ;;  %v2162_v2 = vld [vmem:[%s3105_s1 + $0x150] ss:$12 sps:$4 sm:$0xff]   ;;  %v2183_v4 = vld [vmem:[%s3105_s1 + $0x1e8] ss:$12 sps:$4 sm:$0xff]   ;;  %v2187_v5 = vld [vmem:[%s3105_s1 + $0x2c0] ss:$12 sps:$4 sm:$0xff]   ;;  %v2647_v14 = vrot.slane %v223_v8, %v2531_v37 }
  0x15   :  { %1145 = vmatprep.mubr.bf16.mxu1 %v260_v49  ;;  %v269_v53 = vcombine.high %v260_v49, %v260_v49  ;;  %1022 = vmatprep.mubr.bf16.mxu0 %v260_v49  ;;  %v2167_v6 = vld [vmem:[%s3105_s1 + $0x168] ss:$12 sps:$4 sm:$0xff]   ;;  %v2171_v7 = vld [vmem:[%s3105_s1 + $0x184] ss:$12 sps:$4 sm:$0xff]   ;;  %v2188_v9 = vld [vmem:[%s3105_s1 + $0x200] ss:$12 sps:$4 sm:$0xff]  }
  0x16   :  { %2024 = vmatpush3.bf16.msra.mxu1 %v2142_v27  ;;  %v2192_v10 = vld [vmem:[%s3105_s1 + $0x2d8] ss:$12 sps:$4 sm:$0xff]   ;;  %v2169_v11 = vld [vmem:[%s3105_s1 + $0x180] ss:$12 sps:$4 sm:$0xff]   ;;  %v2176_v12 = vld [vmem:[%s3105_s1 + $0x19c] ss:$12 sps:$4 sm:$0xff]  }
  0x17   :  { %1001 = vmatpush1.bf16.msra.mxu0 %v2117_v17  ;;  %2025 = vmatprep.subr.bf16.mxu1 %v2145_v28  ;;  %v2193_v13 = vld [vmem:[%s3105_s1 + $0x218] ss:$12 sps:$4 sm:$0xff]   ;;  %v2197_v15 = vld [vmem:[%s3105_s1 + $0x2f0] ss:$12 sps:$4 sm:$0xff]   ;;  %v2181_v17 = vld [vmem:[%s3105_s1 + $0x1b4] ss:$12 sps:$4 sm:$0xff]  }
  0x18   :  { %1002 = vmatprep.subr.bf16.mxu0 %v2118_v19  ;;  %v2174_v16 = vld [vmem:[%s3105_s1 + $0x198] ss:$12 sps:$4 sm:$0xff]   ;;  %v2198_v18 = vld [vmem:[%s3105_s1 + $0x230] ss:$12 sps:$4 sm:$0xff]   ;;  %v239_v19 = vcombine.high %v2647_v14, %v2647_v14  ;;  %v2184_v26 = vld [vmem:[%s3105_s1 + $0x1c8] ss:$12 sps:$4 sm:$0xff]  }
  0x19   :  { %v2179_v20 = vld [vmem:[%s3105_s1 + $0x1b0] ss:$12 sps:$4 sm:$0xff]   ;;  %v2206_v28 = vld [vmem:[%s3105_s1 + $0x320] ss:$12 sps:$4 sm:$0xff]   ;;  %v2210_v32 = vld [vmem:[%s3105_s1 + $0x338] ss:$12 sps:$4 sm:$0xff]  }
  0x1a   :  { %2026 = vmatpush3.bf16.msra.mxu1 %v2147_v33  ;;  %v2678_v24 = vrot.slane %v239_v19, %v2531_v37  ;;  %v2191_v27 = vld [vmem:[%s3105_s1 + $0x1e4] ss:$12 sps:$4 sm:$0xff]   ;;  %v2207_v43 = vld [vmem:[%s3105_s1 + $0x240] ss:$12 sps:$4 sm:$0xff]  }
  0x1b   :  { %1003 = vmatpush1.bf16.msra.mxu0 %v2121_v21  ;;  %2027 = vmatprep.subr.bf16.mxu1 %v2150_v34  ;;  %v2186_v21 = vld [vmem:[%s3105_s1 + $0x1cc] ss:$12 sps:$4 sm:$0xff]   ;;  %v2201_v34 = vld [vmem:[%s3105_s1 + $0x214] ss:$12 sps:$4 sm:$0xff]   ;;  %v2209_v41 = vld [vmem:[%s3105_s1 + $0x244] ss:$12 sps:$4 sm:$0xff]  }
  0x1c   :  { %1004 = vmatprep.subr.bf16.mxu0 %v2123_v23  ;;  %v2202_v23 = vld [vmem:[%s3105_s1 + $0x308] ss:$12 sps:$4 sm:$0xff]   ;;  %v2194_v33 = vld [vmem:[%s3105_s1 + $0x1f8] ss:$12 sps:$4 sm:$0xff]   ;;  %v2215_v49 = vld [vmem:[%s3105_s1 + $0x270] ss:$12 sps:$4 sm:$0xff]  }
  0x1d   :  { %v2226_v45 = vld [vmem:[%s3105_s1 + $0x398] ss:$12 sps:$4 sm:$0xff]  }
  0x1e   :  { %2028 = vmatpush3.bf16.msra.mxu1 %v2152_v38  ;;  %v2205_v38 = vld [vmem:[%s3105_s1 + $0x22c] ss:$12 sps:$4 sm:$0xff]  }
  0x1f   :  { %1005 = vmatpush1.bf16.msra.mxu0 %v2126_v29  ;;  %2029 = vmatprep.subr.bf16.mxu1 %v2155_v39  ;;  %v2189_v29 = vld [vmem:[%s3105_s1 + $0x1e0] ss:$12 sps:$4 sm:$0xff]   ;;  %v2218_v39 = vld [vmem:[%s3105_s1 + $0x368] ss:$12 sps:$4 sm:$0xff]   ;;  %v2243_v8 = vld [vmem:[%s3105_s1 + $0x318] ss:$12 sps:$4 sm:$0xff]  }
  0x20   :  { %1006 = vmatprep.subr.bf16.mxu0 %v2128_v30  ;;  %v2196_v30 = vld [vmem:[%s3105_s1 + $0x1fc] ss:$12 sps:$4 sm:$0xff]  }
  0x22   :  { %2030 = vmatpush3.bf16.msra.mxu1 %v2157_v44  ;;  %v2213_v44 = vld [vmem:[%s3105_s1 + $0x25c] ss:$12 sps:$4 sm:$0xff]  }
  0x23   :  { %1007 = vmatpush1.bf16.msra.mxu0 %v2131_v35  ;;  %2037 = vmatprep.subr.bf16.mxu1 %v2161_v46  ;;  %v2214_v35 = vld [vmem:[%s3105_s1 + $0x350] ss:$12 sps:$4 sm:$0xff]   ;;  %v2211_v46 = vld [vmem:[%s3105_s1 + $0x258] ss:$12 sps:$4 sm:$0xff]  }
  0x24   :  { %1008 = vmatprep.subr.bf16.mxu0 %v2133_v36  ;;  %v2199_v36 = vld [vmem:[%s3105_s1 + $0x210] ss:$12 sps:$4 sm:$0xff]  }
  0x25   :  { %1146 = vmatmul.mubr.bf16.vlgmr.msra.gmra.mrb[0].mxu1 %v2566_v50 }
  0x26   :  { %2038 = vmatpush3.bf16.msra.mxu1 %v2163_v51  ;;  %1185 = vmatprep.mubr.bf16.mxu1 %v269_v53  ;;  %v2219_v51 = vld [vmem:[%s3105_s1 + $0x288] ss:$12 sps:$4 sm:$0xff]  }
  0x27   :  { %1009 = vmatpush1.bf16.msra.mxu0 %v2136_v40  ;;  %2039 = vmatprep.subr.bf16.mxu1 %v2166_v52  ;;  %v2203_v40 = vld [vmem:[%s3105_s1 + $0x228] ss:$12 sps:$4 sm:$0xff]  }
  0x28   :  { %1010 = vmatprep.subr.bf16.mxu0 %v2138_v42  ;;  %v2222_v42 = vld [vmem:[%s3105_s1 + $0x380] ss:$12 sps:$4 sm:$0xff]   ;;  %v2234_v52 = vld [vmem:[%s3105_s1 + $0x3c8] ss:$12 sps:$4 sm:$0xff]  }
  0x2a   :  { %2040 = vmatpush3.bf16.msra.mxu1 %v2168_v56  ;;  %v2229_v56 = vld [vmem:[%s3105_s1 + $0x2bc] ss:$12 sps:$4 sm:$0xff]  }
  0x2b   :  { %1011 = vmatpush1.bf16.msra.mxu0 %v2141_v47  ;;  %2041 = vmatprep.subr.bf16.mxu1 %v2172_v57  ;;  %v2217_v47 = vld [vmem:[%s3105_s1 + $0x274] ss:$12 sps:$4 sm:$0xff]   ;;  %v2242_v57 = vld [vmem:[%s3105_s1 + $0x3f8] ss:$12 sps:$4 sm:$0xff]  }
  0x2c   :  { %1012 = vmatprep.subr.bf16.mxu0 %v2143_v48  ;;  %v2230_v48 = vld [vmem:[%s3105_s1 + $0x3b0] ss:$12 sps:$4 sm:$0xff]  }
  0x2e   :  { %2042 = vmatpush3.bf16.msra.mxu1 %v2173_v60  ;;  %v2233_v60 = vld [vmem:[%s3105_s1 + $0x2d4] ss:$12 sps:$4 sm:$0xff]  }
  0x2f   :  { %1013 = vmatpush1.bf16.msra.mxu0 %v2146_v54  ;;  %2043 = vmatprep.subr.bf16.mxu1 %v2177_v61  ;;  %v2238_v54 = vld [vmem:[%s3105_s1 + $0x3e0] ss:$12 sps:$4 sm:$0xff]  }
  0x30   :  { %1014 = vmatprep.subr.bf16.mxu0 %v2148_v55  ;;  %v2223_v55 = vld [vmem:[%s3105_s1 + $0x2a0] ss:$12 sps:$4 sm:$0xff]  }
  0x31   :  { %v2279_v61 = vld [vmem:[%s3107_s3 + $0x4] ss:$8 sps:$4 sm:$0xff]  }
  0x32   :  { %2044 = vmatpush3.bf16.msra.mxu1 %v2178_v0 }
  0x33   :  { %1015 = vmatpush1.bf16.msra.mxu0 %v2151_v58  ;;  %2045 = vmatprep.subr.bf16.mxu1 %v2182_v1  ;;  %v2246_v58 = vld [vmem:[%s3105_s1 + $0x410] ss:$12 sps:$4 sm:$0x3f]   ;;  %v2277_v1 = vld [vmem:[%s3107_s3] ss:$8 sps:$4 sm:$0xff]  }
  0x34   :  { %1016 = vmatprep.subr.bf16.mxu0 %v2153_v59  ;;  %v2227_v59 = vld [vmem:[%s3105_s1 + $0x2b8] ss:$12 sps:$4 sm:$0xff]   ;;  %v988_v0 = vsel %vm980_vm1, %v2246_v58, 0 }
  0x36   :  { %2046 = vmatpush3.bf16.msra.mxu1 %v2183_v4  ;;  %v2235_v4 = vld [vmem:[%s3105_s1 + $0x2e8] ss:$12 sps:$4 sm:$0xff]  }
  0x37   :  { %1017 = vmatpush1.bf16.msra.mxu0 %v2156_v62  ;;  %2047 = vmatprep.subr.bf16.mxu1 %v2187_v5  ;;  %v2231_v62 = vld [vmem:[%s3105_s1 + $0x2d0] ss:$12 sps:$4 sm:$0xff]  }
  0x38   :  { %1018 = vmatprep.subr.bf16.mxu0 %v2158_v63  ;;  %v2237_v63 = vld [vmem:[%s3105_s1 + $0x2ec] ss:$12 sps:$4 sm:$0xff]   ;;  %v2241_v5 = vld [vmem:[%s3105_s1 + $0x304] ss:$12 sps:$4 sm:$0xff]  }
  0x3a   :  { %2048 = vmatpush3.bf16.msra.mxu1 %v2188_v9  ;;  %v2283_v9 = vld [vmem:[%s3107_s3 + $0x20] ss:$8 sps:$4 sm:$0xff]  }
  0x3b   :  { %1019 = vmatpush1.bf16.msra.mxu0 %v2162_v2  ;;  %2049 = vmatprep.subr.bf16.mxu1 %v2192_v10  ;;  %v2809_v2 = vrot.slane %v2647_v14, %v2531_v37  ;;  %v2280_v37 = vld [vmem:[%s3107_s3 + $0x10] ss:$8 sps:$4 sm:$0xff]   ;;  %v2285_v10 = vld [vmem:[%s3107_s3 + $0x24] ss:$8 sps:$4 sm:$0xff]  }
  0x3c   :  { %1020 = vmatprep.subr.bf16.mxu0 %v2164_v3  ;;  %v2282_v3 = vld [vmem:[%s3107_s3 + $0x14] ss:$8 sps:$4 sm:$0xff]  }
  0x3e   :  { %2050 = vmatpush3.bf16.msra.mxu1 %v2193_v13 }
  0x3f   :  { %1021 = vmatpush1.bf16.msra.mxu0 %v2167_v6  ;;  %2051 = vmatprep.subr.bf16.mxu1 %v2197_v15  ;;  %v2239_v6 = vld [vmem:[%s3105_s1 + $0x300] ss:$12 sps:$4 sm:$0xff]  }
  0x40   :  { %1031 = vmatprep.subr.bf16.mxu0 %v2171_v7  ;;  %v2245_v7 = vld [vmem:[%s3105_s1 + $0x31c] ss:$12 sps:$4 sm:$0xff]  }
  0x42   :  { %1023 = vmatmul.mubr.bf16.vlgmr.msra.gmra.mrb[0].mxu0 %v2566_v50  ;;  %2052 = vmatpush3.bf16.msra.mxu1 %v2198_v18  ;;  %v2221_v50 = vld [vmem:[%s3105_s1 + $0x28c] ss:$12 sps:$4 sm:$0xff]  }
  0x43   :  { %1032 = vmatpush1.bf16.msra.mxu0 %v2169_v11  ;;  %1063 = vmatprep.mubr.bf16.mxu0 %v269_v53  ;;  %v2225_v53 = vld [vmem:[%s3105_s1 + $0x2a4] ss:$12 sps:$4 sm:$0xff]   ;;  %v2249_v11 = vld [vmem:[%s3105_s1 + $0x334] ss:$12 sps:$4 sm:$0xff]  }
  0x44   :  { %1033 = vmatprep.subr.bf16.mxu0 %v2176_v12  ;;  %1193 = vmatprep.subr.bf16.mxu1 %v2390_v25 }
  0x45   :  { %1186 = vmatmul.mubr.bf16.vlgmr.msra.gmra.mrb[4].mxu1 %v2672_v22 }
  0x46   :  { %1194 = vmatpush1.bf16.msra.mxu1 %v2202_v23  ;;  %1949 = vmatprep.mubr.msk.bf16.mxu1 %vm976_vm0, %v2678_v24 }
  0x47   :  { %1034 = vmatpush1.bf16.msra.mxu0 %v2174_v16  ;;  %1195 = vmatprep.subr.bf16.mxu1 %v2390_v25 }
  0x48   :  { %1035 = vmatprep.subr.bf16.mxu0 %v2181_v17 }
  0x4a   :  { %1196 = vmatpush1.bf16.msra.mxu1 %v2206_v28 }
  0x4b   :  { %1036 = vmatpush1.bf16.msra.mxu0 %v2179_v20  ;;  %1197 = vmatprep.subr.bf16.mxu1 %v2390_v25 }
  0x4c   :  { %1037 = vmatprep.subr.bf16.mxu0 %v2186_v21 }
  0x4e   :  { %1198 = vmatpush1.bf16.msra.mxu1 %v2210_v32 }
  0x4f   :  { %1038 = vmatpush1.bf16.msra.mxu0 %v2184_v26  ;;  %1199 = vmatprep.subr.bf16.mxu1 %v2390_v25 }
  0x50   :  { %1039 = vmatprep.subr.bf16.mxu0 %v2191_v27 }
  0x52   :  { %1200 = vmatpush1.bf16.msra.mxu1 %v2214_v35 }
  0x53   :  { %1040 = vmatpush1.bf16.msra.mxu0 %v2189_v29  ;;  %1201 = vmatprep.subr.bf16.mxu1 %v2390_v25 }
  0x54   :  { %1041 = vmatprep.subr.bf16.mxu0 %v2196_v30 }
  0x56   :  { %1202 = vmatpush1.bf16.msra.mxu1 %v2218_v39 }
  0x57   :  { %1042 = vmatpush1.bf16.msra.mxu0 %v2194_v33  ;;  %1203 = vmatprep.subr.bf16.mxu1 %v2390_v25 }
  0x58   :  { %1043 = vmatprep.subr.bf16.mxu0 %v2201_v34 }
  0x5a   :  { %1204 = vmatpush1.bf16.msra.mxu1 %v2222_v42 }
  0x5b   :  { %1044 = vmatpush1.bf16.msra.mxu0 %v2199_v36  ;;  %1205 = vmatprep.subr.bf16.mxu1 %v2390_v25 }
  0x5c   :  { %1045 = vmatprep.subr.bf16.mxu0 %v2205_v38 }
  0x5e   :  { %1206 = vmatpush1.bf16.msra.mxu1 %v2226_v45 }
  0x5f   :  { %1046 = vmatpush1.bf16.msra.mxu0 %v2203_v40  ;;  %1207 = vmatprep.subr.bf16.mxu1 %v2390_v25 }
  0x60   :  { %1047 = vmatprep.subr.bf16.mxu0 %v2209_v41 }
  0x62   :  { %1208 = vmatpush1.bf16.msra.mxu1 %v2230_v48 }
  0x63   :  { %1048 = vmatpush1.bf16.msra.mxu0 %v2207_v43  ;;  %1209 = vmatprep.subr.bf16.mxu1 %v2390_v25 }
  0x64   :  { %1049 = vmatprep.subr.bf16.mxu0 %v2213_v44 }
  0x66   :  { %1210 = vmatpush1.bf16.msra.mxu1 %v2234_v52 }
  0x67   :  { %1050 = vmatpush1.bf16.msra.mxu0 %v2211_v46  ;;  %1211 = vmatprep.subr.bf16.mxu1 %v2390_v25 }
  0x68   :  { %1051 = vmatprep.subr.bf16.mxu0 %v2217_v47 }
  0x6a   :  { %1212 = vmatpush1.bf16.msra.mxu1 %v2238_v54 }
  0x6b   :  { %1052 = vmatpush1.bf16.msra.mxu0 %v2215_v49  ;;  %1213 = vmatprep.subr.bf16.mxu1 %v2390_v25 }
  0x6c   :  { %1053 = vmatprep.subr.bf16.mxu0 %v2221_v50 }
  0x6e   :  { %1214 = vmatpush1.bf16.msra.mxu1 %v2242_v57 }
  0x6f   :  { %1054 = vmatpush1.bf16.msra.mxu0 %v2219_v51  ;;  %1215 = vmatprep.subr.bf16.mxu1 %v2390_v25 }
  0x70   :  { %1055 = vmatprep.subr.bf16.mxu0 %v2225_v53 }
  0x72   :  { %1216 = vmatpush1.bf16.msra.mxu1 %v988_v0 }
  0x73   :  { %1056 = vmatpush1.bf16.msra.mxu0 %v2223_v55  ;;  %1539 = vmatprep.subr.bf16.mxu1 %v2279_v61 }
  0x74   :  { %1057 = vmatprep.subr.bf16.mxu0 %v2229_v56 }
  0x75   :  { %1226 = vmatmul.mubr.bf16.vlgmr.msra.gmra.mrb[8].mxu1 %v2809_v2 }
  0x76   :  { %1540 = vmatpush1.bf16.msra.mxu1 %v2277_v1 }
  0x77   :  { %1058 = vmatpush1.bf16.msra.mxu0 %v2227_v59  ;;  %1541 = vmatprep.subr.bf16.mxu1 %v2282_v3 }
  0x78   :  { %1059 = vmatprep.subr.bf16.mxu0 %v2233_v60 }
  0x7a   :  { %1542 = vmatpush1.bf16.msra.mxu1 %v2280_v37 }
  0x7b   :  { %1060 = vmatpush1.bf16.msra.mxu0 %v2231_v62 }
  0x7c   :  { %1061 = vmatprep.subr.bf16.mxu0 %v2237_v63 }
  0x7f   :  { %1062 = vmatpush1.bf16.msra.mxu0 %v2235_v4 }
  0x80   :  { %1072 = vmatprep.subr.bf16.mxu0 %v2241_v5 }
  0x82   :  { %1064 = vmatmul.mubr.bf16.vlgmr.msra.gmra.mrb[0].mxu0 %v2672_v22 }
  0x83   :  { %1073 = vmatpush1.bf16.msra.mxu0 %v2239_v6  ;;  %1948 = vmatprep.mubr.msk.bf16.mxu0 %vm976_vm0, %v2678_v24 }
  0x84   :  { %1074 = vmatprep.subr.bf16.mxu0 %v2245_v7 }
  0x85   :  { %12 = vsyncpa [#allocation3], 0  ;;  %1543 = vmatprep.subr.bf16.mxu1 %v2285_v10  ;;  %v2247_v12 = vld [vmem:[%s3105_s1 + $0x330] ss:$12 sps:$4 sm:$0xff]   ;;  %v2252_v13 = vld [vmem:[%s3105_s1 + $0x34c] ss:$12 sps:$4 sm:$0xff]  }
  0x86   :  { %1544 = vmatpush1.bf16.msra.mxu1 %v2283_v9  ;;  %v2250_v14 = vld [vmem:[%s3105_s1 + $0x348] ss:$12 sps:$4 sm:$0xff]   ;;  %v2255_v15 = vld [vmem:[%s3105_s1 + $0x364] ss:$12 sps:$4 sm:$0xff]   ;;  %v2253_v16 = vld [vmem:[%s3105_s1 + $0x360] ss:$12 sps:$4 sm:$0xff]  }
  0x87   :  { %1075 = vmatpush1.bf16.msra.mxu0 %v2243_v8  ;;  %v2258_v17 = vld [vmem:[%s3105_s1 + $0x37c] ss:$12 sps:$4 sm:$0xff]   ;;  %v2256_v18 = vld [vmem:[%s3105_s1 + $0x378] ss:$12 sps:$4 sm:$0xff]   ;;  %v2261_v19 = vld [vmem:[%s3105_s1 + $0x394] ss:$12 sps:$4 sm:$0xff]  }
  0x88   :  { %1076 = vmatprep.subr.bf16.mxu0 %v2249_v11  ;;  %v2259_v20 = vld [vmem:[%s3105_s1 + $0x390] ss:$12 sps:$4 sm:$0xff]   ;;  %v2264_v21 = vld [vmem:[%s3105_s1 + $0x3ac] ss:$12 sps:$4 sm:$0xff]   ;;  %v2262_v22 = vld [vmem:[%s3105_s1 + $0x3a8] ss:$12 sps:$4 sm:$0xff]  }
  0x89   :  { %v2267_v23 = vld [vmem:[%s3105_s1 + $0x3c4] ss:$12 sps:$4 sm:$0xff]   ;;  %v2265_v24 = vld [vmem:[%s3105_s1 + $0x3c0] ss:$12 sps:$4 sm:$0xff]   ;;  %v2270_v26 = vld [vmem:[%s3105_s1 + $0x3dc] ss:$12 sps:$4 sm:$0xff]  }
  0x8a   :  { %v2286_v27 = vld [vmem:[%s3107_s3 + $0x30] ss:$8 sps:$4 sm:$0xff]   ;;  %v2288_v28 = vld [vmem:[%s3107_s3 + $0x34] ss:$8 sps:$4 sm:$0xff]   ;;  %v2289_v36 = vld [vmem:[%s3107_s3 + $0x40] ss:$8 sps:$4 sm:$0xff]  }
  0x8b   :  { %1077 = vmatpush1.bf16.msra.mxu0 %v2247_v12  ;;  %v2268_v29 = vld [vmem:[%s3105_s1 + $0x3d8] ss:$12 sps:$4 sm:$0xff]   ;;  %1545 = vmatprep.subr.bf16.mxu1 %v2288_v28  ;;  %v2273_v30 = vld [vmem:[%s3105_s1 + $0x3f4] ss:$12 sps:$4 sm:$0xff]   ;;  %v2271_v32 = vld [vmem:[%s3105_s1 + $0x3f0] ss:$12 sps:$4 sm:$0xff]  }
  0x8c   :  { %1078 = vmatprep.subr.bf16.mxu0 %v2252_v13  ;;  %1546 = vmatpush1.bf16.msra.mxu1 %v2286_v27  ;;  %v2274_v33 = vld [vmem:[%s3105_s1 + $0x40c] ss:$12 sps:$4 sm:$0x3f]   ;;  %v2276_v34 = vld [vmem:[%s3105_s1 + $0x408] ss:$12 sps:$4 sm:$0x3f]  }
  0x8d   :  { %v982_v35 = vsel %vm980_vm1, %v2276_v34, 0  ;;  %v2291_v38 = vld [vmem:[%s3107_s3 + $0x44] ss:$8 sps:$4 sm:$0xff]   ;;  %v2294_v39 = vld [vmem:[%s3107_s3 + $0x54] ss:$8 sps:$4 sm:$0xff]   ;;  %v217_v3 = vsub.s32 2, %v2516_v31 }
  0x8e   :  { %1547 = vmatprep.subr.bf16.mxu1 %v2291_v38  ;;  %v2292_v40 = vld [vmem:[%s3107_s3 + $0x50] ss:$8 sps:$4 sm:$0xff]   ;;  %v2297_v41 = vld [vmem:[%s3107_s3 + $0x64] ss:$8 sps:$4 sm:$0xff]   ;;  %v2295_v42 = vld [vmem:[%s3107_s3 + $0x60] ss:$8 sps:$4 sm:$0xff]  }
  0x8f   :  { %1079 = vmatpush1.bf16.msra.mxu0 %v2250_v14  ;;  %v2300_v43 = vld [vmem:[%s3107_s3 + $0x74] ss:$8 sps:$4 sm:$0xff]   ;;  %v2298_v44 = vld [vmem:[%s3107_s3 + $0x70] ss:$8 sps:$4 sm:$0xff]   ;;  %v2303_v45 = vld [vmem:[%s3107_s3 + $0x84] ss:$8 sps:$4 sm:$0xff]  }
  0x90   :  { %1080 = vmatprep.subr.bf16.mxu0 %v2255_v15  ;;  %1548 = vmatpush1.bf16.msra.mxu1 %v2289_v36  ;;  %v2301_v46 = vld [vmem:[%s3107_s3 + $0x80] ss:$8 sps:$4 sm:$0xff]   ;;  %v2306_v47 = vld [vmem:[%s3107_s3 + $0x94] ss:$8 sps:$4 sm:$0xff]   ;;  %v2304_v48 = vld [vmem:[%s3107_s3 + $0x90] ss:$8 sps:$4 sm:$0xff]  }
  0x91   :  { %1549 = vmatprep.subr.bf16.mxu1 %v2294_v39  ;;  %v2309_v49 = vld [vmem:[%s3107_s3 + $0xa4] ss:$8 sps:$4 sm:$0xff]   ;;  %v2307_v50 = vld [vmem:[%s3107_s3 + $0xa0] ss:$8 sps:$4 sm:$0xff]   ;;  %v2312_v51 = vld [vmem:[%s3107_s3 + $0xb4] ss:$8 sps:$4 sm:$0xff]  }
  0x92   :  { %v2310_v52 = vld [vmem:[%s3107_s3 + $0xb0] ss:$8 sps:$4 sm:$0xff]   ;;  %v2315_v53 = vld [vmem:[%s3107_s3 + $0xc4] ss:$8 sps:$4 sm:$0xff]   ;;  %v2313_v54 = vld [vmem:[%s3107_s3 + $0xc0] ss:$8 sps:$4 sm:$0xff]  }
  0x93   :  { %1081 = vmatpush1.bf16.msra.mxu0 %v2253_v16  ;;  %v2318_v55 = vld [vmem:[%s3107_s3 + $0xd4] ss:$8 sps:$4 sm:$0xff]   ;;  %v2316_v56 = vld [vmem:[%s3107_s3 + $0xd0] ss:$8 sps:$4 sm:$0xff]   ;;  %v2321_v62 = vld [vmem:[%s3107_s3 + $0xe4] ss:$8 sps:$4 sm:$0xff]  }
  0x94   :  { %1082 = vmatprep.subr.bf16.mxu0 %v2258_v17  ;;  %1550 = vmatpush1.bf16.msra.mxu1 %v2292_v40  ;;  %v2319_v63 = vld [vmem:[%s3107_s3 + $0xe0] ss:$8 sps:$4 sm:$0xff]   ;;  %v2324_v0 = vld [vmem:[%s3107_s3 + $0xf4] ss:$8 sps:$4 sm:$0xff]   ;;  %v2322_v1 = vld [vmem:[%s3107_s3 + $0xf0] ss:$8 sps:$4 sm:$0xff]  }
  0x95   :  { %1551 = vmatprep.subr.bf16.mxu1 %v2297_v41  ;;  %v205_v4 = vld [vmem:[%s3106_s2] sm:$0x7]  ;;  %v2351_v14 = vld [vmem:[%s3109_s5 + $0x48] sm:$0xff]   ;;  %v2353_v16 = vld [vmem:[%s3109_s5 + $0x50] sm:$0xff]  }
  0x96   :  { %v218_v5 = vrot.slane %v205_v4, %v217_v3  ;;  %v2349_v12 = vld [vmem:[%s3109_s5 + $0x40] sm:$0xff]   ;;  %v2352_v15 = vld [vmem:[%s3109_s5 + $0x8] sm:$0xff]   ;;  %v2354_v17 = vld [vmem:[%s3109_s5 + $0x10] sm:$0xff]  }
  0x97   :  { %1083 = vmatpush1.bf16.msra.mxu0 %v2256_v18  ;;  %v2350_v13 = vld [vmem:[%s3109_s5] sm:$0xff]   ;;  %v2355_v18 = vld [vmem:[%s3109_s5 + $0x58] sm:$0xff]  }
  0x98   :  { %1084 = vmatprep.subr.bf16.mxu0 %v2261_v19  ;;  %1552 = vmatpush1.bf16.msra.mxu1 %v2295_v42  ;;  %v2356_v19 = vld [vmem:[%s3109_s5 + $0x18] sm:$0xff]  }
  0x99   :  { %1553 = vmatprep.subr.bf16.mxu1 %v2300_v43 }
  0x9b   :  { %1085 = vmatpush1.bf16.msra.mxu0 %v2259_v20  ;;  %v2357_v20 = vld [vmem:[%s3109_s5 + $0x60] sm:$0xff]  }
  0x9c   :  { %1086 = vmatprep.subr.bf16.mxu0 %v2264_v21  ;;  %1554 = vmatpush1.bf16.msra.mxu1 %v2298_v44  ;;  %v2358_v21 = vld [vmem:[%s3109_s5 + $0x20] sm:$0xff]  }
  0x9d   :  { %1555 = vmatprep.subr.bf16.mxu1 %v2303_v45  ;;  %v2325_v45 = vld [vmem:[%s3107_s3 + $0x100] ss:$8 sps:$4 sm:$0xff]  }
  0x9f   :  { %1087 = vmatpush1.bf16.msra.mxu0 %v2262_v22  ;;  %v2359_v22 = vld [vmem:[%s3109_s5 + $0x68] sm:$0xff]  }
  0xa0   :  { %1088 = vmatprep.subr.bf16.mxu0 %v2267_v23  ;;  %1556 = vmatpush1.bf16.msra.mxu1 %v2301_v46  ;;  %v2360_v23 = vld [vmem:[%s3109_s5 + $0x28] sm:$0xff]  }
  0xa1   :  { %1557 = vmatprep.subr.bf16.mxu1 %v2306_v47  ;;  %v2328_v47 = vld [vmem:[%s3107_s3 + $0x110] ss:$8 sps:$4 sm:$0xff]  }
  0xa3   :  { %1089 = vmatpush1.bf16.msra.mxu0 %v2265_v24 }
  0xa4   :  { %1090 = vmatprep.subr.bf16.mxu0 %v2270_v26  ;;  %1558 = vmatpush1.bf16.msra.mxu1 %v2304_v48  ;;  %v2333_v48 = vld [vmem:[%s3107_s3 + $0x124] ss:$8 sps:$4 sm:$0xff]  }
  0xa5   :  { %1559 = vmatprep.subr.bf16.mxu1 %v2309_v49  ;;  %v2331_v49 = vld [vmem:[%s3107_s3 + $0x120] ss:$8 sps:$4 sm:$0xff]  }
  0xa7   :  { %1091 = vmatpush1.bf16.msra.mxu0 %v2268_v29 }
  0xa8   :  { %1092 = vmatprep.subr.bf16.mxu0 %v2273_v30  ;;  %1560 = vmatpush1.bf16.msra.mxu1 %v2307_v50  ;;  %v209_v30 = vsub.s32 0, %v2516_v31  ;;  %v2336_v50 = vld [vmem:[%s3107_s3 + $0x134] ss:$8 sps:$4 sm:$0xff]  }
  0xa9   :  { %1561 = vmatprep.subr.bf16.mxu1 %v2312_v51  ;;  %v2339_v51 = vld [vmem:[%s3107_s3 + $0x144] ss:$8 sps:$4 sm:$0xff]  }
  0xab   :  { %1093 = vmatpush1.bf16.msra.mxu0 %v2271_v32  ;;  %v213_v32 = vsub.s32 1, %v2516_v31  ;;  %v2330_v31 = vld [vmem:[%s3107_s3 + $0x114] ss:$8 sps:$4 sm:$0xff]  }
  0xac   :  { %1947 = vmatprep.subr.msk.bf16.mxu0 %vm980_vm1, %v2274_v33  ;;  %1562 = vmatpush1.bf16.msra.mxu1 %v2310_v52  ;;  %v210_v33 = vrot.slane %v205_v4, %v209_v30  ;;  %v2337_v52 = vld [vmem:[%s3107_s3 + $0x140] ss:$8 sps:$4 sm:$0xff]  }
  0xad   :  { %1563 = vmatprep.subr.bf16.mxu1 %v2315_v53  ;;  %v214_v34 = vrot.slane %v205_v4, %v213_v32  ;;  %v2342_v53 = vld [vmem:[%s3107_s3 + $0x154] ss:$8 sps:$4 sm:$0xff]  }
  0xaf   :  { %1095 = vmatpush1.bf16.msra.mxu0 %v982_v35 }
  0xb0   :  { %1564 = vmatpush1.bf16.msra.mxu1 %v2313_v54  ;;  %2059 = vmatprep.subr.bf16.mxu0 %v2349_v12  ;;  %v2340_v54 = vld [vmem:[%s3107_s3 + $0x150] ss:$8 sps:$4 sm:$0xff]  }
  0xb1   :  { %1565 = vmatprep.subr.bf16.mxu1 %v2318_v55  ;;  %v2345_v55 = vld [vmem:[%s3107_s3 + $0x164] ss:$8 sps:$4 sm:$0xff]  }
  0xb2   :  { %1105 = vmatmul.mubr.bf16.vlgmr.msra.gmra.mrb[0].mxu0 %v2809_v2  ;;  %v2327_v2 = vld [vmem:[%s3107_s3 + $0x104] ss:$8 sps:$4 sm:$0xff]  }
  0xb3   :  { %2060 = vmatpush3.bf16.msra.mxu0 %v2350_v13 }
  0xb4   :  { %1566 = vmatpush1.bf16.msra.mxu1 %v2316_v56  ;;  %2061 = vmatprep.subr.bf16.mxu0 %v2351_v14  ;;  %v2343_v56 = vld [vmem:[%s3107_s3 + $0x160] ss:$8 sps:$4 sm:$0xff]  }
  0xb5   :  { %1567 = vmatprep.subr.bf16.mxu1 %v2321_v62  ;;  %v2362_v62 = vld [vmem:[%s3109_s5 + $0x30] sm:$0xff]  }
  0xb7   :  { %2062 = vmatpush3.bf16.msra.mxu0 %v2352_v15  ;;  %v1998_v15 = vld [vmem:[%s3110_s6] ss:$0 sm:$0xff] }
  0xb8   :  { %1568 = vmatpush1.bf16.msra.mxu1 %v2319_v63  ;;  %2063 = vmatprep.subr.bf16.mxu0 %v2353_v16  ;;  %v2363_v63 = vld [vmem:[%s3109_s5 + $0x78] sm:$0xff]  }
  0xb9   :  { %1569 = vmatprep.subr.bf16.mxu1 %v2324_v0  ;;  %v2364_v0 = vld [vmem:[%s3109_s5 + $0x38] sm:$0xff]  }
  0xbb   :  { %2064 = vmatpush3.bf16.msra.mxu0 %v2354_v17 }
  0xbc   :  { %1570 = vmatpush1.bf16.msra.mxu1 %v2322_v1  ;;  %2065 = vmatprep.subr.bf16.mxu0 %v2355_v18  ;;  %v1287_v1 = vld [vmem:[%s3108_s4] sm:$0x3]  ;;  %s2391_s4 = smov [#allocation2]  }
  0xbd   :  { %1580 = vmatprep.subr.bf16.mxu1 %v2327_v2  ;;  %v1292_v2 = vrot.slane %v1287_v1, %v209_v30  ;;  %v1296_v3 = vrot.slane %v1287_v1, %v213_v32  ;;  %s1807_s0 = sshll.u32 %s2391_s4, 4  ;;  %s1808_s0 = int_to_ptr.vmem [resolvable:$true] %s1807_s0 }
  0xbe   :  { %s2365_s10 = scalar_lea.vmem %s1808_s0, 32  ;;  %p2370_p1 = scmp.lt.s32.totalorder %s1808_s0, %s1808_s0 }
  0xbf   :  { %2066 = vmatpush3.bf16.msra.mxu0 %v2356_v19  ;;  %p2366_p0 = scmp.ne.s32.totalorder %s1808_s0, %s2365_s10  ;;  %p2371_p2 = scmp.lt.s32.totalorder %s2365_s10, %s2365_s10 }
  0xc0   :  { %2067 = vmatprep.subr.bf16.mxu0 %v2357_v20 }
  0xc1   :  { %p2372_p3 = por %p2371_p2, %p2370_p1 }
  0xc3   :  { %2068 = vmatpush3.bf16.msra.mxu0 %v2358_v21  ;;  %p2373_p4 = pnand %p2372_p3, %p2366_p0 }
  0xc4   :  { %2069 = vmatprep.subr.bf16.mxu0 %v2359_v22 }
  0xc7   :  { %2070 = vmatpush3.bf16.msra.mxu0 %v2360_v23 }
  0xf8   :  { %v2031_v57 = vpop.f32.mrb[0].mxu1 }
  0xf9   :  { %v2032_v58 = vpop.f32.mrb[1].mxu1 }
  0xfa   :  { %v2033_v59 = vadd.f32 %v2032_v58, %v2031_v57  ;;  %v2034_v60 = vpop.f32.mrb[2].mxu1  ;;  %v2348_v57 = vld [vmem:[%s3107_s3 + $0x174] ss:$8 sps:$4 sm:$0xff]   ;;  %v2346_v58 = vld [vmem:[%s3107_s3 + $0x170] ss:$8 sps:$4 sm:$0xff]  }
  0xfb   :  { %v2035_v61 = vpop.f32.mrb[3].mxu1 }
  0xfc   :  { %v1148_v37 = vadd.f32 %v2033_v59, %v218_v5  ;;  %v2361_v61 = vld [vmem:[%s3109_s5 + $0x70] sm:$0xff]  }
  0xfd   :  { %2071 = vmatprep.subr.bf16.mxu0 %v2361_v61 }
  0xfe   :  { %2072 = vmatpush3.bf16.msra.mxu0 %v2362_v62 }
  0xff   :  { %2073 = vmatprep.subr.bf16.mxu0 %v2363_v63 }
 0x102   :  { %2074 = vmatpush3.bf16.msra.mxu0 %v2364_v0 }
 0x118   :  { %v2053_v6 = vpop.f32.mrb[4].mxu1 }
 0x119   :  { %v2054_v7 = vpop.f32.mrb[5].mxu1 }
 0x11a   :  { %v2055_v8 = vadd.f32 %v2054_v7, %v2053_v6  ;;  %v2056_v9 = vpop.f32.mrb[6].mxu1 }
 0x11b   :  { %v2057_v10 = vpop.f32.mrb[7].mxu1 }
 0x11c   :  { %v1188_v11 = vadd.f32 %v2055_v8, %v1148_v37 }
 0x148   :  { %v1227_v24 = vpop.f32.mrb[8].mxu1 }
 0x149   :  { %v1228_v26 = vadd.f32 %v1227_v24, %v1188_v11  ;;  %v1229_v27 = vpop.f32.mrb[9].mxu1 }
 0x14a   :  { %v1230_v28 = vpop.f32.mrb[10].mxu1 }
 0x14b   :  { %v1231_v29 = vpop.f32.mrb[11].mxu1  ;;  %v1235_v59 = vmax.f32 %v1228_v26, 0.0 }
 0x14d   :  { %v1238_v60 = vpack.c.bf16 %v1235_v59, %v1235_v59 }
 0x185   :  { %v1106_v35 = vpop.f32.mrb[0].mxu0 }
 0x186   :  { %v2081_v36 = vadd.f32 %v1106_v35, %v210_v33  ;;  %v1108_v38 = vpop.f32.mrb[1].mxu0 }
 0x187   :  { %v2082_v39 = vadd.f32 %v1108_v38, %v214_v34  ;;  %v1110_v40 = vpop.f32.mrb[2].mxu0 }
 0x188   :  { %v1233_v41 = vmax.f32 %v2081_v36, 0.0  ;;  %v1111_v42 = vpop.f32.mrb[3].mxu0 }
 0x189   :  { %v1234_v43 = vmax.f32 %v2082_v39, 0.0 }
 0x18a   :  { %v1236_v46 = vpack.c.bf16 %v1233_v41, %v1233_v41 }
 0x18b   :  { %v1237_v44 = vpack.c.bf16 %v1234_v43, %v1234_v43 }
 0x18d   :  { %1571 = vmatprep.mubr.bf16.mxu1 %v1237_v44 }
 0x18e   :  { %1572 = vmatmul.mubr.bf16.vlgmr.msra.gmra.mrb[12].mxu1 %v1236_v46 }
 0x18f   :  { %1581 = vmatpush1.bf16.msra.mxu1 %v2325_v45  ;;  %1612 = vmatprep.mubr.bf16.mxu1 %v2390_v25  ;;  %v2334_v25 = vld [vmem:[%s3107_s3 + $0x130] ss:$8 sps:$4 sm:$0xff]  }
 0x190   :  { %1582 = vmatprep.subr.bf16.mxu1 %v2330_v31 }
 0x193   :  { %1583 = vmatpush1.bf16.msra.mxu1 %v2328_v47 }
 0x194   :  { %1584 = vmatprep.subr.bf16.mxu1 %v2333_v48 }
 0x197   :  { %1585 = vmatpush1.bf16.msra.mxu1 %v2331_v49 }
 0x198   :  { %1586 = vmatprep.subr.bf16.mxu1 %v2336_v50 }
 0x19b   :  { %1587 = vmatpush1.bf16.msra.mxu1 %v2334_v25 }
 0x19c   :  { %1588 = vmatprep.subr.bf16.mxu1 %v2339_v51 }
 0x19f   :  { %1589 = vmatpush1.bf16.msra.mxu1 %v2337_v52 }
 0x1a0   :  { %1590 = vmatprep.subr.bf16.mxu1 %v2342_v53 }
 0x1a3   :  { %1591 = vmatpush1.bf16.msra.mxu1 %v2340_v54 }
 0x1a4   :  { %1592 = vmatprep.subr.bf16.mxu1 %v2345_v55 }
 0x1a7   :  { %1593 = vmatpush1.bf16.msra.mxu1 %v2343_v56 }
 0x1a8   :  { %1594 = vmatprep.subr.bf16.mxu1 %v2348_v57 }
 0x1ab   :  { %1595 = vmatpush1.bf16.msra.mxu1 %v2346_v58 }
 0x1ae   :  { %1613 = vmatmul.mubr.bf16.vlgmr.msra.gmra.mrb[12].mxu1 %v1238_v60 }
 0x281   :  { %v1614_v4 = vpop.f32.mrb[12].mxu1 }
 0x282   :  { %v2083_v5 = vadd.f32 %v1614_v4, %v1292_v2  ;;  %v1616_v37 = vpop.f32.mrb[13].mxu1 }
 0x283   :  { %v2084_v6 = vadd.f32 %v1616_v37, %v1296_v3  ;;  %v1618_v7 = vpop.f32.mrb[14].mxu1 }
 0x284   :  { %v1621_v8 = vmax.f32 %v2083_v5, 0.0  ;;  %v1619_v9 = vpop.f32.mrb[15].mxu1 }
 0x285   :  { %v1622_v10 = vmax.f32 %v2084_v6, 0.0 }
 0x286   :  { %v1623_v12 = vpack.c.bf16 %v1621_v8, %v1621_v8 }
 0x287   :  { %v1624_v11 = vpack.c.bf16 %v1622_v10, %v1622_v10 }
 0x289   :  { %1792 = vmatprep.mubr.bf16.mxu0 %v1624_v11 }
 0x28a   :  { %1793 = vmatmul.mubr.bf16.vlgmr.msra.gmra.mrb[4].mxu0 %v1623_v12 }
 0x35d   :  { %v2075_v13 = vpop.f32.mrb[4].mxu0 }
 0x35e   :  { %v2076_v14 = vpop.f32.mrb[5].mxu0 }
 0x35f   :  { %v2077_v16 = vadd.f32 %v2076_v14, %v2075_v13  ;;  %v2078_v17 = vpop.f32.mrb[6].mxu0 }
 0x360   :  { %v2079_v18 = vpop.f32.mrb[7].mxu0 }
 0x361   :  { %v1795_v19 = vadd.f32 %v2077_v16, %v1998_v15 }
 0x363   :  { %1800 = vst [vmem:[#allocation2] sm:$0x3] %v1795_v19 }
 0x364   :  { %2376 = shalt.err (!%p2373_p4)
}
 0x365   :  { %s2377_s13 = scalar_lea.hbm %s3111_s7, 32 }
 0x366   :  { %p2378_p5 = scmp.ne.s32.totalorder %s3111_s7, %s2377_s13  ;;  %p2381_p6 = scmp.lt.u32.totalorder %s2377_s13, %s3111_s7 }
 0x368   :  { %p2383_p7 = pnand %p2381_p6, %p2378_p5 }
 0x36a   :  { %2386 = shalt.err (!%p2383_p7)
}
 0x36b   :  { %1810 = dma.vmem_to_hbm [thread:$0]  %s1808_s0, 32, %s3111_s7, [#allocation3]  }
 0x36c   :  { %2387 = dma.done.wait [#allocation3], 32  }
 0x36d   :  { %2388 = vsyncadd [#allocation3], 4294967264 }
 0x36e   :  { %1814 = vsyncpa [#allocation3], 1 }

</bundles_post_ra>
